<compile_context>
chip_gen: v7x
topology: tpu7x:2x2x1
jax: 0.10.0
libtpu: 0.0.40
codegen_flags: <defaults>
</compile_context>

<pallas_src>
import jax
import jax.numpy as jnp
import numpy as np
from jax import lax
from jax.experimental import pallas as pl
from jax.experimental.pallas import tpu as pltpu

BN_EPS = 1e-5
NUM_CLASSES = 10
LANE = 128

# Static geometry.
H1, W1, C0 = 32, 32, 3
H2, W2 = 16, 16
H3, W3 = 8, 8
C1, C2, C3 = 32, 64, 128
KK = 9 * C0                      # layer-1 im2col feature width (27)

# Padded row widths for layers 2/3 (layer 1 needs no padded buffer anymore).
# Image pixel (h, w) of layer l lives at flat row (h + 2) * P_l + w of its
# padded VMEM buffer; rows/columns outside the image stay exactly zero and
# double as the conv's zero padding.
P2, P3 = 32, 16
HP2, HP3 = H2 + 4, H3 + 4


def _conv_bn_relu_pool(inp_ref, w_ref, t_ref, rbuf, *, H, W, P, Cout):
    """3x3 conv (stride 1, SAME) + folded bias/BN shift + ReLU + 2x2 max-pool.

    inp_ref: (Hp*P, Cin) f32 zero-padded flat buffer; pixel (h, w) at row
             (h + 2) * P + w, everything outside the image exactly zero.
    w_ref:   (9, Cin, Cout) bf16 conv taps with BN scale folded in, tap = dy*3+dx.
    t_ref:   (1, Cout) f32 folded shift: (conv_bias - mean) * scale + beta.
    rbuf:    (H//2 * P, Cout) f32 scratch for the row-pooled intermediate.
    Returns (H//2 * P//2, Cout) f32; row g*(P//2) + j is pooled pixel (g, j),
    valid only for j < W//2 (other rows hold garbage and must not be consumed).
    """
    M = H * P
    Ho, Q = H // 2, P // 2
    base = P - 1                  # tap (dy,dx): output m = h*P+w reads m + base + dy*P + dx
    acc = None
    for t in range(9):
        dy, dx = divmod(t, 3)
        patch = inp_ref[pl.ds(base + dy * P + dx, M), :].astype(jnp.bfloat16)
        part = jnp.dot(patch, w_ref[t], preferred_element_type=jnp.float32)
        acc = part if acc is None else acc + part
    y = jnp.maximum(acc + t_ref[...], 0.0)                          # (M, Cout) f32

    # 2x2 max-pool: rows via aligned reshape/slices (2P % 8 == 0), columns via
    # stride-2 ref reads that also compact the padded row width P -> Q.
    y = y.reshape(Ho, 2 * P, Cout)
    rbuf[...] = jnp.maximum(y[:, :P, :], y[:, P:, :]).reshape(Ho * P, Cout)
    return jnp.maximum(rbuf[pl.ds(0, Ho * Q, stride=2), :],
                       rbuf[pl.ds(1, Ho * Q, stride=2), :])


def _cnn_kernel(xp_ref, w1_ref, t1_ref, w2_ref, t2_ref, w3_ref, t3_ref,
                wfc_ref, bfc_ref, o_ref, buf2, buf3, rbuf1, rbuf2, rbuf3):
    # Scratch persists across grid steps (and the batch axis may be split over
    # TensorCores), so re-establish the zero padding every step (cheap).
    buf2[...] = jnp.zeros_like(buf2)
    buf3[...] = jnp.zeros_like(buf3)

    # ---- Layer 1: conv3x3 as ONE im2col matmul (patches built in the wrapper,
    # K = 27), folded BN shift, ReLU, 2x2 max-pool.  Compact layout m = h*W1+w.
    a1 = jnp.dot(xp_ref[0], w1_ref[...], preferred_element_type=jnp.float32)   # (1024, C1)
    y1 = jnp.maximum(a1 + t1_ref[...], 0.0)
    y1 = y1.reshape(H1 // 2, 2 * W1, C1)
    rbuf1[...] = jnp.maximum(y1[:, :W1, :], y1[:, W1:, :]).reshape((H1 // 2) * W1, C1)
    p1 = jnp.maximum(rbuf1[pl.ds(0, (H1 // 2) * (W1 // 2), stride=2), :],
                     rbuf1[pl.ds(1, (H1 // 2) * (W1 // 2), stride=2), :])      # (256, C1)
    # Hand off into layer 2's zero-padded buffer (16 aligned 16-row stores).
    for h in range(H2):
        buf2[pl.ds((h + 2) * P2, W2), :] = p1[h * W2:(h + 1) * W2, :]

    # ---- Layer 2.
    p2 = _conv_bn_relu_pool(buf2, w2_ref, t2_ref, rbuf2, H=H2, W=W2, P=P2, Cout=C2)
    for h in range(H3):  # only the W3 valid columns of each pooled row band
        buf3[pl.ds((h + 2) * P3, W3), :] = p2[h * (P2 // 2):h * (P2 // 2) + W3, :]

    # ---- Layer 3.
    p3 = _conv_bn_relu_pool(buf3, w3_ref, t3_ref, rbuf3, H=H3, W=W3, P=P3, Cout=C3)
    # p3: (32, C3); pooled pixel (g, j) at row g*8 + j, valid for j < 4.
    row_id = lax.broadcasted_iota(jnp.int32, (4 * (P3 // 2), C3), 0)
    p3 = jnp.where((row_id % (P3 // 2)) < 4, p3, 0.0)               # zero garbage rows

    # ---- Fused Linear head: wfc is re-laid-out offline to the kernel's
    # (row = g*8 + j, lane = channel) order; logits stay lane-dense (128 wide).
    lane = lax.broadcasted_iota(jnp.int32, (1, LANE), 1)
    logits = bfc_ref[...]                                           # (1, 128) f32
    for k in range(NUM_CLASSES):
        contrib = jnp.sum(p3 * wfc_ref[k], axis=0, keepdims=True)   # (1, C3)
        contrib = jnp.sum(contrib, axis=1, keepdims=True)           # (1, 1)
        logits = logits + jnp.where(lane == k, contrib, 0.0)
    o_ref[0] = logits


def cnn_forward(params, x_nchw):
    """CNN.forward: 3 x (Conv3x3 + BatchNorm + ReLU + MaxPool2) -> Flatten -> Linear."""
    n = x_nchw.shape[0]
    x = jnp.transpose(x_nchw, (0, 2, 3, 1))                         # NHWC (n,32,32,3)

    # Layer-1 im2col patches (layout plumbing only): feature = (dy*3+dx)*3 + ci.
    xpad = jnp.pad(x, ((0, 0), (1, 1), (1, 1), (0, 0)))
    pats = jnp.stack([xpad[:, dy:dy + H1, dx:dx + W1, :]
                      for dy in range(3) for dx in range(3)], axis=3)
    pats = pats.reshape(n, H1 * W1, KK).astype(jnp.bfloat16)

    def prep_conv(layer):
        # TODO(synk): BatchNorm2d is applied in eval mode (running statistics);
        # training-mode per-batch statistics are not implemented.
        scale = layer["gamma"] / jnp.sqrt(layer["running_var"] + BN_EPS)
        shift = (layer["b"] - layer["running_mean"]) * scale + layer["beta"]
        cin, cout = layer["w"].shape[2], layer["w"].shape[3]
        # BN scale folded into the weights offline.
        w = (layer["w"] * scale).reshape(9, cin, cout).astype(jnp.bfloat16)
        return w, shift.reshape(1, cout).astype(jnp.float32)

    w1, t1 = prep_conv(params["conv"][0])
    w1 = w1.reshape(KK, C1)                                         # (27, 32) im2col weight
    w2, t2 = prep_conv(params["conv"][1])
    w3, t3 = prep_conv(params["conv"][2])

    # FC weights re-laid-out (offline, weight-side only) to the kernel's
    # (row = g*8 + j, lane = channel) order.  Torch flattens NCHW, i.e.
    # feature index = c*16 + g*4 + j; rows with j >= 4 are zero-padded.
    wfc = params["fc_w"].reshape(NUM_CLASSES, C3, 4, 4)             # (k, c, g, j)
    wfc = jnp.transpose(wfc, (0, 2, 3, 1))                          # (k, g, j, c)
    wfc = jnp.pad(wfc, ((0, 0), (0, 0), (0, 4), (0, 0)))            # j: 4 -> 8
    wfc = wfc.reshape(NUM_CLASSES, 4 * 8, C3).astype(jnp.float32)
    bfc = jnp.pad(params["fc_b"], (0, LANE - NUM_CLASSES)).reshape(1, LANE).astype(jnp.float32)

    out = pl.pallas_call(
        _cnn_kernel,
        out_shape=jax.ShapeDtypeStruct((n, 1, LANE), jnp.float32),
        grid=(n,),
        in_specs=[
            pl.BlockSpec((1, H1 * W1, KK), lambda i: (i, 0, 0)),
            pl.BlockSpec((KK, C1), lambda i: (0, 0)),
            pl.BlockSpec((1, C1), lambda i: (0, 0)),
            pl.BlockSpec((9, C1, C2), lambda i: (0, 0, 0)),
            pl.BlockSpec((1, C2), lambda i: (0, 0)),
            pl.BlockSpec((9, C2, C3), lambda i: (0, 0, 0)),
            pl.BlockSpec((1, C3), lambda i: (0, 0)),
            pl.BlockSpec((NUM_CLASSES, 4 * 8, C3), lambda i: (0, 0, 0)),
            pl.BlockSpec((1, LANE), lambda i: (0, 0)),
        ],
        out_specs=pl.BlockSpec((1, 1, LANE), lambda i: (i, 0, 0)),
        scratch_shapes=[
            pltpu.VMEM((HP2 * P2, C1), jnp.float32),                # buf2 (padded act, layer 2)
            pltpu.VMEM((HP3 * P3, C2), jnp.float32),                # buf3 (padded act, layer 3)
            pltpu.VMEM(((H1 // 2) * W1, C1), jnp.float32),          # rbuf1
            pltpu.VMEM(((H2 // 2) * P2, C2), jnp.float32),          # rbuf2
            pltpu.VMEM(((H3 // 2) * P3, C3), jnp.float32),          # rbuf3
        ],
        compiler_params=pltpu.CompilerParams(
            dimension_semantics=("parallel",)),
    )(pats, w1, t1, w2, t2, w3, t3, wfc, bfc)
    return out[:, 0, :NUM_CLASSES]


def init_cnn_params(key, in_channels=3, growth_rate=32, num_layers=3,
                    num_classes=10, hidden_size=2048):
    """Deterministic synthetic parameters for CNN(in_size=1024, growth_rate=32,
    num_layers=3, num_classes=10, in_channels=3)."""
    params = {"conv": []}
    chans = [in_channels] + [growth_rate * 2 ** i for i in range(num_layers)]
    for i in range(num_layers):
        cin, cout = chans[i], chans[i + 1]
        key, kw, kb, kg, kbt, km, kv = jax.random.split(key, 7)
        params["conv"].append(dict(
            w=jax.random.normal(kw, (3, 3, cin, cout), jnp.float32) / np.sqrt(9.0 * cin),
            b=0.1 * jax.random.normal(kb, (cout,), jnp.float32),
            gamma=1.0 + 0.1 * jax.random.normal(kg, (cout,), jnp.float32),
            beta=0.1 * jax.random.normal(kbt, (cout,), jnp.float32),
            running_mean=0.1 * jax.random.normal(km, (cout,), jnp.float32),
            running_var=jax.random.uniform(kv, (cout,), jnp.float32, 0.5, 1.5),
        ))
    key, kfw, kfb = jax.random.split(key, 3)
    params["fc_w"] = jax.random.normal(kfw, (num_classes, hidden_size),
                                       jnp.float32) / np.sqrt(hidden_size)
    params["fc_b"] = 0.1 * jax.random.normal(kfb, (num_classes,), jnp.float32)
    return params


def cnn_forward_reference(params, x_nchw):
    """Pure-JAX reference (same math, un-fused), for verification only."""
    x = jnp.transpose(x_nchw, (0, 2, 3, 1))
    for layer in params["conv"]:
        y = lax.conv_general_dilated(
            x, layer["w"], window_strides=(1, 1), padding="SAME",
            dimension_numbers=("NHWC", "HWIO", "NHWC"),
            precision=lax.Precision.HIGHEST) + layer["b"]
        y = (y - layer["running_mean"]) / jnp.sqrt(layer["running_var"] + BN_EPS)
        y = layer["gamma"] * y + layer["beta"]
        y = jnp.maximum(y, 0.0)
        x = lax.reduce_window(y, -jnp.inf, lax.max,
                              (1, 2, 2, 1), (1, 2, 2, 1), "VALID")
    n = x.shape[0]
    feats = jnp.transpose(x, (0, 3, 1, 2)).reshape(n, -1)           # torch Flatten order
    return jnp.dot(feats, params["fc_w"].T,
                   precision=lax.Precision.HIGHEST) + params["fc_b"]


if __name__ == "__main__":
    key = jax.random.PRNGKey(0)
    kp, kx = jax.random.split(key)
    params = init_cnn_params(kp)
    # Small CIFAR-shaped batch (NCHW, like the PyTorch module's input).
    x = jax.random.normal(kx, (2, 3, 32, 32), jnp.float32)

    logits = jax.jit(cnn_forward)(params, x)
    logits = jax.block_until_ready(logits)

    ref = cnn_forward_reference(params, x)
    assert logits.shape == (2, 10), logits.shape
    assert bool(jnp.all(jnp.isfinite(logits)))
    assert bool(jnp.allclose(logits, ref, rtol=2e-2, atol=2e-2)), (
        float(jnp.max(jnp.abs(logits - ref))))
    print("KERNEL_OK")
</pallas_src>

<mosaic_0001>
module attributes {stable_mosaic.version = 11 : i64} {
  func.func @_cnn_kernel(%arg0: i32, %arg1: memref<1x1024x27xbf16, #tpu.memory_space<vmem>>, %arg2: memref<27x32xbf16, #tpu.memory_space<vmem>>, %arg3: memref<1x32xf32, #tpu.memory_space<vmem>>, %arg4: memref<9x32x64xbf16, #tpu.memory_space<vmem>>, %arg5: memref<1x64xf32, #tpu.memory_space<vmem>>, %arg6: memref<9x64x128xbf16, #tpu.memory_space<vmem>>, %arg7: memref<1x128xf32, #tpu.memory_space<vmem>>, %arg8: memref<10x32x128xf32, #tpu.memory_space<vmem>>, %arg9: memref<1x128xf32, #tpu.memory_space<vmem>>, %arg10: memref<1x1x128xf32, #tpu.memory_space<vmem>>, %arg11: memref<640x32xf32, #tpu.memory_space<vmem>>, %arg12: memref<192x64xf32, #tpu.memory_space<vmem>>, %arg13: memref<512x32xf32, #tpu.memory_space<vmem>>, %arg14: memref<256x64xf32, #tpu.memory_space<vmem>>, %arg15: memref<64x128xf32, #tpu.memory_space<vmem>>) attributes {dimension_semantics = [#tpu.dimension_semantics<parallel>], iteration_bounds = array<i64: 2>, scalar_prefetch = 0 : i64, scratch_operands = 5 : i64, tpu.core_type = #tpu.core_type<tc>, window_params = [{transform_indices = @transform_0, window_bounds = array<i64: 1, 1024, 27>}, {pipeline_mode = #tpu.pipeline_mode<synchronous>, transform_indices = @transform_1, window_bounds = array<i64: 27, 32>}, {pipeline_mode = #tpu.pipeline_mode<synchronous>, transform_indices = @transform_2, window_bounds = array<i64: 1, 32>}, {pipeline_mode = #tpu.pipeline_mode<synchronous>, transform_indices = @transform_3, window_bounds = array<i64: 9, 32, 64>}, {pipeline_mode = #tpu.pipeline_mode<synchronous>, transform_indices = @transform_4, window_bounds = array<i64: 1, 64>}, {pipeline_mode = #tpu.pipeline_mode<synchronous>, transform_indices = @transform_5, window_bounds = array<i64: 9, 64, 128>}, {pipeline_mode = #tpu.pipeline_mode<synchronous>, transform_indices = @transform_6, window_bounds = array<i64: 1, 128>}, {pipeline_mode = #tpu.pipeline_mode<synchronous>, transform_indices = @transform_7, window_bounds = array<i64: 10, 32, 128>}, {pipeline_mode = #tpu.pipeline_mode<synchronous>, transform_indices = @transform_8, window_bounds = array<i64: 1, 128>}, {transform_indices = @transform_9, window_bounds = array<i64: 1, 1, 128>}]} {
    %cst = arith.constant 0.000000e+00 : f32
    %0 = vector.broadcast %cst : f32 to vector<640x32xf32>
    %c0 = arith.constant 0 : index
    %c0_0 = arith.constant 0 : index
    %1 = vector.load %arg11[%c0, %c0_0] : memref<640x32xf32, #tpu.memory_space<vmem>>, vector<640x32xf32>
    tpu.vector_store %arg11[%c0, %c0_0], %0 {strides = array<i32>} : memref<640x32xf32, #tpu.memory_space<vmem>>, vector<640x32xf32>,
    %cst_1 = arith.constant 0.000000e+00 : f32
    %2 = vector.broadcast %cst_1 : f32 to vector<192x64xf32>
    %c0_2 = arith.constant 0 : index
    %c0_3 = arith.constant 0 : index
    %3 = vector.load %arg12[%c0_2, %c0_3] : memref<192x64xf32, #tpu.memory_space<vmem>>, vector<192x64xf32>
    tpu.vector_store %arg12[%c0_2, %c0_3], %2 {strides = array<i32>} : memref<192x64xf32, #tpu.memory_space<vmem>>, vector<192x64xf32>,
    %c0_4 = arith.constant 0 : index
    %c0_5 = arith.constant 0 : index
    %c0_6 = arith.constant 0 : index
    %4 = vector.load %arg1[%c0_4, %c0_5, %c0_6] : memref<1x1024x27xbf16, #tpu.memory_space<vmem>>, vector<1x1024x27xbf16>
    %5 = vector.shape_cast %4 : vector<1x1024x27xbf16> to vector<1024x27xbf16>
    %c0_7 = arith.constant 0 : index
    %c0_8 = arith.constant 0 : index
    %6 = vector.load %arg2[%c0_7, %c0_8] : memref<27x32xbf16, #tpu.memory_space<vmem>>, vector<27x32xbf16>
    %cst_9 = arith.constant dense<0.000000e+00> : vector<1024x32xf32>
    %7 = tpu.matmul %5, %6, %cst_9 {dimension_numbers = #tpu.dot_dimension_numbers<[1], [0], [0], [1], [0, 0, 1, 1], [], []>} : vector<1024x27xbf16>, vector<27x32xbf16>, vector<1024x32xf32> -> vector<1024x32xf32>
    %c0_10 = arith.constant 0 : index
    %c0_11 = arith.constant 0 : index
    %8 = vector.load %arg3[%c0_10, %c0_11] : memref<1x32xf32, #tpu.memory_space<vmem>>, vector<1x32xf32>
    %9 = vector.broadcast %8 : vector<1x32xf32> to vector<1024x32xf32>
    %10 = arith.addf %7, %9 : vector<1024x32xf32>
    %cst_12 = arith.constant 0.000000e+00 : f32
    %11 = vector.broadcast %cst_12 : f32 to vector<1024x32xf32>
    %12 = arith.maximumf %10, %11 : vector<1024x32xf32>
    %13 = vector.shape_cast %12 : vector<1024x32xf32> to vector<16x64x32xf32>
    %14 = vector.extract_strided_slice %13 {offsets = [0, 0, 0], sizes = [16, 32, 32], strides = [1, 1, 1]} : vector<16x64x32xf32> to vector<16x32x32xf32>
    %15 = vector.extract_strided_slice %13 {offsets = [0, 32, 0], sizes = [16, 32, 32], strides = [1, 1, 1]} : vector<16x64x32xf32> to vector<16x32x32xf32>
    %16 = arith.maximumf %14, %15 : vector<16x32x32xf32>
    %17 = vector.shape_cast %16 : vector<16x32x32xf32> to vector<512x32xf32>
    %c0_13 = arith.constant 0 : index
    %c0_14 = arith.constant 0 : index
    %18 = vector.load %arg13[%c0_13, %c0_14] : memref<512x32xf32, #tpu.memory_space<vmem>>, vector<512x32xf32>
    tpu.vector_store %arg13[%c0_13, %c0_14], %17 {strides = array<i32>} : memref<512x32xf32, #tpu.memory_space<vmem>>, vector<512x32xf32>,
    %c0_15 = arith.constant 0 : index
    %c0_16 = arith.constant 0 : index
    %19 = tpu.strided_load %arg13[%c0_15, %c0_16] {strides = array<i32: 2, 1>} : memref<512x32xf32, #tpu.memory_space<vmem>>, vector<256x32xf32>
    %c1 = arith.constant 1 : index
    %c0_17 = arith.constant 0 : index
    %20 = tpu.strided_load %arg13[%c1, %c0_17] {strides = array<i32: 2, 1>} : memref<512x32xf32, #tpu.memory_space<vmem>>, vector<256x32xf32>
    %21 = arith.maximumf %19, %20 : vector<256x32xf32>
    %22 = vector.extract_strided_slice %21 {offsets = [0, 0], sizes = [16, 32], strides = [1, 1]} : vector<256x32xf32> to vector<16x32xf32>
    %c64 = arith.constant 64 : index
    %c0_18 = arith.constant 0 : index
    %23 = vector.load %arg11[%c64, %c0_18] : memref<640x32xf32, #tpu.memory_space<vmem>>, vector<16x32xf32>
    tpu.vector_store %arg11[%c64, %c0_18], %22 {strides = array<i32>} : memref<640x32xf32, #tpu.memory_space<vmem>>, vector<16x32xf32>,
    %24 = vector.extract_strided_slice %21 {offsets = [16, 0], sizes = [16, 32], strides = [1, 1]} : vector<256x32xf32> to vector<16x32xf32>
    %c96 = arith.constant 96 : index
    %c0_19 = arith.constant 0 : index
    %25 = vector.load %arg11[%c96, %c0_19] : memref<640x32xf32, #tpu.memory_space<vmem>>, vector<16x32xf32>
    tpu.vector_store %arg11[%c96, %c0_19], %24 {strides = array<i32>} : memref<640x32xf32, #tpu.memory_space<vmem>>, vector<16x32xf32>,
    %26 = vector.extract_strided_slice %21 {offsets = [32, 0], sizes = [16, 32], strides = [1, 1]} : vector<256x32xf32> to vector<16x32xf32>
    %c128 = arith.constant 128 : index
    %c0_20 = arith.constant 0 : index
    %27 = vector.load %arg11[%c128, %c0_20] : memref<640x32xf32, #tpu.memory_space<vmem>>, vector<16x32xf32>
    tpu.vector_store %arg11[%c128, %c0_20], %26 {strides = array<i32>} : memref<640x32xf32, #tpu.memory_space<vmem>>, vector<16x32xf32>,
    %28 = vector.extract_strided_slice %21 {offsets = [48, 0], sizes = [16, 32], strides = [1, 1]} : vector<256x32xf32> to vector<16x32xf32>
    %c160 = arith.constant 160 : index
    %c0_21 = arith.constant 0 : index
    %29 = vector.load %arg11[%c160, %c0_21] : memref<640x32xf32, #tpu.memory_space<vmem>>, vector<16x32xf32>
    tpu.vector_store %arg11[%c160, %c0_21], %28 {strides = array<i32>} : memref<640x32xf32, #tpu.memory_space<vmem>>, vector<16x32xf32>,
    %30 = vector.extract_strided_slice %21 {offsets = [64, 0], sizes = [16, 32], strides = [1, 1]} : vector<256x32xf32> to vector<16x32xf32>
    %c192 = arith.constant 192 : index
    %c0_22 = arith.constant 0 : index
    %31 = vector.load %arg11[%c192, %c0_22] : memref<640x32xf32, #tpu.memory_space<vmem>>, vector<16x32xf32>
    tpu.vector_store %arg11[%c192, %c0_22], %30 {strides = array<i32>} : memref<640x32xf32, #tpu.memory_space<vmem>>, vector<16x32xf32>,
    %32 = vector.extract_strided_slice %21 {offsets = [80, 0], sizes = [16, 32], strides = [1, 1]} : vector<256x32xf32> to vector<16x32xf32>
    %c224 = arith.constant 224 : index
    %c0_23 = arith.constant 0 : index
    %33 = vector.load %arg11[%c224, %c0_23] : memref<640x32xf32, #tpu.memory_space<vmem>>, vector<16x32xf32>
    tpu.vector_store %arg11[%c224, %c0_23], %32 {strides = array<i32>} : memref<640x32xf32, #tpu.memory_space<vmem>>, vector<16x32xf32>,
    %34 = vector.extract_strided_slice %21 {offsets = [96, 0], sizes = [16, 32], strides = [1, 1]} : vector<256x32xf32> to vector<16x32xf32>
    %c256 = arith.constant 256 : index
    %c0_24 = arith.constant 0 : index
    %35 = vector.load %arg11[%c256, %c0_24] : memref<640x32xf32, #tpu.memory_space<vmem>>, vector<16x32xf32>
    tpu.vector_store %arg11[%c256, %c0_24], %34 {strides = array<i32>} : memref<640x32xf32, #tpu.memory_space<vmem>>, vector<16x32xf32>,
    %36 = vector.extract_strided_slice %21 {offsets = [112, 0], sizes = [16, 32], strides = [1, 1]} : vector<256x32xf32> to vector<16x32xf32>
    %c288 = arith.constant 288 : index
    %c0_25 = arith.constant 0 : index
    %37 = vector.load %arg11[%c288, %c0_25] : memref<640x32xf32, #tpu.memory_space<vmem>>, vector<16x32xf32>
    tpu.vector_store %arg11[%c288, %c0_25], %36 {strides = array<i32>} : memref<640x32xf32, #tpu.memory_space<vmem>>, vector<16x32xf32>,
    %38 = vector.extract_strided_slice %21 {offsets = [128, 0], sizes = [16, 32], strides = [1, 1]} : vector<256x32xf32> to vector<16x32xf32>
    %c320 = arith.constant 320 : index
    %c0_26 = arith.constant 0 : index
    %39 = vector.load %arg11[%c320, %c0_26] : memref<640x32xf32, #tpu.memory_space<vmem>>, vector<16x32xf32>
    tpu.vector_store %arg11[%c320, %c0_26], %38 {strides = array<i32>} : memref<640x32xf32, #tpu.memory_space<vmem>>, vector<16x32xf32>,
    %40 = vector.extract_strided_slice %21 {offsets = [144, 0], sizes = [16, 32], strides = [1, 1]} : vector<256x32xf32> to vector<16x32xf32>
    %c352 = arith.constant 352 : index
    %c0_27 = arith.constant 0 : index
    %41 = vector.load %arg11[%c352, %c0_27] : memref<640x32xf32, #tpu.memory_space<vmem>>, vector<16x32xf32>
    tpu.vector_store %arg11[%c352, %c0_27], %40 {strides = array<i32>} : memref<640x32xf32, #tpu.memory_space<vmem>>, vector<16x32xf32>,
    %42 = vector.extract_strided_slice %21 {offsets = [160, 0], sizes = [16, 32], strides = [1, 1]} : vector<256x32xf32> to vector<16x32xf32>
    %c384 = arith.constant 384 : index
    %c0_28 = arith.constant 0 : index
    %43 = vector.load %arg11[%c384, %c0_28] : memref<640x32xf32, #tpu.memory_space<vmem>>, vector<16x32xf32>
    tpu.vector_store %arg11[%c384, %c0_28], %42 {strides = array<i32>} : memref<640x32xf32, #tpu.memory_space<vmem>>, vector<16x32xf32>,
    %44 = vector.extract_strided_slice %21 {offsets = [176, 0], sizes = [16, 32], strides = [1, 1]} : vector<256x32xf32> to vector<16x32xf32>
    %c416 = arith.constant 416 : index
    %c0_29 = arith.constant 0 : index
    %45 = vector.load %arg11[%c416, %c0_29] : memref<640x32xf32, #tpu.memory_space<vmem>>, vector<16x32xf32>
    tpu.vector_store %arg11[%c416, %c0_29], %44 {strides = array<i32>} : memref<640x32xf32, #tpu.memory_space<vmem>>, vector<16x32xf32>,
    %46 = vector.extract_strided_slice %21 {offsets = [192, 0], sizes = [16, 32], strides = [1, 1]} : vector<256x32xf32> to vector<16x32xf32>
    %c448 = arith.constant 448 : index
    %c0_30 = arith.constant 0 : index
    %47 = vector.load %arg11[%c448, %c0_30] : memref<640x32xf32, #tpu.memory_space<vmem>>, vector<16x32xf32>
    tpu.vector_store %arg11[%c448, %c0_30], %46 {strides = array<i32>} : memref<640x32xf32, #tpu.memory_space<vmem>>, vector<16x32xf32>,
    %48 = vector.extract_strided_slice %21 {offsets = [208, 0], sizes = [16, 32], strides = [1, 1]} : vector<256x32xf32> to vector<16x32xf32>
    %c480 = arith.constant 480 : index
    %c0_31 = arith.constant 0 : index
    %49 = vector.load %arg11[%c480, %c0_31] : memref<640x32xf32, #tpu.memory_space<vmem>>, vector<16x32xf32>
    tpu.vector_store %arg11[%c480, %c0_31], %48 {strides = array<i32>} : memref<640x32xf32, #tpu.memory_space<vmem>>, vector<16x32xf32>,
    %50 = vector.extract_strided_slice %21 {offsets = [224, 0], sizes = [16, 32], strides = [1, 1]} : vector<256x32xf32> to vector<16x32xf32>
    %c512 = arith.constant 512 : index
    %c0_32 = arith.constant 0 : index
    %51 = vector.load %arg11[%c512, %c0_32] : memref<640x32xf32, #tpu.memory_space<vmem>>, vector<16x32xf32>
    tpu.vector_store %arg11[%c512, %c0_32], %50 {strides = array<i32>} : memref<640x32xf32, #tpu.memory_space<vmem>>, vector<16x32xf32>,
    %52 = vector.extract_strided_slice %21 {offsets = [240, 0], sizes = [16, 32], strides = [1, 1]} : vector<256x32xf32> to vector<16x32xf32>
    %c544 = arith.constant 544 : index
    %c0_33 = arith.constant 0 : index
    %53 = vector.load %arg11[%c544, %c0_33] : memref<640x32xf32, #tpu.memory_space<vmem>>, vector<16x32xf32>
    tpu.vector_store %arg11[%c544, %c0_33], %52 {strides = array<i32>} : memref<640x32xf32, #tpu.memory_space<vmem>>, vector<16x32xf32>,
    %c31 = arith.constant 31 : index
    %c0_34 = arith.constant 0 : index
    %54 = vector.load %arg11[%c31, %c0_34] : memref<640x32xf32, #tpu.memory_space<vmem>>, vector<512x32xf32>
    %55 = arith.truncf %54 : vector<512x32xf32> to vector<512x32xbf16>
    %c0_35 = arith.constant 0 : index
    %c0_36 = arith.constant 0 : index
    %c0_37 = arith.constant 0 : index
    %56 = vector.load %arg4[%c0_35, %c0_36, %c0_37] : memref<9x32x64xbf16, #tpu.memory_space<vmem>>, vector<1x32x64xbf16>
    %57 = vector.shape_cast %56 : vector<1x32x64xbf16> to vector<32x64xbf16>
    %cst_38 = arith.constant dense<0.000000e+00> : vector<512x64xf32>
    %58 = tpu.matmul %55, %57, %cst_38 {dimension_numbers = #tpu.dot_dimension_numbers<[1], [0], [0], [1], [0, 0, 1, 1], [], []>} : vector<512x32xbf16>, vector<32x64xbf16>, vector<512x64xf32> -> vector<512x64xf32>
    %c32 = arith.constant 32 : index
    %c0_39 = arith.constant 0 : index
    %59 = vector.load %arg11[%c32, %c0_39] : memref<640x32xf32, #tpu.memory_space<vmem>>, vector<512x32xf32>
    %60 = arith.truncf %59 : vector<512x32xf32> to vector<512x32xbf16>
    %c1_40 = arith.constant 1 : index
    %c0_41 = arith.constant 0 : index
    %c0_42 = arith.constant 0 : index
    %61 = vector.load %arg4[%c1_40, %c0_41, %c0_42] : memref<9x32x64xbf16, #tpu.memory_space<vmem>>, vector<1x32x64xbf16>
    %62 = vector.shape_cast %61 : vector<1x32x64xbf16> to vector<32x64xbf16>
    %cst_43 = arith.constant dense<0.000000e+00> : vector<512x64xf32>
    %63 = tpu.matmul %60, %62, %cst_43 {dimension_numbers = #tpu.dot_dimension_numbers<[1], [0], [0], [1], [0, 0, 1, 1], [], []>} : vector<512x32xbf16>, vector<32x64xbf16>, vector<512x64xf32> -> vector<512x64xf32>
    %64 = arith.addf %58, %63 : vector<512x64xf32>
    %c33 = arith.constant 33 : index
    %c0_44 = arith.constant 0 : index
    %65 = vector.load %arg11[%c33, %c0_44] : memref<640x32xf32, #tpu.memory_space<vmem>>, vector<512x32xf32>
    %66 = arith.truncf %65 : vector<512x32xf32> to vector<512x32xbf16>
    %c2 = arith.constant 2 : index
    %c0_45 = arith.constant 0 : index
    %c0_46 = arith.constant 0 : index
    %67 = vector.load %arg4[%c2, %c0_45, %c0_46] : memref<9x32x64xbf16, #tpu.memory_space<vmem>>, vector<1x32x64xbf16>
    %68 = vector.shape_cast %67 : vector<1x32x64xbf16> to vector<32x64xbf16>
    %cst_47 = arith.constant dense<0.000000e+00> : vector<512x64xf32>
    %69 = tpu.matmul %66, %68, %cst_47 {dimension_numbers = #tpu.dot_dimension_numbers<[1], [0], [0], [1], [0, 0, 1, 1], [], []>} : vector<512x32xbf16>, vector<32x64xbf16>, vector<512x64xf32> -> vector<512x64xf32>
    %70 = arith.addf %64, %69 : vector<512x64xf32>
    %c63 = arith.constant 63 : index
    %c0_48 = arith.constant 0 : index
    %71 = vector.load %arg11[%c63, %c0_48] : memref<640x32xf32, #tpu.memory_space<vmem>>, vector<512x32xf32>
    %72 = arith.truncf %71 : vector<512x32xf32> to vector<512x32xbf16>
    %c3 = arith.constant 3 : index
    %c0_49 = arith.constant 0 : index
    %c0_50 = arith.constant 0 : index
    %73 = vector.load %arg4[%c3, %c0_49, %c0_50] : memref<9x32x64xbf16, #tpu.memory_space<vmem>>, vector<1x32x64xbf16>
    %74 = vector.shape_cast %73 : vector<1x32x64xbf16> to vector<32x64xbf16>
    %cst_51 = arith.constant dense<0.000000e+00> : vector<512x64xf32>
    %75 = tpu.matmul %72, %74, %cst_51 {dimension_numbers = #tpu.dot_dimension_numbers<[1], [0], [0], [1], [0, 0, 1, 1], [], []>} : vector<512x32xbf16>, vector<32x64xbf16>, vector<512x64xf32> -> vector<512x64xf32>
    %76 = arith.addf %70, %75 : vector<512x64xf32>
    %c64_52 = arith.constant 64 : index
    %c0_53 = arith.constant 0 : index
    %77 = vector.load %arg11[%c64_52, %c0_53] : memref<640x32xf32, #tpu.memory_space<vmem>>, vector<512x32xf32>
    %78 = arith.truncf %77 : vector<512x32xf32> to vector<512x32xbf16>
    %c4 = arith.constant 4 : index
    %c0_54 = arith.constant 0 : index
    %c0_55 = arith.constant 0 : index
    %79 = vector.load %arg4[%c4, %c0_54, %c0_55] : memref<9x32x64xbf16, #tpu.memory_space<vmem>>, vector<1x32x64xbf16>
    %80 = vector.shape_cast %79 : vector<1x32x64xbf16> to vector<32x64xbf16>
    %cst_56 = arith.constant dense<0.000000e+00> : vector<512x64xf32>
    %81 = tpu.matmul %78, %80, %cst_56 {dimension_numbers = #tpu.dot_dimension_numbers<[1], [0], [0], [1], [0, 0, 1, 1], [], []>} : vector<512x32xbf16>, vector<32x64xbf16>, vector<512x64xf32> -> vector<512x64xf32>
    %82 = arith.addf %76, %81 : vector<512x64xf32>
    %c65 = arith.constant 65 : index
    %c0_57 = arith.constant 0 : index
    %83 = vector.load %arg11[%c65, %c0_57] : memref<640x32xf32, #tpu.memory_space<vmem>>, vector<512x32xf32>
    %84 = arith.truncf %83 : vector<512x32xf32> to vector<512x32xbf16>
    %c5 = arith.constant 5 : index
    %c0_58 = arith.constant 0 : index
    %c0_59 = arith.constant 0 : index
    %85 = vector.load %arg4[%c5, %c0_58, %c0_59] : memref<9x32x64xbf16, #tpu.memory_space<vmem>>, vector<1x32x64xbf16>
    %86 = vector.shape_cast %85 : vector<1x32x64xbf16> to vector<32x64xbf16>
    %cst_60 = arith.constant dense<0.000000e+00> : vector<512x64xf32>
    %87 = tpu.matmul %84, %86, %cst_60 {dimension_numbers = #tpu.dot_dimension_numbers<[1], [0], [0], [1], [0, 0, 1, 1], [], []>} : vector<512x32xbf16>, vector<32x64xbf16>, vector<512x64xf32> -> vector<512x64xf32>
    %88 = arith.addf %82, %87 : vector<512x64xf32>
    %c95 = arith.constant 95 : index
    %c0_61 = arith.constant 0 : index
    %89 = vector.load %arg11[%c95, %c0_61] : memref<640x32xf32, #tpu.memory_space<vmem>>, vector<512x32xf32>
    %90 = arith.truncf %89 : vector<512x32xf32> to vector<512x32xbf16>
    %c6 = arith.constant 6 : index
    %c0_62 = arith.constant 0 : index
    %c0_63 = arith.constant 0 : index
    %91 = vector.load %arg4[%c6, %c0_62, %c0_63] : memref<9x32x64xbf16, #tpu.memory_space<vmem>>, vector<1x32x64xbf16>
    %92 = vector.shape_cast %91 : vector<1x32x64xbf16> to vector<32x64xbf16>
    %cst_64 = arith.constant dense<0.000000e+00> : vector<512x64xf32>
    %93 = tpu.matmul %90, %92, %cst_64 {dimension_numbers = #tpu.dot_dimension_numbers<[1], [0], [0], [1], [0, 0, 1, 1], [], []>} : vector<512x32xbf16>, vector<32x64xbf16>, vector<512x64xf32> -> vector<512x64xf32>
    %94 = arith.addf %88, %93 : vector<512x64xf32>
    %c96_65 = arith.constant 96 : index
    %c0_66 = arith.constant 0 : index
    %95 = vector.load %arg11[%c96_65, %c0_66] : memref<640x32xf32, #tpu.memory_space<vmem>>, vector<512x32xf32>
    %96 = arith.truncf %95 : vector<512x32xf32> to vector<512x32xbf16>
    %c7 = arith.constant 7 : index
    %c0_67 = arith.constant 0 : index
    %c0_68 = arith.constant 0 : index
    %97 = vector.load %arg4[%c7, %c0_67, %c0_68] : memref<9x32x64xbf16, #tpu.memory_space<vmem>>, vector<1x32x64xbf16>
    %98 = vector.shape_cast %97 : vector<1x32x64xbf16> to vector<32x64xbf16>
    %cst_69 = arith.constant dense<0.000000e+00> : vector<512x64xf32>
    %99 = tpu.matmul %96, %98, %cst_69 {dimension_numbers = #tpu.dot_dimension_numbers<[1], [0], [0], [1], [0, 0, 1, 1], [], []>} : vector<512x32xbf16>, vector<32x64xbf16>, vector<512x64xf32> -> vector<512x64xf32>
    %100 = arith.addf %94, %99 : vector<512x64xf32>
    %c97 = arith.constant 97 : index
    %c0_70 = arith.constant 0 : index
    %101 = vector.load %arg11[%c97, %c0_70] : memref<640x32xf32, #tpu.memory_space<vmem>>, vector<512x32xf32>
    %102 = arith.truncf %101 : vector<512x32xf32> to vector<512x32xbf16>
    %c8 = arith.constant 8 : index
    %c0_71 = arith.constant 0 : index
    %c0_72 = arith.constant 0 : index
    %103 = vector.load %arg4[%c8, %c0_71, %c0_72] : memref<9x32x64xbf16, #tpu.memory_space<vmem>>, vector<1x32x64xbf16>
    %104 = vector.shape_cast %103 : vector<1x32x64xbf16> to vector<32x64xbf16>
    %cst_73 = arith.constant dense<0.000000e+00> : vector<512x64xf32>
    %105 = tpu.matmul %102, %104, %cst_73 {dimension_numbers = #tpu.dot_dimension_numbers<[1], [0], [0], [1], [0, 0, 1, 1], [], []>} : vector<512x32xbf16>, vector<32x64xbf16>, vector<512x64xf32> -> vector<512x64xf32>
    %106 = arith.addf %100, %105 : vector<512x64xf32>
    %c0_74 = arith.constant 0 : index
    %c0_75 = arith.constant 0 : index
    %107 = vector.load %arg5[%c0_74, %c0_75] : memref<1x64xf32, #tpu.memory_space<vmem>>, vector<1x64xf32>
    %108 = vector.broadcast %107 : vector<1x64xf32> to vector<512x64xf32>
    %109 = arith.addf %106, %108 : vector<512x64xf32>
    %cst_76 = arith.constant 0.000000e+00 : f32
    %110 = vector.broadcast %cst_76 : f32 to vector<512x64xf32>
    %111 = arith.maximumf %109, %110 : vector<512x64xf32>
    %112 = vector.shape_cast %111 : vector<512x64xf32> to vector<8x64x64xf32>
    %113 = vector.extract_strided_slice %112 {offsets = [0, 0, 0], sizes = [8, 32, 64], strides = [1, 1, 1]} : vector<8x64x64xf32> to vector<8x32x64xf32>
    %114 = vector.extract_strided_slice %112 {offsets = [0, 32, 0], sizes = [8, 32, 64], strides = [1, 1, 1]} : vector<8x64x64xf32> to vector<8x32x64xf32>
    %115 = arith.maximumf %113, %114 : vector<8x32x64xf32>
    %116 = vector.shape_cast %115 : vector<8x32x64xf32> to vector<256x64xf32>
    %c0_77 = arith.constant 0 : index
    %c0_78 = arith.constant 0 : index
    %117 = vector.load %arg14[%c0_77, %c0_78] : memref<256x64xf32, #tpu.memory_space<vmem>>, vector<256x64xf32>
    tpu.vector_store %arg14[%c0_77, %c0_78], %116 {strides = array<i32>} : memref<256x64xf32, #tpu.memory_space<vmem>>, vector<256x64xf32>,
    %c0_79 = arith.constant 0 : index
    %c0_80 = arith.constant 0 : index
    %118 = tpu.strided_load %arg14[%c0_79, %c0_80] {strides = array<i32: 2, 1>} : memref<256x64xf32, #tpu.memory_space<vmem>>, vector<128x64xf32>
    %c1_81 = arith.constant 1 : index
    %c0_82 = arith.constant 0 : index
    %119 = tpu.strided_load %arg14[%c1_81, %c0_82] {strides = array<i32: 2, 1>} : memref<256x64xf32, #tpu.memory_space<vmem>>, vector<128x64xf32>
    %120 = arith.maximumf %118, %119 : vector<128x64xf32>
    %121 = vector.extract_strided_slice %120 {offsets = [0, 0], sizes = [8, 64], strides = [1, 1]} : vector<128x64xf32> to vector<8x64xf32>
    %c32_83 = arith.constant 32 : index
    %c0_84 = arith.constant 0 : index
    %122 = vector.load %arg12[%c32_83, %c0_84] : memref<192x64xf32, #tpu.memory_space<vmem>>, vector<8x64xf32>
    tpu.vector_store %arg12[%c32_83, %c0_84], %121 {strides = array<i32>} : memref<192x64xf32, #tpu.memory_space<vmem>>, vector<8x64xf32>,
    %123 = vector.extract_strided_slice %120 {offsets = [16, 0], sizes = [8, 64], strides = [1, 1]} : vector<128x64xf32> to vector<8x64xf32>
    %c48 = arith.constant 48 : index
    %c0_85 = arith.constant 0 : index
    %124 = vector.load %arg12[%c48, %c0_85] : memref<192x64xf32, #tpu.memory_space<vmem>>, vector<8x64xf32>
    tpu.vector_store %arg12[%c48, %c0_85], %123 {strides = array<i32>} : memref<192x64xf32, #tpu.memory_space<vmem>>, vector<8x64xf32>,
    %125 = vector.extract_strided_slice %120 {offsets = [32, 0], sizes = [8, 64], strides = [1, 1]} : vector<128x64xf32> to vector<8x64xf32>
    %c64_86 = arith.constant 64 : index
    %c0_87 = arith.constant 0 : index
    %126 = vector.load %arg12[%c64_86, %c0_87] : memref<192x64xf32, #tpu.memory_space<vmem>>, vector<8x64xf32>
    tpu.vector_store %arg12[%c64_86, %c0_87], %125 {strides = array<i32>} : memref<192x64xf32, #tpu.memory_space<vmem>>, vector<8x64xf32>,
    %127 = vector.extract_strided_slice %120 {offsets = [48, 0], sizes = [8, 64], strides = [1, 1]} : vector<128x64xf32> to vector<8x64xf32>
    %c80 = arith.constant 80 : index
    %c0_88 = arith.constant 0 : index
    %128 = vector.load %arg12[%c80, %c0_88] : memref<192x64xf32, #tpu.memory_space<vmem>>, vector<8x64xf32>
    tpu.vector_store %arg12[%c80, %c0_88], %127 {strides = array<i32>} : memref<192x64xf32, #tpu.memory_space<vmem>>, vector<8x64xf32>,
    %129 = vector.extract_strided_slice %120 {offsets = [64, 0], sizes = [8, 64], strides = [1, 1]} : vector<128x64xf32> to vector<8x64xf32>
    %c96_89 = arith.constant 96 : index
    %c0_90 = arith.constant 0 : index
    %130 = vector.load %arg12[%c96_89, %c0_90] : memref<192x64xf32, #tpu.memory_space<vmem>>, vector<8x64xf32>
    tpu.vector_store %arg12[%c96_89, %c0_90], %129 {strides = array<i32>} : memref<192x64xf32, #tpu.memory_space<vmem>>, vector<8x64xf32>,
    %131 = vector.extract_strided_slice %120 {offsets = [80, 0], sizes = [8, 64], strides = [1, 1]} : vector<128x64xf32> to vector<8x64xf32>
    %c112 = arith.constant 112 : index
    %c0_91 = arith.constant 0 : index
    %132 = vector.load %arg12[%c112, %c0_91] : memref<192x64xf32, #tpu.memory_space<vmem>>, vector<8x64xf32>
    tpu.vector_store %arg12[%c112, %c0_91], %131 {strides = array<i32>} : memref<192x64xf32, #tpu.memory_space<vmem>>, vector<8x64xf32>,
    %133 = vector.extract_strided_slice %120 {offsets = [96, 0], sizes = [8, 64], strides = [1, 1]} : vector<128x64xf32> to vector<8x64xf32>
    %c128_92 = arith.constant 128 : index
    %c0_93 = arith.constant 0 : index
    %134 = vector.load %arg12[%c128_92, %c0_93] : memref<192x64xf32, #tpu.memory_space<vmem>>, vector<8x64xf32>
    tpu.vector_store %arg12[%c128_92, %c0_93], %133 {strides = array<i32>} : memref<192x64xf32, #tpu.memory_space<vmem>>, vector<8x64xf32>,
    %135 = vector.extract_strided_slice %120 {offsets = [112, 0], sizes = [8, 64], strides = [1, 1]} : vector<128x64xf32> to vector<8x64xf32>
    %c144 = arith.constant 144 : index
    %c0_94 = arith.constant 0 : index
    %136 = vector.load %arg12[%c144, %c0_94] : memref<192x64xf32, #tpu.memory_space<vmem>>, vector<8x64xf32>
    tpu.vector_store %arg12[%c144, %c0_94], %135 {strides = array<i32>} : memref<192x64xf32, #tpu.memory_space<vmem>>, vector<8x64xf32>,
    %c15 = arith.constant 15 : index
    %c0_95 = arith.constant 0 : index
    %137 = vector.load %arg12[%c15, %c0_95] : memref<192x64xf32, #tpu.memory_space<vmem>>, vector<128x64xf32>
    %138 = arith.truncf %137 : vector<128x64xf32> to vector<128x64xbf16>
    %c0_96 = arith.constant 0 : index
    %c0_97 = arith.constant 0 : index
    %c0_98 = arith.constant 0 : index
    %139 = vector.load %arg6[%c0_96, %c0_97, %c0_98] : memref<9x64x128xbf16, #tpu.memory_space<vmem>>, vector<1x64x128xbf16>
    %140 = vector.shape_cast %139 : vector<1x64x128xbf16> to vector<64x128xbf16>
    %cst_99 = arith.constant dense<0.000000e+00> : vector<128x128xf32>
    %141 = tpu.matmul %138, %140, %cst_99 {dimension_numbers = #tpu.dot_dimension_numbers<[1], [0], [0], [1], [0, 0, 1, 1], [], []>} : vector<128x64xbf16>, vector<64x128xbf16>, vector<128x128xf32> -> vector<128x128xf32>
    %c16 = arith.constant 16 : index
    %c0_100 = arith.constant 0 : index
    %142 = vector.load %arg12[%c16, %c0_100] : memref<192x64xf32, #tpu.memory_space<vmem>>, vector<128x64xf32>
    %143 = arith.truncf %142 : vector<128x64xf32> to vector<128x64xbf16>
    %c1_101 = arith.constant 1 : index
    %c0_102 = arith.constant 0 : index
    %c0_103 = arith.constant 0 : index
    %144 = vector.load %arg6[%c1_101, %c0_102, %c0_103] : memref<9x64x128xbf16, #tpu.memory_space<vmem>>, vector<1x64x128xbf16>
    %145 = vector.shape_cast %144 : vector<1x64x128xbf16> to vector<64x128xbf16>
    %cst_104 = arith.constant dense<0.000000e+00> : vector<128x128xf32>
    %146 = tpu.matmul %143, %145, %cst_104 {dimension_numbers = #tpu.dot_dimension_numbers<[1], [0], [0], [1], [0, 0, 1, 1], [], []>} : vector<128x64xbf16>, vector<64x128xbf16>, vector<128x128xf32> -> vector<128x128xf32>
    %147 = arith.addf %141, %146 : vector<128x128xf32>
    %c17 = arith.constant 17 : index
    %c0_105 = arith.constant 0 : index
    %148 = vector.load %arg12[%c17, %c0_105] : memref<192x64xf32, #tpu.memory_space<vmem>>, vector<128x64xf32>
    %149 = arith.truncf %148 : vector<128x64xf32> to vector<128x64xbf16>
    %c2_106 = arith.constant 2 : index
    %c0_107 = arith.constant 0 : index
    %c0_108 = arith.constant 0 : index
    %150 = vector.load %arg6[%c2_106, %c0_107, %c0_108] : memref<9x64x128xbf16, #tpu.memory_space<vmem>>, vector<1x64x128xbf16>
    %151 = vector.shape_cast %150 : vector<1x64x128xbf16> to vector<64x128xbf16>
    %cst_109 = arith.constant dense<0.000000e+00> : vector<128x128xf32>
    %152 = tpu.matmul %149, %151, %cst_109 {dimension_numbers = #tpu.dot_dimension_numbers<[1], [0], [0], [1], [0, 0, 1, 1], [], []>} : vector<128x64xbf16>, vector<64x128xbf16>, vector<128x128xf32> -> vector<128x128xf32>
    %153 = arith.addf %147, %152 : vector<128x128xf32>
    %c31_110 = arith.constant 31 : index
    %c0_111 = arith.constant 0 : index
    %154 = vector.load %arg12[%c31_110, %c0_111] : memref<192x64xf32, #tpu.memory_space<vmem>>, vector<128x64xf32>
    %155 = arith.truncf %154 : vector<128x64xf32> to vector<128x64xbf16>
    %c3_112 = arith.constant 3 : index
    %c0_113 = arith.constant 0 : index
    %c0_114 = arith.constant 0 : index
    %156 = vector.load %arg6[%c3_112, %c0_113, %c0_114] : memref<9x64x128xbf16, #tpu.memory_space<vmem>>, vector<1x64x128xbf16>
    %157 = vector.shape_cast %156 : vector<1x64x128xbf16> to vector<64x128xbf16>
    %cst_115 = arith.constant dense<0.000000e+00> : vector<128x128xf32>
    %158 = tpu.matmul %155, %157, %cst_115 {dimension_numbers = #tpu.dot_dimension_numbers<[1], [0], [0], [1], [0, 0, 1, 1], [], []>} : vector<128x64xbf16>, vector<64x128xbf16>, vector<128x128xf32> -> vector<128x128xf32>
    %159 = arith.addf %153, %158 : vector<128x128xf32>
    %c32_116 = arith.constant 32 : index
    %c0_117 = arith.constant 0 : index
    %160 = vector.load %arg12[%c32_116, %c0_117] : memref<192x64xf32, #tpu.memory_space<vmem>>, vector<128x64xf32>
    %161 = arith.truncf %160 : vector<128x64xf32> to vector<128x64xbf16>
    %c4_118 = arith.constant 4 : index
    %c0_119 = arith.constant 0 : index
    %c0_120 = arith.constant 0 : index
    %162 = vector.load %arg6[%c4_118, %c0_119, %c0_120] : memref<9x64x128xbf16, #tpu.memory_space<vmem>>, vector<1x64x128xbf16>
    %163 = vector.shape_cast %162 : vector<1x64x128xbf16> to vector<64x128xbf16>
    %cst_121 = arith.constant dense<0.000000e+00> : vector<128x128xf32>
    %164 = tpu.matmul %161, %163, %cst_121 {dimension_numbers = #tpu.dot_dimension_numbers<[1], [0], [0], [1], [0, 0, 1, 1], [], []>} : vector<128x64xbf16>, vector<64x128xbf16>, vector<128x128xf32> -> vector<128x128xf32>
    %165 = arith.addf %159, %164 : vector<128x128xf32>
    %c33_122 = arith.constant 33 : index
    %c0_123 = arith.constant 0 : index
    %166 = vector.load %arg12[%c33_122, %c0_123] : memref<192x64xf32, #tpu.memory_space<vmem>>, vector<128x64xf32>
    %167 = arith.truncf %166 : vector<128x64xf32> to vector<128x64xbf16>
    %c5_124 = arith.constant 5 : index
    %c0_125 = arith.constant 0 : index
    %c0_126 = arith.constant 0 : index
    %168 = vector.load %arg6[%c5_124, %c0_125, %c0_126] : memref<9x64x128xbf16, #tpu.memory_space<vmem>>, vector<1x64x128xbf16>
    %169 = vector.shape_cast %168 : vector<1x64x128xbf16> to vector<64x128xbf16>
    %cst_127 = arith.constant dense<0.000000e+00> : vector<128x128xf32>
    %170 = tpu.matmul %167, %169, %cst_127 {dimension_numbers = #tpu.dot_dimension_numbers<[1], [0], [0], [1], [0, 0, 1, 1], [], []>} : vector<128x64xbf16>, vector<64x128xbf16>, vector<128x128xf32> -> vector<128x128xf32>
    %171 = arith.addf %165, %170 : vector<128x128xf32>
    %c47 = arith.constant 47 : index
    %c0_128 = arith.constant 0 : index
    %172 = vector.load %arg12[%c47, %c0_128] : memref<192x64xf32, #tpu.memory_space<vmem>>, vector<128x64xf32>
    %173 = arith.truncf %172 : vector<128x64xf32> to vector<128x64xbf16>
    %c6_129 = arith.constant 6 : index
    %c0_130 = arith.constant 0 : index
    %c0_131 = arith.constant 0 : index
    %174 = vector.load %arg6[%c6_129, %c0_130, %c0_131] : memref<9x64x128xbf16, #tpu.memory_space<vmem>>, vector<1x64x128xbf16>
    %175 = vector.shape_cast %174 : vector<1x64x128xbf16> to vector<64x128xbf16>
    %cst_132 = arith.constant dense<0.000000e+00> : vector<128x128xf32>
    %176 = tpu.matmul %173, %175, %cst_132 {dimension_numbers = #tpu.dot_dimension_numbers<[1], [0], [0], [1], [0, 0, 1, 1], [], []>} : vector<128x64xbf16>, vector<64x128xbf16>, vector<128x128xf32> -> vector<128x128xf32>
    %177 = arith.addf %171, %176 : vector<128x128xf32>
    %c48_133 = arith.constant 48 : index
    %c0_134 = arith.constant 0 : index
    %178 = vector.load %arg12[%c48_133, %c0_134] : memref<192x64xf32, #tpu.memory_space<vmem>>, vector<128x64xf32>
    %179 = arith.truncf %178 : vector<128x64xf32> to vector<128x64xbf16>
    %c7_135 = arith.constant 7 : index
    %c0_136 = arith.constant 0 : index
    %c0_137 = arith.constant 0 : index
    %180 = vector.load %arg6[%c7_135, %c0_136, %c0_137] : memref<9x64x128xbf16, #tpu.memory_space<vmem>>, vector<1x64x128xbf16>
    %181 = vector.shape_cast %180 : vector<1x64x128xbf16> to vector<64x128xbf16>
    %cst_138 = arith.constant dense<0.000000e+00> : vector<128x128xf32>
    %182 = tpu.matmul %179, %181, %cst_138 {dimension_numbers = #tpu.dot_dimension_numbers<[1], [0], [0], [1], [0, 0, 1, 1], [], []>} : vector<128x64xbf16>, vector<64x128xbf16>, vector<128x128xf32> -> vector<128x128xf32>
    %183 = arith.addf %177, %182 : vector<128x128xf32>
    %c49 = arith.constant 49 : index
    %c0_139 = arith.constant 0 : index
    %184 = vector.load %arg12[%c49, %c0_139] : memref<192x64xf32, #tpu.memory_space<vmem>>, vector<128x64xf32>
    %185 = arith.truncf %184 : vector<128x64xf32> to vector<128x64xbf16>
    %c8_140 = arith.constant 8 : index
    %c0_141 = arith.constant 0 : index
    %c0_142 = arith.constant 0 : index
    %186 = vector.load %arg6[%c8_140, %c0_141, %c0_142] : memref<9x64x128xbf16, #tpu.memory_space<vmem>>, vector<1x64x128xbf16>
    %187 = vector.shape_cast %186 : vector<1x64x128xbf16> to vector<64x128xbf16>
    %cst_143 = arith.constant dense<0.000000e+00> : vector<128x128xf32>
    %188 = tpu.matmul %185, %187, %cst_143 {dimension_numbers = #tpu.dot_dimension_numbers<[1], [0], [0], [1], [0, 0, 1, 1], [], []>} : vector<128x64xbf16>, vector<64x128xbf16>, vector<128x128xf32> -> vector<128x128xf32>
    %189 = arith.addf %183, %188 : vector<128x128xf32>
    %c0_144 = arith.constant 0 : index
    %c0_145 = arith.constant 0 : index
    %190 = vector.load %arg7[%c0_144, %c0_145] : memref<1x128xf32, #tpu.memory_space<vmem>>, vector<1x128xf32>
    %191 = vector.broadcast %190 : vector<1x128xf32> to vector<128x128xf32>
    %192 = arith.addf %189, %191 : vector<128x128xf32>
    %cst_146 = arith.constant 0.000000e+00 : f32
    %193 = vector.broadcast %cst_146 : f32 to vector<128x128xf32>
    %194 = arith.maximumf %192, %193 : vector<128x128xf32>
    %195 = vector.shape_cast %194 : vector<128x128xf32> to vector<4x32x128xf32>
    %196 = vector.extract_strided_slice %195 {offsets = [0, 0, 0], sizes = [4, 16, 128], strides = [1, 1, 1]} : vector<4x32x128xf32> to vector<4x16x128xf32>
    %197 = vector.extract_strided_slice %195 {offsets = [0, 16, 0], sizes = [4, 16, 128], strides = [1, 1, 1]} : vector<4x32x128xf32> to vector<4x16x128xf32>
    %198 = arith.maximumf %196, %197 : vector<4x16x128xf32>
    %199 = vector.shape_cast %198 : vector<4x16x128xf32> to vector<64x128xf32>
    %c0_147 = arith.constant 0 : index
    %c0_148 = arith.constant 0 : index
    %200 = vector.load %arg15[%c0_147, %c0_148] : memref<64x128xf32, #tpu.memory_space<vmem>>, vector<64x128xf32>
    tpu.vector_store %arg15[%c0_147, %c0_148], %199 {strides = array<i32>} : memref<64x128xf32, #tpu.memory_space<vmem>>, vector<64x128xf32>,
    %c0_149 = arith.constant 0 : index
    %c0_150 = arith.constant 0 : index
    %201 = tpu.strided_load %arg15[%c0_149, %c0_150] {strides = array<i32: 2, 1>} : memref<64x128xf32, #tpu.memory_space<vmem>>, vector<32x128xf32>
    %c1_151 = arith.constant 1 : index
    %c0_152 = arith.constant 0 : index
    %202 = tpu.strided_load %arg15[%c1_151, %c0_152] {strides = array<i32: 2, 1>} : memref<64x128xf32, #tpu.memory_space<vmem>>, vector<32x128xf32>
    %203 = arith.maximumf %201, %202 : vector<32x128xf32>
    %204 = tpu.iota {dimensions = array<i32: 0>} : vector<32x128xi32>
    %c8_i32 = arith.constant 8 : i32
    %c0_i32 = arith.constant 0 : i32
    %205 = arith.cmpi eq, %c8_i32, %c0_i32 : i32
    %c1_i32 = arith.constant 1 : i32
    %206 = arith.select %205, %c1_i32, %c8_i32 : i32
    %207 = vector.broadcast %206 : i32 to vector<32x128xi32>
    %208 = arith.remsi %204, %207 : vector<32x128xi32>
    %c0_i32_153 = arith.constant 0 : i32
    %209 = vector.broadcast %c0_i32_153 : i32 to vector<32x128xi32>
    %210 = arith.cmpi ne, %208, %209 : vector<32x128xi32>
    %c0_i32_154 = arith.constant 0 : i32
    %211 = vector.broadcast %c0_i32_154 : i32 to vector<32x128xi32>
    %212 = arith.cmpi slt, %208, %211 : vector<32x128xi32>
    %c0_i32_155 = arith.constant 0 : i32
    %213 = arith.cmpi slt, %206, %c0_i32_155 : i32
    %214 = vector.broadcast %213 : i1 to vector<32x128xi1>
    %215 = vector.broadcast %214 : vector<32x128xi1> to vector<32x128xi1>
    %216 = arith.xori %212, %215 : vector<32x128xi1>
    %217 = arith.andi %216, %210 : vector<32x128xi1>
    %218 = vector.broadcast %206 : i32 to vector<32x128xi32>
    %219 = arith.addi %208, %218 : vector<32x128xi32>
    %220 = arith.select %217, %219, %208 : vector<32x128xi1>, vector<32x128xi32>
    %c4_i32 = arith.constant 4 : i32
    %221 = vector.broadcast %c4_i32 : i32 to vector<32x128xi32>
    %222 = arith.cmpi slt, %220, %221 : vector<32x128xi32>
    %cst_156 = arith.constant 0.000000e+00 : f32
    %223 = vector.broadcast %cst_156 : f32 to vector<32x128xf32>
    %224 = arith.select %222, %203, %223 : vector<32x128xi1>, vector<32x128xf32>
    %225 = tpu.iota {dimensions = array<i32: 1>} : vector<1x128xi32>
    %c0_157 = arith.constant 0 : index
    %c0_158 = arith.constant 0 : index
    %226 = vector.load %arg9[%c0_157, %c0_158] : memref<1x128xf32, #tpu.memory_space<vmem>>, vector<1x128xf32>
    %c0_159 = arith.constant 0 : index
    %c0_160 = arith.constant 0 : index
    %c0_161 = arith.constant 0 : index
    %227 = vector.load %arg8[%c0_159, %c0_160, %c0_161] : memref<10x32x128xf32, #tpu.memory_space<vmem>>, vector<1x32x128xf32>
    %228 = vector.shape_cast %227 : vector<1x32x128xf32> to vector<32x128xf32>
    %229 = arith.mulf %224, %228 : vector<32x128xf32>
    %cst_162 = arith.constant dense<0.000000e+00> : vector<128xf32>
    %230 = vector.multi_reduction <add>, %229, %cst_162 [0] : vector<32x128xf32> to vector<128xf32>
    %231 = vector.shape_cast %230 : vector<128xf32> to vector<1x128xf32>
    %cst_163 = arith.constant dense<0.000000e+00> : vector<1xf32>
    %232 = vector.multi_reduction <add>, %231, %cst_163 [1] : vector<1x128xf32> to vector<1xf32>
    %233 = vector.shape_cast %232 : vector<1xf32> to vector<1x1xf32>
    %c0_i32_164 = arith.constant 0 : i32
    %234 = vector.broadcast %c0_i32_164 : i32 to vector<1x128xi32>
    %235 = arith.cmpi eq, %225, %234 : vector<1x128xi32>
    %cst_165 = arith.constant 0.000000e+00 : f32
    %236 = vector.shape_cast %233 : vector<1x1xf32> to vector<1x1xf32>
    %237 = vector.broadcast %236 : vector<1x1xf32> to vector<1x128xf32>
    %238 = vector.broadcast %cst_165 : f32 to vector<1x128xf32>
    %239 = arith.select %235, %237, %238 : vector<1x128xi1>, vector<1x128xf32>
    %240 = arith.addf %226, %239 : vector<1x128xf32>
    %c1_166 = arith.constant 1 : index
    %c0_167 = arith.constant 0 : index
    %c0_168 = arith.constant 0 : index
    %241 = vector.load %arg8[%c1_166, %c0_167, %c0_168] : memref<10x32x128xf32, #tpu.memory_space<vmem>>, vector<1x32x128xf32>
    %242 = vector.shape_cast %241 : vector<1x32x128xf32> to vector<32x128xf32>
    %243 = arith.mulf %224, %242 : vector<32x128xf32>
    %cst_169 = arith.constant dense<0.000000e+00> : vector<128xf32>
    %244 = vector.multi_reduction <add>, %243, %cst_169 [0] : vector<32x128xf32> to vector<128xf32>
    %245 = vector.shape_cast %244 : vector<128xf32> to vector<1x128xf32>
    %cst_170 = arith.constant dense<0.000000e+00> : vector<1xf32>
    %246 = vector.multi_reduction <add>, %245, %cst_170 [1] : vector<1x128xf32> to vector<1xf32>
    %247 = vector.shape_cast %246 : vector<1xf32> to vector<1x1xf32>
    %c1_i32_171 = arith.constant 1 : i32
    %248 = vector.broadcast %c1_i32_171 : i32 to vector<1x128xi32>
    %249 = arith.cmpi eq, %225, %248 : vector<1x128xi32>
    %cst_172 = arith.constant 0.000000e+00 : f32
    %250 = vector.shape_cast %247 : vector<1x1xf32> to vector<1x1xf32>
    %251 = vector.broadcast %250 : vector<1x1xf32> to vector<1x128xf32>
    %252 = vector.broadcast %cst_172 : f32 to vector<1x128xf32>
    %253 = arith.select %249, %251, %252 : vector<1x128xi1>, vector<1x128xf32>
    %254 = arith.addf %240, %253 : vector<1x128xf32>
    %c2_173 = arith.constant 2 : index
    %c0_174 = arith.constant 0 : index
    %c0_175 = arith.constant 0 : index
    %255 = vector.load %arg8[%c2_173, %c0_174, %c0_175] : memref<10x32x128xf32, #tpu.memory_space<vmem>>, vector<1x32x128xf32>
    %256 = vector.shape_cast %255 : vector<1x32x128xf32> to vector<32x128xf32>
    %257 = arith.mulf %224, %256 : vector<32x128xf32>
    %cst_176 = arith.constant dense<0.000000e+00> : vector<128xf32>
    %258 = vector.multi_reduction <add>, %257, %cst_176 [0] : vector<32x128xf32> to vector<128xf32>
    %259 = vector.shape_cast %258 : vector<128xf32> to vector<1x128xf32>
    %cst_177 = arith.constant dense<0.000000e+00> : vector<1xf32>
    %260 = vector.multi_reduction <add>, %259, %cst_177 [1] : vector<1x128xf32> to vector<1xf32>
    %261 = vector.shape_cast %260 : vector<1xf32> to vector<1x1xf32>
    %c2_i32 = arith.constant 2 : i32
    %262 = vector.broadcast %c2_i32 : i32 to vector<1x128xi32>
    %263 = arith.cmpi eq, %225, %262 : vector<1x128xi32>
    %cst_178 = arith.constant 0.000000e+00 : f32
    %264 = vector.shape_cast %261 : vector<1x1xf32> to vector<1x1xf32>
    %265 = vector.broadcast %264 : vector<1x1xf32> to vector<1x128xf32>
    %266 = vector.broadcast %cst_178 : f32 to vector<1x128xf32>
    %267 = arith.select %263, %265, %266 : vector<1x128xi1>, vector<1x128xf32>
    %268 = arith.addf %254, %267 : vector<1x128xf32>
    %c3_179 = arith.constant 3 : index
    %c0_180 = arith.constant 0 : index
    %c0_181 = arith.constant 0 : index
    %269 = vector.load %arg8[%c3_179, %c0_180, %c0_181] : memref<10x32x128xf32, #tpu.memory_space<vmem>>, vector<1x32x128xf32>
    %270 = vector.shape_cast %269 : vector<1x32x128xf32> to vector<32x128xf32>
    %271 = arith.mulf %224, %270 : vector<32x128xf32>
    %cst_182 = arith.constant dense<0.000000e+00> : vector<128xf32>
    %272 = vector.multi_reduction <add>, %271, %cst_182 [0] : vector<32x128xf32> to vector<128xf32>
    %273 = vector.shape_cast %272 : vector<128xf32> to vector<1x128xf32>
    %cst_183 = arith.constant dense<0.000000e+00> : vector<1xf32>
    %274 = vector.multi_reduction <add>, %273, %cst_183 [1] : vector<1x128xf32> to vector<1xf32>
    %275 = vector.shape_cast %274 : vector<1xf32> to vector<1x1xf32>
    %c3_i32 = arith.constant 3 : i32
    %276 = vector.broadcast %c3_i32 : i32 to vector<1x128xi32>
    %277 = arith.cmpi eq, %225, %276 : vector<1x128xi32>
    %cst_184 = arith.constant 0.000000e+00 : f32
    %278 = vector.shape_cast %275 : vector<1x1xf32> to vector<1x1xf32>
    %279 = vector.broadcast %278 : vector<1x1xf32> to vector<1x128xf32>
    %280 = vector.broadcast %cst_184 : f32 to vector<1x128xf32>
    %281 = arith.select %277, %279, %280 : vector<1x128xi1>, vector<1x128xf32>
    %282 = arith.addf %268, %281 : vector<1x128xf32>
    %c4_185 = arith.constant 4 : index
    %c0_186 = arith.constant 0 : index
    %c0_187 = arith.constant 0 : index
    %283 = vector.load %arg8[%c4_185, %c0_186, %c0_187] : memref<10x32x128xf32, #tpu.memory_space<vmem>>, vector<1x32x128xf32>
    %284 = vector.shape_cast %283 : vector<1x32x128xf32> to vector<32x128xf32>
    %285 = arith.mulf %224, %284 : vector<32x128xf32>
    %cst_188 = arith.constant dense<0.000000e+00> : vector<128xf32>
    %286 = vector.multi_reduction <add>, %285, %cst_188 [0] : vector<32x128xf32> to vector<128xf32>
    %287 = vector.shape_cast %286 : vector<128xf32> to vector<1x128xf32>
    %cst_189 = arith.constant dense<0.000000e+00> : vector<1xf32>
    %288 = vector.multi_reduction <add>, %287, %cst_189 [1] : vector<1x128xf32> to vector<1xf32>
    %289 = vector.shape_cast %288 : vector<1xf32> to vector<1x1xf32>
    %c4_i32_190 = arith.constant 4 : i32
    %290 = vector.broadcast %c4_i32_190 : i32 to vector<1x128xi32>
    %291 = arith.cmpi eq, %225, %290 : vector<1x128xi32>
    %cst_191 = arith.constant 0.000000e+00 : f32
    %292 = vector.shape_cast %289 : vector<1x1xf32> to vector<1x1xf32>
    %293 = vector.broadcast %292 : vector<1x1xf32> to vector<1x128xf32>
    %294 = vector.broadcast %cst_191 : f32 to vector<1x128xf32>
    %295 = arith.select %291, %293, %294 : vector<1x128xi1>, vector<1x128xf32>
    %296 = arith.addf %282, %295 : vector<1x128xf32>
    %c5_192 = arith.constant 5 : index
    %c0_193 = arith.constant 0 : index
    %c0_194 = arith.constant 0 : index
    %297 = vector.load %arg8[%c5_192, %c0_193, %c0_194] : memref<10x32x128xf32, #tpu.memory_space<vmem>>, vector<1x32x128xf32>
    %298 = vector.shape_cast %297 : vector<1x32x128xf32> to vector<32x128xf32>
    %299 = arith.mulf %224, %298 : vector<32x128xf32>
    %cst_195 = arith.constant dense<0.000000e+00> : vector<128xf32>
    %300 = vector.multi_reduction <add>, %299, %cst_195 [0] : vector<32x128xf32> to vector<128xf32>
    %301 = vector.shape_cast %300 : vector<128xf32> to vector<1x128xf32>
    %cst_196 = arith.constant dense<0.000000e+00> : vector<1xf32>
    %302 = vector.multi_reduction <add>, %301, %cst_196 [1] : vector<1x128xf32> to vector<1xf32>
    %303 = vector.shape_cast %302 : vector<1xf32> to vector<1x1xf32>
    %c5_i32 = arith.constant 5 : i32
    %304 = vector.broadcast %c5_i32 : i32 to vector<1x128xi32>
    %305 = arith.cmpi eq, %225, %304 : vector<1x128xi32>
    %cst_197 = arith.constant 0.000000e+00 : f32
    %306 = vector.shape_cast %303 : vector<1x1xf32> to vector<1x1xf32>
    %307 = vector.broadcast %306 : vector<1x1xf32> to vector<1x128xf32>
    %308 = vector.broadcast %cst_197 : f32 to vector<1x128xf32>
    %309 = arith.select %305, %307, %308 : vector<1x128xi1>, vector<1x128xf32>
    %310 = arith.addf %296, %309 : vector<1x128xf32>
    %c6_198 = arith.constant 6 : index
    %c0_199 = arith.constant 0 : index
    %c0_200 = arith.constant 0 : index
    %311 = vector.load %arg8[%c6_198, %c0_199, %c0_200] : memref<10x32x128xf32, #tpu.memory_space<vmem>>, vector<1x32x128xf32>
    %312 = vector.shape_cast %311 : vector<1x32x128xf32> to vector<32x128xf32>
    %313 = arith.mulf %224, %312 : vector<32x128xf32>
    %cst_201 = arith.constant dense<0.000000e+00> : vector<128xf32>
    %314 = vector.multi_reduction <add>, %313, %cst_201 [0] : vector<32x128xf32> to vector<128xf32>
    %315 = vector.shape_cast %314 : vector<128xf32> to vector<1x128xf32>
    %cst_202 = arith.constant dense<0.000000e+00> : vector<1xf32>
    %316 = vector.multi_reduction <add>, %315, %cst_202 [1] : vector<1x128xf32> to vector<1xf32>
    %317 = vector.shape_cast %316 : vector<1xf32> to vector<1x1xf32>
    %c6_i32 = arith.constant 6 : i32
    %318 = vector.broadcast %c6_i32 : i32 to vector<1x128xi32>
    %319 = arith.cmpi eq, %225, %318 : vector<1x128xi32>
    %cst_203 = arith.constant 0.000000e+00 : f32
    %320 = vector.shape_cast %317 : vector<1x1xf32> to vector<1x1xf32>
    %321 = vector.broadcast %320 : vector<1x1xf32> to vector<1x128xf32>
    %322 = vector.broadcast %cst_203 : f32 to vector<1x128xf32>
    %323 = arith.select %319, %321, %322 : vector<1x128xi1>, vector<1x128xf32>
    %324 = arith.addf %310, %323 : vector<1x128xf32>
    %c7_204 = arith.constant 7 : index
    %c0_205 = arith.constant 0 : index
    %c0_206 = arith.constant 0 : index
    %325 = vector.load %arg8[%c7_204, %c0_205, %c0_206] : memref<10x32x128xf32, #tpu.memory_space<vmem>>, vector<1x32x128xf32>
    %326 = vector.shape_cast %325 : vector<1x32x128xf32> to vector<32x128xf32>
    %327 = arith.mulf %224, %326 : vector<32x128xf32>
    %cst_207 = arith.constant dense<0.000000e+00> : vector<128xf32>
    %328 = vector.multi_reduction <add>, %327, %cst_207 [0] : vector<32x128xf32> to vector<128xf32>
    %329 = vector.shape_cast %328 : vector<128xf32> to vector<1x128xf32>
    %cst_208 = arith.constant dense<0.000000e+00> : vector<1xf32>
    %330 = vector.multi_reduction <add>, %329, %cst_208 [1] : vector<1x128xf32> to vector<1xf32>
    %331 = vector.shape_cast %330 : vector<1xf32> to vector<1x1xf32>
    %c7_i32 = arith.constant 7 : i32
    %332 = vector.broadcast %c7_i32 : i32 to vector<1x128xi32>
    %333 = arith.cmpi eq, %225, %332 : vector<1x128xi32>
    %cst_209 = arith.constant 0.000000e+00 : f32
    %334 = vector.shape_cast %331 : vector<1x1xf32> to vector<1x1xf32>
    %335 = vector.broadcast %334 : vector<1x1xf32> to vector<1x128xf32>
    %336 = vector.broadcast %cst_209 : f32 to vector<1x128xf32>
    %337 = arith.select %333, %335, %336 : vector<1x128xi1>, vector<1x128xf32>
    %338 = arith.addf %324, %337 : vector<1x128xf32>
    %c8_210 = arith.constant 8 : index
    %c0_211 = arith.constant 0 : index
    %c0_212 = arith.constant 0 : index
    %339 = vector.load %arg8[%c8_210, %c0_211, %c0_212] : memref<10x32x128xf32, #tpu.memory_space<vmem>>, vector<1x32x128xf32>
    %340 = vector.shape_cast %339 : vector<1x32x128xf32> to vector<32x128xf32>
    %341 = arith.mulf %224, %340 : vector<32x128xf32>
    %cst_213 = arith.constant dense<0.000000e+00> : vector<128xf32>
    %342 = vector.multi_reduction <add>, %341, %cst_213 [0] : vector<32x128xf32> to vector<128xf32>
    %343 = vector.shape_cast %342 : vector<128xf32> to vector<1x128xf32>
    %cst_214 = arith.constant dense<0.000000e+00> : vector<1xf32>
    %344 = vector.multi_reduction <add>, %343, %cst_214 [1] : vector<1x128xf32> to vector<1xf32>
    %345 = vector.shape_cast %344 : vector<1xf32> to vector<1x1xf32>
    %c8_i32_215 = arith.constant 8 : i32
    %346 = vector.broadcast %c8_i32_215 : i32 to vector<1x128xi32>
    %347 = arith.cmpi eq, %225, %346 : vector<1x128xi32>
    %cst_216 = arith.constant 0.000000e+00 : f32
    %348 = vector.shape_cast %345 : vector<1x1xf32> to vector<1x1xf32>
    %349 = vector.broadcast %348 : vector<1x1xf32> to vector<1x128xf32>
    %350 = vector.broadcast %cst_216 : f32 to vector<1x128xf32>
    %351 = arith.select %347, %349, %350 : vector<1x128xi1>, vector<1x128xf32>
    %352 = arith.addf %338, %351 : vector<1x128xf32>
    %c9 = arith.constant 9 : index
    %c0_217 = arith.constant 0 : index
    %c0_218 = arith.constant 0 : index
    %353 = vector.load %arg8[%c9, %c0_217, %c0_218] : memref<10x32x128xf32, #tpu.memory_space<vmem>>, vector<1x32x128xf32>
    %354 = vector.shape_cast %353 : vector<1x32x128xf32> to vector<32x128xf32>
    %355 = arith.mulf %224, %354 : vector<32x128xf32>
    %cst_219 = arith.constant dense<0.000000e+00> : vector<128xf32>
    %356 = vector.multi_reduction <add>, %355, %cst_219 [0] : vector<32x128xf32> to vector<128xf32>
    %357 = vector.shape_cast %356 : vector<128xf32> to vector<1x128xf32>
    %cst_220 = arith.constant dense<0.000000e+00> : vector<1xf32>
    %358 = vector.multi_reduction <add>, %357, %cst_220 [1] : vector<1x128xf32> to vector<1xf32>
    %359 = vector.shape_cast %358 : vector<1xf32> to vector<1x1xf32>
    %c9_i32 = arith.constant 9 : i32
    %360 = vector.broadcast %c9_i32 : i32 to vector<1x128xi32>
    %361 = arith.cmpi eq, %225, %360 : vector<1x128xi32>
    %cst_221 = arith.constant 0.000000e+00 : f32
    %362 = vector.shape_cast %359 : vector<1x1xf32> to vector<1x1xf32>
    %363 = vector.broadcast %362 : vector<1x1xf32> to vector<1x128xf32>
    %364 = vector.broadcast %cst_221 : f32 to vector<1x128xf32>
    %365 = arith.select %361, %363, %364 : vector<1x128xi1>, vector<1x128xf32>
    %366 = arith.addf %352, %365 : vector<1x128xf32>
    %c0_222 = arith.constant 0 : index
    %c0_223 = arith.constant 0 : index
    %c0_224 = arith.constant 0 : index
    %367 = vector.load %arg10[%c0_222, %c0_223, %c0_224] : memref<1x1x128xf32, #tpu.memory_space<vmem>>, vector<1x1x128xf32>
    %368 = vector.shape_cast %367 : vector<1x1x128xf32> to vector<1x128xf32>
    %369 = vector.shape_cast %366 : vector<1x128xf32> to vector<1x1x128xf32>
    tpu.vector_store %arg10[%c0_222, %c0_223, %c0_224], %369 {strides = array<i32>} : memref<1x1x128xf32, #tpu.memory_space<vmem>>, vector<1x1x128xf32>,
    return
  }
  func.func @transform_0(%arg0: i32) -> (i32, i32, i32) {
    %c0_i32 = arith.constant 0 : i32
    %c0_i32_0 = arith.constant 0 : i32
    %c0_i32_1 = arith.constant 0 : i32
    return %arg0, %c0_i32, %c0_i32_0 : i32, i32, i32
  }
  func.func @transform_1(%arg0: i32) -> (i32, i32) {
    %c0_i32 = arith.constant 0 : i32
    %c0_i32_0 = arith.constant 0 : i32
    %c0_i32_1 = arith.constant 0 : i32
    return %c0_i32, %c0_i32_0 : i32, i32
  }
  func.func @transform_2(%arg0: i32) -> (i32, i32) {
    %c0_i32 = arith.constant 0 : i32
    %c0_i32_0 = arith.constant 0 : i32
    %c0_i32_1 = arith.constant 0 : i32
    return %c0_i32, %c0_i32_0 : i32, i32
  }
  func.func @transform_3(%arg0: i32) -> (i32, i32, i32) {
    %c0_i32 = arith.constant 0 : i32
    %c0_i32_0 = arith.constant 0 : i32
    %c0_i32_1 = arith.constant 0 : i32
    %c0_i32_2 = arith.constant 0 : i32
    return %c0_i32, %c0_i32_0, %c0_i32_1 : i32, i32, i32
  }
  func.func @transform_4(%arg0: i32) -> (i32, i32) {
    %c0_i32 = arith.constant 0 : i32
    %c0_i32_0 = arith.constant 0 : i32
    %c0_i32_1 = arith.constant 0 : i32
    return %c0_i32, %c0_i32_0 : i32, i32
  }
  func.func @transform_5(%arg0: i32) -> (i32, i32, i32) {
    %c0_i32 = arith.constant 0 : i32
    %c0_i32_0 = arith.constant 0 : i32
    %c0_i32_1 = arith.constant 0 : i32
    %c0_i32_2 = arith.constant 0 : i32
    return %c0_i32, %c0_i32_0, %c0_i32_1 : i32, i32, i32
  }
  func.func @transform_6(%arg0: i32) -> (i32, i32) {
    %c0_i32 = arith.constant 0 : i32
    %c0_i32_0 = arith.constant 0 : i32
    %c0_i32_1 = arith.constant 0 : i32
    return %c0_i32, %c0_i32_0 : i32, i32
  }
  func.func @transform_7(%arg0: i32) -> (i32, i32, i32) {
    %c0_i32 = arith.constant 0 : i32
    %c0_i32_0 = arith.constant 0 : i32
    %c0_i32_1 = arith.constant 0 : i32
    %c0_i32_2 = arith.constant 0 : i32
    return %c0_i32, %c0_i32_0, %c0_i32_1 : i32, i32, i32
  }
  func.func @transform_8(%arg0: i32) -> (i32, i32) {
    %c0_i32 = arith.constant 0 : i32
    %c0_i32_0 = arith.constant 0 : i32
    %c0_i32_1 = arith.constant 0 : i32
    return %c0_i32, %c0_i32_0 : i32, i32
  }
  func.func @transform_9(%arg0: i32) -> (i32, i32, i32) {
    %c0_i32 = arith.constant 0 : i32
    %c0_i32_0 = arith.constant 0 : i32
    %c0_i32_1 = arith.constant 0 : i32
    return %arg0, %c0_i32, %c0_i32_0 : i32, i32, i32
  }
}

</mosaic_0001>

<bundles_post_ra>
// kernel: cnn_forward.1
= control target key start
LH: loop header
LB: loop body
LE: loop exit
PB: predicated region body
PF: predicated region fallthrough
CT: control target
= control target key end

     0   :  { %14 = vsyncpa [#allocation8], 0  ;;  %s14431_s0 = inlined_call_operand.vmem [shape: bf16[2,1024,27], index: 0, kind: input, shape index: {}]   ;;  %s14432_s1 = inlined_call_operand.vmem [shape: bf16[27,32], index: 1, kind: input, shape index: {}]   ;;  %s14433_s2 = inlined_call_operand.vmem [shape: f32[1,32], index: 2, kind: input, shape index: {}]   ;;  %s14434_s3 = inlined_call_operand.vmem [shape: bf16[9,32,64], index: 3, kind: input, shape index: {}]   ;;  %s14435_s4 = inlined_call_operand.vmem [shape: f32[1,64], index: 4, kind: input, shape index: {}]   ;;  %s14436_s5 = inlined_call_operand.vmem [shape: bf16[9,64,128], index: 5, kind: input, shape index: {}]   ;;  %s14437_s6 = inlined_call_operand.vmem [shape: f32[1,128], index: 6, kind: input, shape index: {}]   ;;  %s14438_s7 = inlined_call_operand.vmem [shape: f32[10,32,128], index: 7, kind: input, shape index: {}]   ;;  %s14439_s8 = inlined_call_operand.vmem [shape: f32[1,128], index: 8, kind: input, shape index: {}]   ;;  %s14440_s9 = inlined_call_operand.hbm [shape: f32[2,1,128], index: 9, kind: output, shape index: {}]  }
   0x1   :  { %16 = vsyncpa [#allocation8 + $0x1], 0  ;;  %s12477_s30 = smov 0   ;;  %s12479_s10 = smov 0  }
   0x2   :  { %s12481_s11 = smov 0   ;;  %s12483_s12 = smov 0  }
   0x3 LB: > { %s12498_s13 = sadd.s32 4294967295, %s12422_s12   ;;  %s9423_s14 = sadd.s32 4294967294, %s12422_s12   ;;  %s12422_s12 = sphi %s12483_s12, %s14523_s12   ;;  %s12418_s11 = sphi %s12481_s11, %s14522_s11   ;;  %s12414_s10 = sphi %s12479_s10, %s14521_s10   ;;  %s12410_s30 = sphi %s12477_s30, %s14520_s30  }
   0x4   : > { %s12502_s15 = sadd.s32 1, %s12422_s12   ;;  %s223_s16 = sadd.s32 1, %s12418_s11 }
   0x5   : > { %s220_s17 = ssub.s32 %s12422_s12, %s12502_s15  ;;  %p233_p0 = scmp.ne.s32.totalorder %s12418_s11, %s12414_s10 }
   0x6   : > { %p221_p1 = scmp.eq.s32.totalorder %s220_s17, 0  ;;  %p234_p2 = scmp.eq.s32.totalorder %s12498_s13, 1 }
   0x7   : > { %p239_p3 = scmp.ne.s32.totalorder %s12414_s10, %s12410_s30  ;;  %p240_p4 = scmp.eq.s32.totalorder %s9423_s14, 1 }
   0x8   : > { %s12513_s18 = scalar_select %p221_p1, %s12418_s11, %s223_s16  }
   0x9   : > { %p12515_p5 = por %p234_p2, %p233_p0  ;;  %p12519_p6 = por %p240_p4, %p239_p3 }
   0xa   : > { %p9426_p7 = scmp.ge.s32.totalorder %s12422_s12, 1  ;;  %p290_p8 = scmp.lt.s32.totalorder %s12422_s12, 3 }
   0xc   : > { %p291_p9 = pnand %p9426_p7, %p290_p8 }
   0xe   : > { %294 = sbr.rel (%p291_p9) target bundleno = 2198 (0x896), region = 56 }
  0x15   : > { %v12237_v0 = vld [vmem:[%s14432_s1] sm:$0xff]   ;;  %vm1100_vm0 = vcmask 1044480   ;;  %v12238_v1 = vld [vmem:[%s14432_s1 + $0x8] sm:$0x3f]   ;;  %vm1101_vm1 = vcmask 1045504   ;;  %p325_p10 = scmp.lt.s32.totalorder %s12498_s13, 1 }
  0x16   : > { %10592 = vmatprep.subr.bf16.mxu0 %v12237_v0  ;;  %v12424_v2 = vmov 65535   ;;  %vm907_vm2 = vcmask 220160   ;;  %vm331_vm3 = vcmask 261120   ;;  %v14441_v37 = vmov 0.0   ;;  %v12303_v40 = vld [vmem:[%s14434_s3 + $0x10] sm:$0xff]   ;;  %v12304_v41 = vld [vmem:[%s14434_s3 + $0x18] sm:$0xff]  }
  0x17   : > { %10593 = vmatpush3.bf16.msra.mxu0 %v12237_v0  ;;  %v1102_v3 = vsel %vm1100_vm0, 4294967295, %v12424_v2  ;;  %s326_s25 = scalar_select %p325_p10, %s12498_s13, 1  ;;  %336 = vst.msk [vmem:[#allocation2 + $0x20] sm:$0xff] %vm331_vm3, %v14441_v37  ;;  %337 = vst.msk [vmem:[#allocation2 + $0x28] sm:$0xff] %vm331_vm3, %v14441_v37  ;;  %v12809_v0 = vld [vmem:[%s14434_s3 + $0x20] sm:$0xff]   ;;  %v12306_v2 = vld [vmem:[%s14434_s3 + $0x28] sm:$0xff]  }
  0x18   : > { %v1103_v4 = vsel %vm1101_vm1, %v1102_v3, 0  ;;  %335 = vst.msk [vmem:[#allocation2 + $0x18] sm:$0xff] %vm331_vm3, %v14441_v37  ;;  %338 = vst.msk [vmem:[#allocation2 + $0x30] sm:$0xff] %vm331_vm3, %v14441_v37  ;;  %11552 = vmatprep.subr.bf16.mxu1 %v12809_v0  ;;  %vm412_vm4 = vcmask 523264   ;;  %s323_s28 = sand.u32 1, %s12414_s10  }
  0x19   : > { %v1105_v5 = vand.u32 %v12238_v1, %v1103_v4  ;;  %s10111_s26 = sshll.u32 %s326_s25, 9  ;;  %339 = vst.msk [vmem:[#allocation2 + $0x38] sm:$0xff] %vm331_vm3, %v14441_v37  ;;  %340 = vst.msk [vmem:[#allocation2 + $0x40] sm:$0xff] %vm331_vm3, %v14441_v37  ;;  %11554 = vmatpush3.bf16.msra.mxu1 %v12809_v0  ;;  %s324_s14 = scalar_lea.vmem [#allocation7], %s323_s28 }
  0x1a   : > { %s12536_s29 = scalar_lea.vmem %s14431_s0, %s10111_s26  ;;  %341 = vst.msk [vmem:[#allocation2 + $0x48] sm:$0xff] %vm331_vm3, %v14441_v37  ;;  %342 = vst.msk [vmem:[#allocation2 + $0x50] sm:$0xff] %vm331_vm3, %v14441_v37  ;;  %11553 = vmatprep.subr.bf16.mxu1 %v12306_v2  ;;  %s9368_s16 = sshll.u32 %s324_s14, 4  ;;  %s14391_s16 = int_to_ptr.vmem [resolvable:$true] %s9368_s16 }
  0x1b   : > { %10594 = vmatprep.subr.bf16.mxu0 %v1105_v5  ;;  %v12239_v6 = vld [vmem:[%s12536_s29] sm:$0xff]   ;;  %v12240_v7 = vld [vmem:[%s12536_s29 + $0x8] sm:$0xff]   ;;  %v12241_v8 = vld [vmem:[%s12536_s29 + $0x10] sm:$0xff]   ;;  %343 = vst.msk [vmem:[#allocation2 + $0x58] sm:$0xff] %vm331_vm3, %v14441_v37  ;;  %s9356_s23 = scalar_lea.sflag [#allocation8], %s323_s28  ;;  %s12360_s24 = scalar_lea.vmem %s14391_s16, 16 }
  0x1c   : > { %10595 = vmatpush3.bf16.msra.mxu0 %v1105_v5  ;;  %10596 = vmatprep.mubr.msk.bf16.mxu0 %vm907_vm2, %v12239_v6  ;;  %v12242_v9 = vld [vmem:[%s12536_s29 + $0x18] sm:$0xff]   ;;  %v12243_v10 = vld [vmem:[%s12536_s29 + $0x20] sm:$0xff]   ;;  %v12244_v11 = vld [vmem:[%s12536_s29 + $0x28] sm:$0xff]   ;;  %344 = vst.msk [vmem:[#allocation2 + $0x60] sm:$0xff] %vm331_vm3, %v14441_v37  ;;  %p12361_p11 = scmp.ne.s32.totalorder %s14391_s16, %s12360_s24 }
  0x1d   : > { %v12245_v12 = vld [vmem:[%s12536_s29 + $0x30] sm:$0xff]   ;;  %v12246_v13 = vld [vmem:[%s12536_s29 + $0x38] sm:$0xff]   ;;  %v12247_v14 = vld [vmem:[%s12536_s29 + $0x40] sm:$0xff]   ;;  %345 = vst.msk [vmem:[#allocation2 + $0x68] sm:$0xff] %vm331_vm3, %v14441_v37  ;;  %10724 = vmatprep.subr.bf16.mxu0 %v12303_v40  ;;  %11555 = vmatpush3.bf16.msra.mxu1 %v12306_v2 }
  0x1e   : > { %v12248_v15 = vld [vmem:[%s12536_s29 + $0x48] sm:$0xff]   ;;  %v12249_v16 = vld [vmem:[%s12536_s29 + $0x50] sm:$0xff]   ;;  %v12250_v17 = vld [vmem:[%s12536_s29 + $0x58] sm:$0xff]   ;;  %346 = vst.msk [vmem:[#allocation2 + $0x70] sm:$0xff] %vm331_vm3, %v14441_v37  ;;  %p12362_p12 = pnand %p12361_p11, %p12515_p5 }
  0x1f   : > { %10597 = vmatmul.mubr.msk.bf16.vlgmr.msra.gmra.mrb[0].mxu0 %vm907_vm2, %v12240_v7  ;;  %v12251_v18 = vld [vmem:[%s12536_s29 + $0x60] sm:$0xff]   ;;  %v12252_v19 = vld [vmem:[%s12536_s29 + $0x68] sm:$0xff]   ;;  %v12253_v20 = vld [vmem:[%s12536_s29 + $0x70] sm:$0xff]   ;;  %347 = vst.msk [vmem:[#allocation2 + $0x78] sm:$0xff] %vm331_vm3, %v14441_v37 }
  0x20   : > { %10600 = vmatprep.mubr.msk.bf16.mxu0 %vm907_vm2, %v12241_v8  ;;  %v12254_v21 = vld [vmem:[%s12536_s29 + $0x78] sm:$0xff]   ;;  %v12255_v22 = vld [vmem:[%s12536_s29 + $0x80] sm:$0xff]   ;;  %v12256_v23 = vld [vmem:[%s12536_s29 + $0x88] sm:$0xff]   ;;  %348 = vst.msk [vmem:[#allocation2 + $0x80] sm:$0xff] %vm331_vm3, %v14441_v37  ;;  %10725 = vmatpush3.bf16.msra.mxu0 %v12303_v40  ;;  %p12363_p13 = pneg %p12362_p12 }
  0x21   : > { %v12257_v24 = vld [vmem:[%s12536_s29 + $0x90] sm:$0xff]   ;;  %v12258_v25 = vld [vmem:[%s12536_s29 + $0x98] sm:$0xff]   ;;  %v12259_v26 = vld [vmem:[%s12536_s29 + $0xa0] sm:$0xff]   ;;  %349 = vst.msk [vmem:[#allocation2 + $0x88] sm:$0xff] %vm331_vm3, %v14441_v37  ;;  %10726 = vmatprep.subr.bf16.mxu0 %v12304_v41 }
  0x22   : > { %v12260_v27 = vld [vmem:[%s12536_s29 + $0xa8] sm:$0xff]   ;;  %v12261_v28 = vld [vmem:[%s12536_s29 + $0xb0] sm:$0xff]   ;;  %v12262_v29 = vld [vmem:[%s12536_s29 + $0xb8] sm:$0xff]   ;;  %350 = vst.msk [vmem:[#allocation2 + $0x90] sm:$0xff] %vm331_vm3, %v14441_v37 }
  0x23   : > { %v12263_v30 = vld [vmem:[%s12536_s29 + $0xc0] sm:$0xff]   ;;  %v12264_v31 = vld [vmem:[%s12536_s29 + $0xc8] sm:$0xff]   ;;  %v12265_v32 = vld [vmem:[%s12536_s29 + $0xd0] sm:$0xff]   ;;  %351 = vst.msk [vmem:[#allocation2 + $0x98] sm:$0xff] %vm331_vm3, %v14441_v37 }
  0x24   : > { %v12266_v33 = vld [vmem:[%s12536_s29 + $0xd8] sm:$0xff]   ;;  %v12267_v34 = vld [vmem:[%s12536_s29 + $0xe0] sm:$0xff]   ;;  %v12597_v35 = vld [vmem:[%s12536_s29 + $0xe8] sm:$0xff]   ;;  %352 = vst.msk [vmem:[#allocation2 + $0xa0] sm:$0xff] %vm331_vm3, %v14441_v37  ;;  %10727 = vmatpush3.bf16.msra.mxu0 %v12304_v41 }
  0x25   : > { %v12600_v36 = vld [vmem:[%s12536_s29 + $0xf0] sm:$0xff]   ;;  %353 = vst.msk [vmem:[#allocation2 + $0xa8] sm:$0xff] %vm331_vm3, %v14441_v37  ;;  %354 = vst.msk [vmem:[#allocation2 + $0xb0] sm:$0xff] %vm331_vm3, %v14441_v37  ;;  %v12270_v38 = vld [vmem:[%s12536_s29 + $0xf8] sm:$0xff]  }
  0x26   : > { %355 = vst.msk [vmem:[#allocation2 + $0xb8] sm:$0xff] %vm331_vm3, %v14441_v37  ;;  %356 = vst.msk [vmem:[#allocation2 + $0xc0] sm:$0xff] %vm331_vm3, %v14441_v37  ;;  %v12271_v39 = vld [vmem:[%s12536_s29 + $0x100] sm:$0xff]   ;;  %v12272_v42 = vld [vmem:[%s12536_s29 + $0x108] sm:$0xff]  }
  0x27   : > { %10601 = vmatmul.mubr.msk.bf16.gmra.mrb[4].mxu0 %vm907_vm2, %v12242_v9  ;;  %357 = vst.msk [vmem:[#allocation2 + $0xc8] sm:$0xff] %vm331_vm3, %v14441_v37  ;;  %358 = vst.msk [vmem:[#allocation2 + $0xd0] sm:$0xff] %vm331_vm3, %v14441_v37  ;;  %v12273_v43 = vld [vmem:[%s12536_s29 + $0x110] sm:$0xff]   ;;  %v12274_v44 = vld [vmem:[%s12536_s29 + $0x118] sm:$0xff]  }
  0x28   : > { %10604 = vmatprep.mubr.msk.bf16.mxu0 %vm907_vm2, %v12243_v10  ;;  %359 = vst.msk [vmem:[#allocation2 + $0xd8] sm:$0xff] %vm331_vm3, %v14441_v37  ;;  %360 = vst.msk [vmem:[#allocation2 + $0xe0] sm:$0xff] %vm331_vm3, %v14441_v37  ;;  %v12275_v45 = vld [vmem:[%s12536_s29 + $0x120] sm:$0xff]   ;;  %v12276_v46 = vld [vmem:[%s12536_s29 + $0x128] sm:$0xff]  }
  0x29   : > { %361 = vst.msk [vmem:[#allocation2 + $0xe8] sm:$0xff] %vm331_vm3, %v14441_v37  ;;  %362 = vst.msk [vmem:[#allocation2 + $0xf0] sm:$0xff] %vm331_vm3, %v14441_v37  ;;  %v12277_v47 = vld [vmem:[%s12536_s29 + $0x130] sm:$0xff]   ;;  %v12278_v48 = vld [vmem:[%s12536_s29 + $0x138] sm:$0xff]  }
  0x2a   : > { %363 = vst.msk [vmem:[#allocation2 + $0xf8] sm:$0xff] %vm331_vm3, %v14441_v37  ;;  %364 = vst.msk [vmem:[#allocation2 + $0x100] sm:$0xff] %vm331_vm3, %v14441_v37  ;;  %v12279_v49 = vld [vmem:[%s12536_s29 + $0x140] sm:$0xff]   ;;  %v12280_v50 = vld [vmem:[%s12536_s29 + $0x148] sm:$0xff]  }
  0x2b   : > { %365 = vst.msk [vmem:[#allocation2 + $0x108] sm:$0xff] %vm331_vm3, %v14441_v37  ;;  %366 = vst.msk [vmem:[#allocation2 + $0x110] sm:$0xff] %vm331_vm3, %v14441_v37  ;;  %v12281_v51 = vld [vmem:[%s12536_s29 + $0x150] sm:$0xff]   ;;  %v12282_v52 = vld [vmem:[%s12536_s29 + $0x158] sm:$0xff]  }
  0x2c   : > { %367 = vst.msk [vmem:[#allocation2 + $0x118] sm:$0xff] %vm331_vm3, %v14441_v37  ;;  %368 = vst.msk [vmem:[#allocation2 + $0x120] sm:$0xff] %vm331_vm3, %v14441_v37  ;;  %v12283_v53 = vld [vmem:[%s12536_s29 + $0x160] sm:$0xff]   ;;  %v12284_v54 = vld [vmem:[%s12536_s29 + $0x168] sm:$0xff]  }
  0x2d   : > { %369 = vst.msk [vmem:[#allocation2 + $0x128] sm:$0xff] %vm331_vm3, %v14441_v37  ;;  %370 = vst.msk [vmem:[#allocation2 + $0x130] sm:$0xff] %vm331_vm3, %v14441_v37  ;;  %v12285_v55 = vld [vmem:[%s12536_s29 + $0x170] sm:$0xff]   ;;  %v12286_v56 = vld [vmem:[%s12536_s29 + $0x178] sm:$0xff]  }
  0x2e   : > { %371 = vst.msk [vmem:[#allocation2 + $0x138] sm:$0xff] %vm331_vm3, %v14441_v37  ;;  %372 = vst.msk [vmem:[#allocation2 + $0x140] sm:$0xff] %vm331_vm3, %v14441_v37  ;;  %v12287_v57 = vld [vmem:[%s12536_s29 + $0x180] sm:$0xff]   ;;  %v12288_v58 = vld [vmem:[%s12536_s29 + $0x188] sm:$0xff]  }
  0x2f   : > { %10605 = vmatmul.mubr.msk.bf16.gmra.mrb[8].mxu0 %vm907_vm2, %v12244_v11  ;;  %373 = vst.msk [vmem:[#allocation2 + $0x148] sm:$0xff] %vm331_vm3, %v14441_v37  ;;  %374 = vst.msk [vmem:[#allocation2 + $0x150] sm:$0xff] %vm331_vm3, %v14441_v37  ;;  %v12289_v59 = vld [vmem:[%s12536_s29 + $0x190] sm:$0xff]   ;;  %v12290_v60 = vld [vmem:[%s12536_s29 + $0x198] sm:$0xff]  }
  0x30   : > { %10608 = vmatprep.mubr.msk.bf16.mxu0 %vm907_vm2, %v12245_v12  ;;  %375 = vst.msk [vmem:[#allocation2 + $0x158] sm:$0xff] %vm331_vm3, %v14441_v37  ;;  %376 = vst.msk [vmem:[#allocation2 + $0x160] sm:$0xff] %vm331_vm3, %v14441_v37  ;;  %v12291_v61 = vld [vmem:[%s12536_s29 + $0x1a0] sm:$0xff]   ;;  %v12292_v62 = vld [vmem:[%s12536_s29 + $0x1a8] sm:$0xff]  }
  0x31   : > { %377 = vst.msk [vmem:[#allocation2 + $0x168] sm:$0xff] %vm331_vm3, %v14441_v37  ;;  %378 = vst.msk [vmem:[#allocation2 + $0x170] sm:$0xff] %vm331_vm3, %v14441_v37  ;;  %v12293_v63 = vld [vmem:[%s12536_s29 + $0x1b0] sm:$0xff]   ;;  %v12294_v4 = vld [vmem:[%s12536_s29 + $0x1b8] sm:$0xff]  }
  0x32   : > { %379 = vst.msk [vmem:[#allocation2 + $0x178] sm:$0xff] %vm331_vm3, %v14441_v37  ;;  %380 = vst.msk [vmem:[#allocation2 + $0x180] sm:$0xff] %vm331_vm3, %v14441_v37  ;;  %v12295_v6 = vld [vmem:[%s12536_s29 + $0x1c0] sm:$0xff]  }
  0x33   : > { %381 = vst.msk [vmem:[#allocation2 + $0x188] sm:$0xff] %vm331_vm3, %v14441_v37  ;;  %382 = vst.msk [vmem:[#allocation2 + $0x190] sm:$0xff] %vm331_vm3, %v14441_v37  ;;  %v12823_v8 = vld [vmem:[%s14433_s2] ss:$0 sm:$0xff] }
  0x34   : > { %383 = vst.msk [vmem:[#allocation2 + $0x198] sm:$0xff] %vm331_vm3, %v14441_v37  ;;  %384 = vst.msk [vmem:[#allocation2 + $0x1a0] sm:$0xff] %vm331_vm3, %v14441_v37  ;;  %v12299_v40 = vld [vmem:[%s12536_s29 + $0x1e0] sm:$0xff]  }
  0x35   : > { %385 = vst.msk [vmem:[#allocation2 + $0x1a8] sm:$0xff] %vm331_vm3, %v14441_v37  ;;  %386 = vst.msk [vmem:[#allocation2 + $0x1b0] sm:$0xff] %vm331_vm3, %v14441_v37 }
  0x36   : > { %387 = vst.msk [vmem:[#allocation2 + $0x1b8] sm:$0xff] %vm331_vm3, %v14441_v37  ;;  %388 = vst.msk [vmem:[#allocation2 + $0x1c0] sm:$0xff] %vm331_vm3, %v14441_v37 }
  0x37   : > { %10609 = vmatmul.mubr.msk.bf16.gmra.mrb[12].mxu0 %vm907_vm2, %v12246_v13  ;;  %389 = vst.msk [vmem:[#allocation2 + $0x1c8] sm:$0xff] %vm331_vm3, %v14441_v37  ;;  %390 = vst.msk [vmem:[#allocation2 + $0x1d0] sm:$0xff] %vm331_vm3, %v14441_v37 }
  0x38   : > { %10612 = vmatprep.mubr.msk.bf16.mxu0 %vm907_vm2, %v12247_v14  ;;  %391 = vst.msk [vmem:[#allocation2 + $0x1d8] sm:$0xff] %vm331_vm3, %v14441_v37  ;;  %392 = vst.msk [vmem:[#allocation2 + $0x1e0] sm:$0xff] %vm331_vm3, %v14441_v37 }
  0x39   : > { %393 = vst.msk [vmem:[#allocation2 + $0x1e8] sm:$0xff] %vm331_vm3, %v14441_v37  ;;  %394 = vst.msk [vmem:[#allocation2 + $0x1f0] sm:$0xff] %vm331_vm3, %v14441_v37 }
  0x3a   : > { %395 = vst.msk [vmem:[#allocation2 + $0x1f8] sm:$0xff] %vm331_vm3, %v14441_v37  ;;  %396 = vst.msk [vmem:[#allocation2 + $0x200] sm:$0xff] %vm331_vm3, %v14441_v37 }
  0x3b   : > { %397 = vst.msk [vmem:[#allocation2 + $0x208] sm:$0xff] %vm331_vm3, %v14441_v37  ;;  %398 = vst.msk [vmem:[#allocation2 + $0x210] sm:$0xff] %vm331_vm3, %v14441_v37 }
  0x3c   : > { %399 = vst.msk [vmem:[#allocation2 + $0x218] sm:$0xff] %vm331_vm3, %v14441_v37  ;;  %400 = vst.msk [vmem:[#allocation2 + $0x220] sm:$0xff] %vm331_vm3, %v14441_v37 }
  0x3d   : > { %401 = vst.msk [vmem:[#allocation2 + $0x228] sm:$0xff] %vm331_vm3, %v14441_v37  ;;  %402 = vst.msk [vmem:[#allocation2 + $0x230] sm:$0xff] %vm331_vm3, %v14441_v37 }
  0x3e   : > { %403 = vst.msk [vmem:[#allocation2 + $0x238] sm:$0xff] %vm331_vm3, %v14441_v37  ;;  %404 = vst.msk [vmem:[#allocation2 + $0x240] sm:$0xff] %vm331_vm3, %v14441_v37 }
  0x3f   : > { %10613 = vmatmul.mubr.msk.bf16.gmra.mrb[16].mxu0 %vm907_vm2, %v12248_v15  ;;  %405 = vst.msk [vmem:[#allocation2 + $0x248] sm:$0xff] %vm331_vm3, %v14441_v37  ;;  %406 = vst.msk [vmem:[#allocation2 + $0x250] sm:$0xff] %vm331_vm3, %v14441_v37  ;;  %v12296_v15 = vld [vmem:[%s12536_s29 + $0x1c8] sm:$0xff]  }
  0x40   : > { %10616 = vmatprep.mubr.msk.bf16.mxu0 %vm907_vm2, %v12249_v16  ;;  %407 = vst.msk [vmem:[#allocation2 + $0x258] sm:$0xff] %vm331_vm3, %v14441_v37  ;;  %408 = vst.msk [vmem:[#allocation2 + $0x260] sm:$0xff] %vm331_vm3, %v14441_v37 }
  0x47   : > { %10617 = vmatmul.mubr.msk.bf16.gmra.mrb[20].mxu0 %vm907_vm2, %v12250_v17 }
  0x48   : > { %10620 = vmatprep.mubr.msk.bf16.mxu0 %vm907_vm2, %v12251_v18 }
  0x4f   : > { %10621 = vmatmul.mubr.msk.bf16.gmra.mrb[24].mxu0 %vm907_vm2, %v12252_v19  ;;  %v12297_v19 = vld [vmem:[%s12536_s29 + $0x1d0] sm:$0xff]  }
  0x50   : > { %10624 = vmatprep.mubr.msk.bf16.mxu0 %vm907_vm2, %v12253_v20 }
  0x57   : > { %10625 = vmatmul.mubr.msk.bf16.gmra.mrb[28].mxu0 %vm907_vm2, %v12254_v21 }
  0x58   : > { %10628 = vmatprep.mubr.msk.bf16.mxu0 %vm907_vm2, %v12255_v22 }
  0x5f   : > { %10629 = vmatmul.mubr.msk.bf16.gmra.mrb[32].mxu0 %vm907_vm2, %v12256_v23 }
  0x60   : > { %10632 = vmatprep.mubr.msk.bf16.mxu0 %vm907_vm2, %v12257_v24 }
  0x67   : > { %10633 = vmatmul.mubr.msk.bf16.gmra.mrb[36].mxu0 %vm907_vm2, %v12258_v25 }
  0x68   : > { %10636 = vmatprep.mubr.msk.bf16.mxu0 %vm907_vm2, %v12259_v26 }
  0x6f   : > { %10637 = vmatmul.mubr.msk.bf16.gmra.mrb[40].mxu0 %vm907_vm2, %v12260_v27 }
  0x70   : > { %10640 = vmatprep.mubr.msk.bf16.mxu0 %vm907_vm2, %v12261_v28 }
  0x77   : > { %10641 = vmatmul.mubr.msk.bf16.gmra.mrb[44].mxu0 %vm907_vm2, %v12262_v29 }
  0x78   : > { %10644 = vmatprep.mubr.msk.bf16.mxu0 %vm907_vm2, %v12263_v30 }
  0x7f   : > { %10645 = vmatmul.mubr.msk.bf16.gmra.mrb[48].mxu0 %vm907_vm2, %v12264_v31 }
  0x80   : > { %10648 = vmatprep.mubr.msk.bf16.mxu0 %vm907_vm2, %v12265_v32 }
  0x87   : > { %10649 = vmatmul.mubr.msk.bf16.gmra.mrb[52].mxu0 %vm907_vm2, %v12266_v33 }
  0x88   : > { %10652 = vmatprep.mubr.msk.bf16.mxu0 %vm907_vm2, %v12267_v34 }
  0x8f   : > { %10653 = vmatmul.mubr.msk.bf16.gmra.mrb[56].mxu0 %vm907_vm2, %v12597_v35 }
  0x90   : > { %10656 = vmatprep.mubr.msk.bf16.mxu0 %vm907_vm2, %v12600_v36 }
  0x97   : > { %10657 = vmatmul.mubr.msk.bf16.gmra.mrb[60].mxu0 %vm907_vm2, %v12270_v38  ;;  %v12298_v38 = vld [vmem:[%s12536_s29 + $0x1d8] sm:$0xff]  }
  0x98   : > { %10660 = vmatprep.mubr.msk.bf16.mxu0 %vm907_vm2, %v12271_v39 }
  0x9f   : > { %10661 = vmatmul.mubr.msk.bf16.gmra.mrb[64].mxu0 %vm907_vm2, %v12272_v42 }
  0xa0   : > { %10664 = vmatprep.mubr.msk.bf16.mxu0 %vm907_vm2, %v12273_v43 }
  0xa7   : > { %10665 = vmatmul.mubr.msk.bf16.gmra.mrb[68].mxu0 %vm907_vm2, %v12274_v44 }
  0xa8   : > { %10668 = vmatprep.mubr.msk.bf16.mxu0 %vm907_vm2, %v12275_v45 }
  0xaf   : > { %10669 = vmatmul.mubr.msk.bf16.gmra.mrb[72].mxu0 %vm907_vm2, %v12276_v46 }
  0xb0   : > { %10672 = vmatprep.mubr.msk.bf16.mxu0 %vm907_vm2, %v12277_v47 }
  0xb7   : > { %10673 = vmatmul.mubr.msk.bf16.gmra.mrb[76].mxu0 %vm907_vm2, %v12278_v48 }
  0xb8   : > { %10676 = vmatprep.mubr.msk.bf16.mxu0 %vm907_vm2, %v12279_v49 }
  0xbf   : > { %10677 = vmatmul.mubr.msk.bf16.gmra.mrb[80].mxu0 %vm907_vm2, %v12280_v50 }
  0xc0   : > { %10680 = vmatprep.mubr.msk.bf16.mxu0 %vm907_vm2, %v12281_v51 }
  0xc7   : > { %10681 = vmatmul.mubr.msk.bf16.gmra.mrb[84].mxu0 %vm907_vm2, %v12282_v52 }
  0xc8   : > { %10684 = vmatprep.mubr.msk.bf16.mxu0 %vm907_vm2, %v12283_v53  ;;  %v12300_v53 = vld [vmem:[%s12536_s29 + $0x1e8] sm:$0xff]  }
  0xcf   : > { %10685 = vmatmul.mubr.msk.bf16.gmra.mrb[88].mxu0 %vm907_vm2, %v12284_v54 }
  0xd0   : > { %10688 = vmatprep.mubr.msk.bf16.mxu0 %vm907_vm2, %v12285_v55 }
  0xd7   : > { %10689 = vmatmul.mubr.msk.bf16.gmra.mrb[92].mxu0 %vm907_vm2, %v12286_v56 }
  0xd8   : > { %10692 = vmatprep.mubr.msk.bf16.mxu0 %vm907_vm2, %v12287_v57 }
  0xdf   : > { %10693 = vmatmul.mubr.msk.bf16.gmra.mrb[96].mxu0 %vm907_vm2, %v12288_v58  ;;  %v12301_v58 = vld [vmem:[%s12536_s29 + $0x1f0] sm:$0xff]  }
  0xe0   : > { %10696 = vmatprep.mubr.msk.bf16.mxu0 %vm907_vm2, %v12289_v59 }
  0xe7   : > { %10697 = vmatmul.mubr.msk.bf16.gmra.mrb[100].mxu0 %vm907_vm2, %v12290_v60 }
  0xe8   : > { %10700 = vmatprep.mubr.msk.bf16.mxu0 %vm907_vm2, %v12291_v61 }
  0xef   : > { %10701 = vmatmul.mubr.msk.bf16.gmra.mrb[104].mxu0 %vm907_vm2, %v12292_v62 }
  0xf0   : > { %10704 = vmatprep.mubr.msk.bf16.mxu0 %vm907_vm2, %v12293_v63 }
  0xf2   : > { %v10598_v1 = vpop.f32.mrb[0].mxu0 }
  0xf3   : > { %v1141_v3 = vpop.f32.mrb[1].mxu0  ;;  %v1150_v9 = vadd.f32 %v10598_v1, %v12823_v8 }
  0xf4   : > { %v10599_v5 = vpop.f32.mrb[2].mxu0  ;;  %v1142_v10 = vadd.f32 %v12823_v8, %v1141_v3 }
  0xf5   : > { %v1144_v7 = vpop.f32.mrb[3].mxu0  ;;  %v1153_v12 = vadd.f32 %v10599_v5, %v12823_v8  ;;  %v1654_v20 = vmax.f32 %v1150_v9, 0.0 }
  0xf6   : > { %v1145_v16 = vadd.f32 %v12823_v8, %v1144_v7  ;;  %v1652_v24 = vmax.f32 %v1142_v10, 0.0 }
  0xf7   : > { %10705 = vmatmul.mubr.msk.bf16.gmra.mrb[108].mxu0 %vm907_vm2, %v12294_v4  ;;  %v1655_v27 = vmax.f32 %v1153_v12, 0.0  ;;  %v2200_v12 = vld [vmem:[#allocation2 + $0x28] sm:$0xff] }
  0xf8   : > { %10708 = vmatprep.mubr.msk.bf16.mxu0 %vm907_vm2, %v12295_v6  ;;  %v1653_v30 = vmax.f32 %v1145_v16, 0.0  ;;  %v12302_v16 = vld [vmem:[%s12536_s29 + $0x1f8] sm:$0xff]   ;;  %s10108_s29 = sshll.u32 %s12498_s13, 4  ;;  %s12426_s13 = smov [#allocation7]  }
  0xf9   : > { %s14389_s22 = scalar_lea.hbm %s14440_s9, %s10108_s29  ;;  %s12364_s25 = sshll.u32 %s12426_s13, 4  ;;  %s12365_s25 = int_to_ptr.vmem [resolvable:$false] %s12364_s25 }
  0xfa   : > { %v10602_v11 = vpop.f32.mrb[4].mxu0  ;;  %s12366_s26 = scalar_lea.vmem %s12365_s25, 32  ;;  %p12367_p0 = scmp.lt.s32.totalorder %s14391_s16, %s12365_s25 }
  0xfb   : > { %v1166_v13 = vadd.f32 %v10602_v11, %v12823_v8  ;;  %v1157_v14 = vpop.f32.mrb[5].mxu0  ;;  %v2199_v11 = vld [vmem:[#allocation2 + $0x20] sm:$0xff]  ;;  %p12368_p1 = scmp.lt.s32.totalorder %s12366_s26, %s12360_s24 }
  0xfc   : > { %v1158_v17 = vadd.f32 %v12823_v8, %v1157_v14  ;;  %v10603_v18 = vpop.f32.mrb[6].mxu0 }
  0xfd   : > { %v1658_v21 = vmax.f32 %v1166_v13, 0.0  ;;  %v1169_v22 = vadd.f32 %v10603_v18, %v12823_v8  ;;  %v1160_v23 = vpop.f32.mrb[7].mxu0  ;;  %v2263_v18 = vpack.c.bf16 %v2200_v12, %v2199_v11  ;;  %p12369_p2 = por %p12368_p1, %p12367_p0 }
  0xfe   : > { %v1656_v25 = vmax.f32 %v1158_v17, 0.0  ;;  %v1161_v26 = vadd.f32 %v12823_v8, %v1160_v23 }
  0xff   : > { %v1782_v28 = vmax.f32 %v1654_v20, %v1658_v21  ;;  %v1659_v29 = vmax.f32 %v1169_v22, 0.0  ;;  %10709 = vmatmul.mubr.msk.bf16.gmra.mrb[112].mxu0 %vm907_vm2, %v12296_v15  ;;  %v2201_v20 = vld [vmem:[#allocation2 + $0x30] sm:$0xff]  ;;  %v2202_v21 = vld [vmem:[#allocation2 + $0x38] sm:$0xff]  ;;  %p12370_p3 = pnand %p12369_p2, %p12363_p13 }
 0x100   : > { %v1780_v31 = vmax.f32 %v1652_v24, %v1656_v25  ;;  %v1657_v32 = vmax.f32 %v1161_v26, 0.0  ;;  %10712 = vmatprep.mubr.msk.bf16.mxu0 %vm907_vm2, %v12297_v19 }
 0x101   : > { %1846 = vst.msk [vmem:[#allocation4 + $0x10] sm:$0xff] %vm331_vm3, %v1782_v28  ;;  %v1783_v33 = vmax.f32 %v1655_v27, %v1659_v29 }
 0x102   : > { %1844 = vst.msk [vmem:[#allocation4] sm:$0xff] %vm331_vm3, %v1780_v31  ;;  %v1781_v34 = vmax.f32 %v1653_v30, %v1657_v32  ;;  %v10606_v35 = vpop.f32.mrb[8].mxu0 }
 0x103   : > { %1847 = vst.msk [vmem:[#allocation4 + $0x18] sm:$0xff] %vm331_vm3, %v1783_v33  ;;  %v1173_v36 = vpop.f32.mrb[9].mxu0  ;;  %v1182_v42 = vadd.f32 %v10606_v35, %v12823_v8 }
 0x104   : > { %1845 = vst.msk [vmem:[#allocation4 + $0x8] sm:$0xff] %vm331_vm3, %v1781_v34  ;;  %v10607_v39 = vpop.f32.mrb[10].mxu0  ;;  %v1174_v45 = vadd.f32 %v12823_v8, %v1173_v36  ;;  %v2264_v34 = vpack.c.bf16 %v2202_v21, %v2201_v20 }
 0x105   : > { %v1176_v41 = vpop.f32.mrb[11].mxu0  ;;  %v1185_v50 = vadd.f32 %v10607_v39, %v12823_v8  ;;  %v1662_v59 = vmax.f32 %v1182_v42, 0.0 }
 0x106   : > { %v1177_v55 = vadd.f32 %v12823_v8, %v1176_v41  ;;  %v1660_v63 = vmax.f32 %v1174_v45, 0.0 }
 0x107   : > { %10713 = vmatmul.mubr.msk.bf16.gmra.mrb[116].mxu0 %vm907_vm2, %v12298_v38  ;;  %v1663_v3 = vmax.f32 %v1185_v50, 0.0 }
 0x108   : > { %10716 = vmatprep.mubr.msk.bf16.mxu0 %vm907_vm2, %v12299_v40  ;;  %v1661_v6 = vmax.f32 %v1177_v55, 0.0  ;;  %v2205_v55 = vld [vmem:[#allocation2 + $0x50] sm:$0xff] }
 0x10a   : > { %v1910_v43 = vld [vmem:[#allocation4 + $0x10] ss:$2 sm:$0xff]  ;;  %v1974_v44 = vld [vmem:[#allocation4 + $0x11] ss:$2 sm:$0xff]  ;;  %v10610_v46 = vpop.f32.mrb[12].mxu0 }
 0x10b   : > { %v2036_v47 = vmax.f32 %v1910_v43, %v1974_v44  ;;  %v1908_v48 = vld [vmem:[#allocation4] ss:$2 sm:$0xff]  ;;  %v1972_v49 = vld [vmem:[#allocation4 + $0x1] ss:$2 sm:$0xff]  ;;  %v1198_v51 = vadd.f32 %v10610_v46, %v12823_v8  ;;  %v1189_v52 = vpop.f32.mrb[13].mxu0 }
 0x10c   : > { %v2035_v54 = vmax.f32 %v1908_v48, %v1972_v49  ;;  %v1190_v56 = vadd.f32 %v12823_v8, %v1189_v52  ;;  %v10611_v57 = vpop.f32.mrb[14].mxu0 }
 0x10d   : > { %v1666_v60 = vmax.f32 %v1198_v51, 0.0  ;;  %v1201_v61 = vadd.f32 %v10611_v57, %v12823_v8  ;;  %v1192_v62 = vpop.f32.mrb[15].mxu0  ;;  %2068 = vst.msk [vmem:[#allocation2 + $0x48] sm:$0xff] %vm331_vm3, %v2036_v47 }
 0x10e   : > { %v1664_v1 = vmax.f32 %v1190_v56, 0.0  ;;  %v1193_v2 = vadd.f32 %v12823_v8, %v1192_v62  ;;  %2067 = vst.msk [vmem:[#allocation2 + $0x40] sm:$0xff] %vm331_vm3, %v2035_v54  ;;  %v2206_v56 = vld [vmem:[#allocation2 + $0x58] sm:$0xff] }
 0x10f   : > { %v1786_v4 = vmax.f32 %v1662_v59, %v1666_v60  ;;  %v1667_v5 = vmax.f32 %v1201_v61, 0.0  ;;  %10717 = vmatmul.mubr.msk.bf16.gmra.mrb[120].mxu0 %vm907_vm2, %v12300_v53  ;;  %v2266_v61 = vpack.c.bf16 %v2206_v56, %v2205_v55 }
 0x110   : > { %v1784_v7 = vmax.f32 %v1660_v63, %v1664_v1  ;;  %v1665_v9 = vmax.f32 %v1193_v2, 0.0  ;;  %10720 = vmatprep.mubr.msk.bf16.mxu0 %vm907_vm2, %v12301_v58 }
 0x111   : > { %1850 = vst.msk [vmem:[#allocation4 + $0x30] sm:$0xff] %vm331_vm3, %v1786_v4  ;;  %v1787_v10 = vmax.f32 %v1663_v3, %v1667_v5  ;;  %v2209_v4 = vld [vmem:[#allocation2 + $0x70] sm:$0xff]  ;;  %v2210_v5 = vld [vmem:[#allocation2 + $0x78] sm:$0xff] }
 0x112   : > { %1848 = vst.msk [vmem:[#allocation4 + $0x20] sm:$0xff] %vm331_vm3, %v1784_v7  ;;  %v1785_v13 = vmax.f32 %v1661_v6, %v1665_v9  ;;  %v10614_v14 = vpop.f32.mrb[16].mxu0 }
 0x113   : > { %1851 = vst.msk [vmem:[#allocation4 + $0x38] sm:$0xff] %vm331_vm3, %v1787_v10  ;;  %v1205_v15 = vpop.f32.mrb[17].mxu0  ;;  %v1214_v22 = vadd.f32 %v10614_v14, %v12823_v8 }
 0x114   : > { %1849 = vst.msk [vmem:[#allocation4 + $0x28] sm:$0xff] %vm331_vm3, %v1785_v13  ;;  %v10615_v17 = vpop.f32.mrb[18].mxu0  ;;  %v1206_v25 = vadd.f32 %v12823_v8, %v1205_v15  ;;  %v2204_v27 = vld [vmem:[#allocation2 + $0x48] sm:$0xff] }
 0x115   : > { %v1208_v19 = vpop.f32.mrb[19].mxu0  ;;  %v1217_v31 = vadd.f32 %v10615_v17, %v12823_v8  ;;  %v2203_v35 = vld [vmem:[#allocation2 + $0x40] sm:$0xff]  ;;  %v1670_v41 = vmax.f32 %v1214_v22, 0.0 }
 0x116   : > { %v1209_v38 = vadd.f32 %v12823_v8, %v1208_v19  ;;  %v1668_v45 = vmax.f32 %v1206_v25, 0.0  ;;  %v2265_v48 = vpack.c.bf16 %v2204_v27, %v2203_v35 }
 0x117   : > { %10721 = vmatmul.mubr.msk.bf16.gmra.mrb[124].mxu0 %vm907_vm2, %v12302_v16  ;;  %v1671_v49 = vmax.f32 %v1217_v31, 0.0 }
 0x118   : > { %10728 = vmatprep.mubr.msk.bf16.mxu0 %vm331_vm3, %v2263_v18  ;;  %v1669_v52 = vmax.f32 %v1209_v38, 0.0  ;;  %v2268_v18 = vpack.c.bf16 %v2210_v5, %v2209_v4 }
 0x11a   : > { %v1914_v23 = vld [vmem:[#allocation4 + $0x30] ss:$2 sm:$0xff]  ;;  %v1978_v24 = vld [vmem:[#allocation4 + $0x31] ss:$2 sm:$0xff]  ;;  %v10618_v26 = vpop.f32.mrb[20].mxu0 }
 0x11b   : > { %v2038_v28 = vmax.f32 %v1914_v23, %v1978_v24  ;;  %v1912_v29 = vld [vmem:[#allocation4 + $0x20] ss:$2 sm:$0xff]  ;;  %v1976_v30 = vld [vmem:[#allocation4 + $0x21] ss:$2 sm:$0xff]  ;;  %v1230_v32 = vadd.f32 %v10618_v26, %v12823_v8  ;;  %v1221_v33 = vpop.f32.mrb[21].mxu0 }
 0x11c   : > { %v2037_v36 = vmax.f32 %v1912_v29, %v1976_v30  ;;  %v1222_v39 = vadd.f32 %v12823_v8, %v1221_v33  ;;  %v10619_v40 = vpop.f32.mrb[22].mxu0 }
 0x11d   : > { %v1674_v42 = vmax.f32 %v1230_v32, 0.0  ;;  %v1233_v43 = vadd.f32 %v10619_v40, %v12823_v8  ;;  %v1224_v44 = vpop.f32.mrb[23].mxu0  ;;  %2070 = vst.msk [vmem:[#allocation2 + $0x68] sm:$0xff] %vm331_vm3, %v2038_v28  ;;  %v2213_v40 = vld [vmem:[#allocation2 + $0x90] sm:$0xff] }
 0x11e   : > { %v1672_v46 = vmax.f32 %v1222_v39, 0.0  ;;  %v1225_v47 = vadd.f32 %v12823_v8, %v1224_v44  ;;  %2069 = vst.msk [vmem:[#allocation2 + $0x60] sm:$0xff] %vm331_vm3, %v2037_v36 }
 0x11f   : > { %v1790_v50 = vmax.f32 %v1670_v41, %v1674_v42  ;;  %v1675_v51 = vmax.f32 %v1233_v43, 0.0  ;;  %10729 = vmatmul.mubr.msk.bf16.vlgmr.msra.gmra.mrb[128].mxu0 %vm331_vm3, %v2264_v34  ;;  %v2214_v41 = vld [vmem:[#allocation2 + $0x98] sm:$0xff] }
 0x120   : > { %v1788_v53 = vmax.f32 %v1668_v45, %v1672_v46  ;;  %v1673_v54 = vmax.f32 %v1225_v47, 0.0  ;;  %10732 = vmatprep.mubr.msk.bf16.mxu0 %vm331_vm3, %v2265_v48  ;;  %v2270_v47 = vpack.c.bf16 %v2214_v41, %v2213_v40 }
 0x121   : > { %1854 = vst.msk [vmem:[#allocation4 + $0x50] sm:$0xff] %vm331_vm3, %v1790_v50  ;;  %v1791_v57 = vmax.f32 %v1671_v49, %v1675_v51 }
 0x122   : > { %1852 = vst.msk [vmem:[#allocation4 + $0x40] sm:$0xff] %vm331_vm3, %v1788_v53  ;;  %v1789_v58 = vmax.f32 %v1669_v52, %v1673_v54  ;;  %v10622_v59 = vpop.f32.mrb[24].mxu0 }
 0x123   : > { %1855 = vst.msk [vmem:[#allocation4 + $0x58] sm:$0xff] %vm331_vm3, %v1791_v57  ;;  %v1237_v60 = vpop.f32.mrb[25].mxu0  ;;  %v1246_v6 = vadd.f32 %v10622_v59, %v12823_v8 }
 0x124   : > { %1853 = vst.msk [vmem:[#allocation4 + $0x48] sm:$0xff] %vm331_vm3, %v1789_v58  ;;  %v10623_v62 = vpop.f32.mrb[26].mxu0  ;;  %v2208_v63 = vld [vmem:[#allocation2 + $0x68] sm:$0xff]  ;;  %v1238_v10 = vadd.f32 %v12823_v8, %v1237_v60 }
 0x125   : > { %v1240_v1 = vpop.f32.mrb[27].mxu0  ;;  %v2207_v2 = vld [vmem:[#allocation2 + $0x60] sm:$0xff]  ;;  %v1249_v15 = vadd.f32 %v10623_v62, %v12823_v8  ;;  %v1678_v23 = vmax.f32 %v1246_v6, 0.0 }
 0x126   : > { %v2267_v3 = vpack.c.bf16 %v2208_v63, %v2207_v2  ;;  %v1241_v20 = vadd.f32 %v12823_v8, %v1240_v1  ;;  %v1676_v27 = vmax.f32 %v1238_v10, 0.0 }
 0x127   : > { %10733 = vmatmul.mubr.msk.bf16.gmra.mrb[132].mxu0 %vm331_vm3, %v2266_v61  ;;  %v1679_v30 = vmax.f32 %v1249_v15, 0.0 }
 0x128   : > { %10736 = vmatprep.mubr.msk.bf16.mxu0 %vm331_vm3, %v2267_v3  ;;  %v1677_v33 = vmax.f32 %v1241_v20, 0.0 }
 0x12a   : > { %v1918_v7 = vld [vmem:[#allocation4 + $0x50] ss:$2 sm:$0xff]  ;;  %v1982_v9 = vld [vmem:[#allocation4 + $0x51] ss:$2 sm:$0xff]  ;;  %v10626_v11 = vpop.f32.mrb[28].mxu0 }
 0x12b   : > { %v2040_v12 = vmax.f32 %v1918_v7, %v1982_v9  ;;  %v1916_v13 = vld [vmem:[#allocation4 + $0x40] ss:$2 sm:$0xff]  ;;  %v1980_v14 = vld [vmem:[#allocation4 + $0x41] ss:$2 sm:$0xff]  ;;  %v1262_v16 = vadd.f32 %v10626_v11, %v12823_v8  ;;  %v1253_v17 = vpop.f32.mrb[29].mxu0 }
 0x12c   : > { %v2039_v19 = vmax.f32 %v1916_v13, %v1980_v14  ;;  %v1254_v21 = vadd.f32 %v12823_v8, %v1253_v17  ;;  %v10627_v22 = vpop.f32.mrb[30].mxu0 }
 0x12d   : > { %2072 = vst.msk [vmem:[#allocation2 + $0x88] sm:$0xff] %vm331_vm3, %v2040_v12  ;;  %v1682_v24 = vmax.f32 %v1262_v16, 0.0  ;;  %v1265_v25 = vadd.f32 %v10627_v22, %v12823_v8  ;;  %v1256_v26 = vpop.f32.mrb[31].mxu0 }
 0x12e   : > { %2071 = vst.msk [vmem:[#allocation2 + $0x80] sm:$0xff] %vm331_vm3, %v2039_v19  ;;  %v1680_v28 = vmax.f32 %v1254_v21, 0.0  ;;  %v1257_v29 = vadd.f32 %v12823_v8, %v1256_v26  ;;  %v2218_v19 = vld [vmem:[#allocation2 + $0xb8] sm:$0xff] }
 0x12f   : > { %v1794_v31 = vmax.f32 %v1678_v23, %v1682_v24  ;;  %v1683_v32 = vmax.f32 %v1265_v25, 0.0  ;;  %10737 = vmatmul.mubr.msk.bf16.gmra.mrb[136].mxu0 %vm331_vm3, %v2268_v18  ;;  %v2217_v18 = vld [vmem:[#allocation2 + $0xb0] sm:$0xff] }
 0x130   : > { %v1792_v34 = vmax.f32 %v1676_v27, %v1680_v28  ;;  %v1681_v35 = vmax.f32 %v1257_v29, 0.0  ;;  %v2272_v25 = vpack.c.bf16 %v2218_v19, %v2217_v18 }
 0x131   : > { %1858 = vst.msk [vmem:[#allocation4 + $0x70] sm:$0xff] %vm331_vm3, %v1794_v31  ;;  %v1795_v36 = vmax.f32 %v1679_v30, %v1683_v32 }
 0x132   : > { %1856 = vst.msk [vmem:[#allocation4 + $0x60] sm:$0xff] %vm331_vm3, %v1792_v34  ;;  %v1793_v38 = vmax.f32 %v1677_v33, %v1681_v35  ;;  %v10630_v39 = vpop.f32.mrb[32].mxu0 }
 0x133   : > { %1859 = vst.msk [vmem:[#allocation4 + $0x78] sm:$0xff] %vm331_vm3, %v1795_v36  ;;  %v1269_v42 = vpop.f32.mrb[33].mxu0  ;;  %v1278_v49 = vadd.f32 %v10630_v39, %v12823_v8 }
 0x134   : > { %1857 = vst.msk [vmem:[#allocation4 + $0x68] sm:$0xff] %vm331_vm3, %v1793_v38  ;;  %v10631_v43 = vpop.f32.mrb[34].mxu0  ;;  %v2212_v44 = vld [vmem:[#allocation2 + $0x88] sm:$0xff]  ;;  %v1270_v52 = vadd.f32 %v12823_v8, %v1269_v42 }
 0x135   : > { %v1272_v45 = vpop.f32.mrb[35].mxu0  ;;  %v2211_v46 = vld [vmem:[#allocation2 + $0x80] sm:$0xff]  ;;  %v1281_v57 = vadd.f32 %v10631_v43, %v12823_v8  ;;  %v1686_v1 = vmax.f32 %v1278_v49, 0.0 }
 0x136   : > { %v2269_v48 = vpack.c.bf16 %v2212_v44, %v2211_v46  ;;  %v1273_v61 = vadd.f32 %v12823_v8, %v1272_v45  ;;  %v1684_v5 = vmax.f32 %v1270_v52, 0.0 }
 0x137   : > { %v1687_v9 = vmax.f32 %v1281_v57, 0.0 }
 0x138   : > { %10740 = vmatprep.mubr.msk.bf16.mxu0 %vm331_vm3, %v2269_v48  ;;  %v1685_v12 = vmax.f32 %v1273_v61, 0.0  ;;  %v2222_v61 = vld [vmem:[#allocation2 + $0xd8] sm:$0xff] }
 0x139   : > { %10741 = vmatmul.mubr.msk.bf16.gmra.mrb[140].mxu0 %vm331_vm3, %v2270_v47 }
 0x13a   : > { %v1922_v50 = vld [vmem:[#allocation4 + $0x70] ss:$2 sm:$0xff]  ;;  %v1986_v51 = vld [vmem:[#allocation4 + $0x71] ss:$2 sm:$0xff]  ;;  %v10634_v53 = vpop.f32.mrb[36].mxu0 }
 0x13b   : > { %v2042_v54 = vmax.f32 %v1922_v50, %v1986_v51  ;;  %v1920_v55 = vld [vmem:[#allocation4 + $0x60] ss:$2 sm:$0xff]  ;;  %v1984_v56 = vld [vmem:[#allocation4 + $0x61] ss:$2 sm:$0xff]  ;;  %v1294_v58 = vadd.f32 %v10634_v53, %v12823_v8  ;;  %v1285_v59 = vpop.f32.mrb[37].mxu0  ;;  %v12932_v50 = vld [vmem:[%s14434_s3 + $0x30] sm:$0xff]  }
 0x13c   : > { %v2041_v60 = vmax.f32 %v1920_v55, %v1984_v56  ;;  %v1286_v62 = vadd.f32 %v12823_v8, %v1285_v59  ;;  %v10635_v63 = vpop.f32.mrb[38].mxu0  ;;  %10928 = vmatprep.subr.bf16.mxu1 %v12932_v50 }
 0x13d   : > { %2074 = vst.msk [vmem:[#allocation2 + $0xa8] sm:$0xff] %vm331_vm3, %v2042_v54  ;;  %v1690_v2 = vmax.f32 %v1294_v58, 0.0  ;;  %v1297_v3 = vadd.f32 %v10635_v63, %v12823_v8  ;;  %v1288_v4 = vpop.f32.mrb[39].mxu0 }
 0x13e   : > { %2073 = vst.msk [vmem:[#allocation2 + $0xa0] sm:$0xff] %vm331_vm3, %v2041_v60  ;;  %v1688_v6 = vmax.f32 %v1286_v62, 0.0  ;;  %v1289_v7 = vadd.f32 %v12823_v8, %v1288_v4  ;;  %v2221_v60 = vld [vmem:[#allocation2 + $0xd0] sm:$0xff] }
 0x13f   : > { %v1798_v10 = vmax.f32 %v1686_v1, %v1690_v2  ;;  %v1691_v11 = vmax.f32 %v1297_v3, 0.0  ;;  %v2274_v4 = vpack.c.bf16 %v2222_v61, %v2221_v60 }
 0x140   : > { %v1796_v13 = vmax.f32 %v1684_v5, %v1688_v6  ;;  %v1689_v14 = vmax.f32 %v1289_v7, 0.0 }
 0x141   : > { %1862 = vst.msk [vmem:[#allocation4 + $0x90] sm:$0xff] %vm331_vm3, %v1798_v10  ;;  %v1799_v15 = vmax.f32 %v1687_v9, %v1691_v11 }
 0x142   : > { %1860 = vst.msk [vmem:[#allocation4 + $0x80] sm:$0xff] %vm331_vm3, %v1796_v13  ;;  %v1797_v16 = vmax.f32 %v1685_v12, %v1689_v14  ;;  %v10638_v17 = vpop.f32.mrb[40].mxu0 }
 0x143   : > { %1863 = vst.msk [vmem:[#allocation4 + $0x98] sm:$0xff] %vm331_vm3, %v1799_v15  ;;  %v1301_v20 = vpop.f32.mrb[41].mxu0  ;;  %v1310_v27 = vadd.f32 %v10638_v17, %v12823_v8 }
 0x144   : > { %1861 = vst.msk [vmem:[#allocation4 + $0x88] sm:$0xff] %vm331_vm3, %v1797_v16  ;;  %v10639_v21 = vpop.f32.mrb[42].mxu0  ;;  %v2216_v22 = vld [vmem:[#allocation2 + $0xa8] sm:$0xff]  ;;  %v1302_v30 = vadd.f32 %v12823_v8, %v1301_v20 }
 0x145   : > { %v1304_v23 = vpop.f32.mrb[43].mxu0  ;;  %v2215_v24 = vld [vmem:[#allocation2 + $0xa0] sm:$0xff]  ;;  %v1313_v35 = vadd.f32 %v10639_v21, %v12823_v8  ;;  %v1694_v43 = vmax.f32 %v1310_v27, 0.0 }
 0x146   : > { %v2271_v26 = vpack.c.bf16 %v2216_v22, %v2215_v24  ;;  %v1305_v40 = vadd.f32 %v12823_v8, %v1304_v23  ;;  %v1692_v47 = vmax.f32 %v1302_v30, 0.0 }
 0x147   : > { %v1695_v51 = vmax.f32 %v1313_v35, 0.0 }
 0x148   : > { %10744 = vmatprep.mubr.msk.bf16.mxu0 %vm331_vm3, %v2271_v26  ;;  %v1693_v54 = vmax.f32 %v1305_v40, 0.0  ;;  %v2226_v40 = vld [vmem:[#allocation2 + $0xf8] sm:$0xff] }
 0x149   : > { %10745 = vmatmul.mubr.msk.bf16.gmra.mrb[144].mxu0 %vm331_vm3, %v2272_v25 }
 0x14a   : > { %v1926_v28 = vld [vmem:[#allocation4 + $0x90] ss:$2 sm:$0xff]  ;;  %v1990_v29 = vld [vmem:[#allocation4 + $0x91] ss:$2 sm:$0xff]  ;;  %v10642_v31 = vpop.f32.mrb[44].mxu0 }
 0x14b   : > { %v2044_v32 = vmax.f32 %v1926_v28, %v1990_v29  ;;  %v1924_v33 = vld [vmem:[#allocation4 + $0x80] ss:$2 sm:$0xff]  ;;  %v1988_v34 = vld [vmem:[#allocation4 + $0x81] ss:$2 sm:$0xff]  ;;  %v1326_v36 = vadd.f32 %v10642_v31, %v12823_v8  ;;  %v1317_v38 = vpop.f32.mrb[45].mxu0 }
 0x14c   : > { %v2043_v39 = vmax.f32 %v1924_v33, %v1988_v34  ;;  %v1318_v41 = vadd.f32 %v12823_v8, %v1317_v38  ;;  %v10643_v42 = vpop.f32.mrb[46].mxu0 }
 0x14d   : > { %2076 = vst.msk [vmem:[#allocation2 + $0xc8] sm:$0xff] %vm331_vm3, %v2044_v32  ;;  %v1698_v44 = vmax.f32 %v1326_v36, 0.0  ;;  %v1329_v45 = vadd.f32 %v10643_v42, %v12823_v8  ;;  %v1320_v46 = vpop.f32.mrb[47].mxu0 }
 0x14e   : > { %2075 = vst.msk [vmem:[#allocation2 + $0xc0] sm:$0xff] %vm331_vm3, %v2043_v39  ;;  %v1696_v48 = vmax.f32 %v1318_v41, 0.0  ;;  %v1321_v49 = vadd.f32 %v12823_v8, %v1320_v46  ;;  %v2225_v39 = vld [vmem:[#allocation2 + $0xf0] sm:$0xff] }
 0x14f   : > { %v1802_v52 = vmax.f32 %v1694_v43, %v1698_v44  ;;  %v1699_v53 = vmax.f32 %v1329_v45, 0.0 }
 0x150   : > { %v1800_v55 = vmax.f32 %v1692_v47, %v1696_v48  ;;  %v1697_v56 = vmax.f32 %v1321_v49, 0.0  ;;  %v2276_v48 = vpack.c.bf16 %v2226_v40, %v2225_v39 }
 0x151   : > { %1866 = vst.msk [vmem:[#allocation4 + $0xb0] sm:$0xff] %vm331_vm3, %v1802_v52  ;;  %v1803_v57 = vmax.f32 %v1695_v51, %v1699_v53 }
 0x152   : > { %1864 = vst.msk [vmem:[#allocation4 + $0xa0] sm:$0xff] %vm331_vm3, %v1800_v55  ;;  %v1801_v58 = vmax.f32 %v1693_v54, %v1697_v56  ;;  %v10646_v59 = vpop.f32.mrb[48].mxu0 }
 0x153   : > { %1867 = vst.msk [vmem:[#allocation4 + $0xb8] sm:$0xff] %vm331_vm3, %v1803_v57  ;;  %v1333_v62 = vpop.f32.mrb[49].mxu0  ;;  %v1342_v6 = vadd.f32 %v10646_v59, %v12823_v8 }
 0x154   : > { %1865 = vst.msk [vmem:[#allocation4 + $0xa8] sm:$0xff] %vm331_vm3, %v1801_v58  ;;  %v10647_v63 = vpop.f32.mrb[50].mxu0  ;;  %v2220_v1 = vld [vmem:[#allocation2 + $0xc8] sm:$0xff]  ;;  %v1334_v10 = vadd.f32 %v12823_v8, %v1333_v62 }
 0x155   : > { %v1336_v2 = vpop.f32.mrb[51].mxu0  ;;  %v2219_v3 = vld [vmem:[#allocation2 + $0xc0] sm:$0xff]  ;;  %v1345_v15 = vadd.f32 %v10647_v63, %v12823_v8  ;;  %v1702_v22 = vmax.f32 %v1342_v6, 0.0 }
 0x156   : > { %v2273_v5 = vpack.c.bf16 %v2220_v1, %v2219_v3  ;;  %v1337_v19 = vadd.f32 %v12823_v8, %v1336_v2  ;;  %v1700_v26 = vmax.f32 %v1334_v10, 0.0 }
 0x157   : > { %v1703_v29 = vmax.f32 %v1345_v15, 0.0 }
 0x158   : > { %10748 = vmatprep.mubr.msk.bf16.mxu0 %vm331_vm3, %v2273_v5  ;;  %v1701_v32 = vmax.f32 %v1337_v19, 0.0 }
 0x159   : > { %10749 = vmatmul.mubr.msk.bf16.gmra.mrb[148].mxu0 %vm331_vm3, %v2274_v4 }
 0x15a   : > { %v1930_v7 = vld [vmem:[#allocation4 + $0xb0] ss:$2 sm:$0xff]  ;;  %v1994_v9 = vld [vmem:[#allocation4 + $0xb1] ss:$2 sm:$0xff]  ;;  %v10650_v11 = vpop.f32.mrb[52].mxu0 }
 0x15b   : > { %v2046_v12 = vmax.f32 %v1930_v7, %v1994_v9  ;;  %v1928_v13 = vld [vmem:[#allocation4 + $0xa0] ss:$2 sm:$0xff]  ;;  %v1992_v14 = vld [vmem:[#allocation4 + $0xa1] ss:$2 sm:$0xff]  ;;  %v1358_v16 = vadd.f32 %v10650_v11, %v12823_v8  ;;  %v1349_v17 = vpop.f32.mrb[53].mxu0 }
 0x15c   : > { %v2045_v18 = vmax.f32 %v1928_v13, %v1992_v14  ;;  %v1350_v20 = vadd.f32 %v12823_v8, %v1349_v17  ;;  %v10651_v21 = vpop.f32.mrb[54].mxu0 }
 0x15d   : > { %2078 = vst.msk [vmem:[#allocation2 + $0xe8] sm:$0xff] %vm331_vm3, %v2046_v12  ;;  %v1706_v23 = vmax.f32 %v1358_v16, 0.0  ;;  %v1361_v24 = vadd.f32 %v10651_v21, %v12823_v8  ;;  %v1352_v25 = vpop.f32.mrb[55].mxu0  ;;  %v2229_v21 = vld [vmem:[#allocation2 + $0x110] sm:$0xff] }
 0x15e   : > { %2077 = vst.msk [vmem:[#allocation2 + $0xe0] sm:$0xff] %vm331_vm3, %v2045_v18  ;;  %v1704_v27 = vmax.f32 %v1350_v20, 0.0  ;;  %v1353_v28 = vadd.f32 %v12823_v8, %v1352_v25 }
 0x15f   : > { %v1806_v30 = vmax.f32 %v1702_v22, %v1706_v23  ;;  %v1707_v31 = vmax.f32 %v1361_v24, 0.0  ;;  %v2230_v22 = vld [vmem:[#allocation2 + $0x118] sm:$0xff] }
 0x160   : > { %v1804_v33 = vmax.f32 %v1700_v26, %v1704_v27  ;;  %v1705_v34 = vmax.f32 %v1353_v28, 0.0  ;;  %v3120_v24 = vld [vmem:[#allocation2 + $0xf1] sm:$0xff] }
 0x161   : > { %1870 = vst.msk [vmem:[#allocation4 + $0xd0] sm:$0xff] %vm331_vm3, %v1806_v30  ;;  %v1807_v35 = vmax.f32 %v1703_v29, %v1707_v31 }
 0x162   : > { %1868 = vst.msk [vmem:[#allocation4 + $0xc0] sm:$0xff] %vm331_vm3, %v1804_v33  ;;  %v1805_v36 = vmax.f32 %v1701_v32, %v1705_v34  ;;  %v10654_v38 = vpop.f32.mrb[56].mxu0  ;;  %v2278_v32 = vpack.c.bf16 %v2230_v22, %v2229_v21 }
 0x163   : > { %1871 = vst.msk [vmem:[#allocation4 + $0xd8] sm:$0xff] %vm331_vm3, %v1807_v35  ;;  %v1365_v41 = vpop.f32.mrb[57].mxu0  ;;  %v1374_v52 = vadd.f32 %v10654_v38, %v12823_v8  ;;  %v12309_v38 = vld [vmem:[%s14434_s3] sm:$0xff]  }
 0x164   : > { %1869 = vst.msk [vmem:[#allocation4 + $0xc8] sm:$0xff] %vm331_vm3, %v1805_v36  ;;  %v10655_v42 = vpop.f32.mrb[58].mxu0  ;;  %v2224_v43 = vld [vmem:[#allocation2 + $0xe8] sm:$0xff]  ;;  %v1366_v55 = vadd.f32 %v12823_v8, %v1365_v41  ;;  %v12308_v36 = vld [vmem:[%s14434_s3 + $0x38] sm:$0xff]   ;;  %10792 = vmatprep.subr.bf16.mxu0 %v12309_v38 }
 0x165   : > { %v3119_v44 = vld [vmem:[#allocation2 + $0xe9] sm:$0xff]  ;;  %v1368_v45 = vpop.f32.mrb[59].mxu0  ;;  %v2223_v46 = vld [vmem:[#allocation2 + $0xe0] sm:$0xff]  ;;  %v1377_v60 = vadd.f32 %v10655_v42, %v12823_v8  ;;  %v1710_v4 = vmax.f32 %v1374_v52, 0.0  ;;  %10793 = vmatpush3.bf16.msra.mxu0 %v12309_v38 }
 0x166   : > { %v3118_v47 = vld [vmem:[#allocation2 + $0xe1] sm:$0xff]  ;;  %v2275_v49 = vpack.c.bf16 %v2224_v43, %v2223_v46  ;;  %v1369_v1 = vadd.f32 %v12823_v8, %v1368_v45  ;;  %v1708_v9 = vmax.f32 %v1366_v55, 0.0 }
 0x167   : > { %v3170_v51 = vpack.c.bf16 %v3119_v44, %v3118_v47  ;;  %v1711_v12 = vmax.f32 %v1377_v60, 0.0 }
 0x168   : > { %10752 = vmatprep.mubr.msk.bf16.mxu0 %vm331_vm3, %v2275_v49  ;;  %v1709_v15 = vmax.f32 %v1369_v1, 0.0 }
 0x169   : > { %10888 = vmatprep.mubr.msk.bf16.mxu1 %vm331_vm3, %v3170_v51  ;;  %10753 = vmatmul.mubr.msk.bf16.gmra.mrb[152].mxu0 %vm331_vm3, %v2276_v48 }
 0x16a   : > { %v1934_v53 = vld [vmem:[#allocation4 + $0xd0] ss:$2 sm:$0xff]  ;;  %v1998_v54 = vld [vmem:[#allocation4 + $0xd1] ss:$2 sm:$0xff]  ;;  %v10658_v56 = vpop.f32.mrb[60].mxu0 }
 0x16b   : > { %v2048_v57 = vmax.f32 %v1934_v53, %v1998_v54  ;;  %v1932_v58 = vld [vmem:[#allocation4 + $0xc0] ss:$2 sm:$0xff]  ;;  %v1996_v59 = vld [vmem:[#allocation4 + $0xc1] ss:$2 sm:$0xff]  ;;  %v1390_v61 = vadd.f32 %v10658_v56, %v12823_v8  ;;  %v1381_v62 = vpop.f32.mrb[61].mxu0 }
 0x16c   : > { %v2047_v63 = vmax.f32 %v1932_v58, %v1996_v59  ;;  %v1382_v2 = vadd.f32 %v12823_v8, %v1381_v62  ;;  %v10659_v3 = vpop.f32.mrb[62].mxu0 }
 0x16d   : > { %2080 = vst.msk [vmem:[#allocation2 + $0x108] sm:$0xff] %vm331_vm3, %v2048_v57  ;;  %v1714_v5 = vmax.f32 %v1390_v61, 0.0  ;;  %v1393_v6 = vadd.f32 %v10659_v3, %v12823_v8  ;;  %v1384_v7 = vpop.f32.mrb[63].mxu0 }
 0x16e   : > { %2079 = vst.msk [vmem:[#allocation2 + $0x100] sm:$0xff] %vm331_vm3, %v2047_v63  ;;  %v1712_v10 = vmax.f32 %v1382_v2, 0.0  ;;  %v1385_v11 = vadd.f32 %v12823_v8, %v1384_v7 }
 0x16f   : > { %v1810_v13 = vmax.f32 %v1710_v4, %v1714_v5  ;;  %v1715_v14 = vmax.f32 %v1393_v6, 0.0 }
 0x170   : > { %v1808_v16 = vmax.f32 %v1708_v9, %v1712_v10  ;;  %v1713_v17 = vmax.f32 %v1385_v11, 0.0  ;;  %v2233_v9 = vld [vmem:[#allocation2 + $0x130] sm:$0xff]  ;;  %v2234_v10 = vld [vmem:[#allocation2 + $0x138] sm:$0xff] }
 0x171   : > { %1874 = vst.msk [vmem:[#allocation4 + $0xf0] sm:$0xff] %vm331_vm3, %v1810_v13  ;;  %v1811_v18 = vmax.f32 %v1711_v12, %v1715_v14  ;;  %v3124_v12 = vld [vmem:[#allocation2 + $0x111] sm:$0xff] }
 0x172   : > { %1872 = vst.msk [vmem:[#allocation4 + $0xe0] sm:$0xff] %vm331_vm3, %v1808_v16  ;;  %v1809_v19 = vmax.f32 %v1709_v15, %v1713_v17  ;;  %v10662_v20 = vpop.f32.mrb[64].mxu0 }
 0x173   : > { %1875 = vst.msk [vmem:[#allocation4 + $0xf8] sm:$0xff] %vm331_vm3, %v1811_v18  ;;  %v1397_v23 = vpop.f32.mrb[65].mxu0  ;;  %v1406_v39 = vadd.f32 %v10662_v20, %v12823_v8 }
 0x174   : > { %1873 = vst.msk [vmem:[#allocation4 + $0xe8] sm:$0xff] %vm331_vm3, %v1809_v19  ;;  %v10663_v25 = vpop.f32.mrb[66].mxu0  ;;  %v2228_v26 = vld [vmem:[#allocation2 + $0x108] sm:$0xff]  ;;  %v1398_v42 = vadd.f32 %v12823_v8, %v1397_v23  ;;  %v2280_v19 = vpack.c.bf16 %v2234_v10, %v2233_v9 }
 0x175   : > { %v3123_v27 = vld [vmem:[#allocation2 + $0x109] sm:$0xff]  ;;  %v1400_v28 = vpop.f32.mrb[67].mxu0  ;;  %v2227_v29 = vld [vmem:[#allocation2 + $0x100] sm:$0xff]  ;;  %v1409_v47 = vadd.f32 %v10663_v25, %v12823_v8  ;;  %v1718_v55 = vmax.f32 %v1406_v39, 0.0 }
 0x176   : > { %v3121_v30 = vld [vmem:[#allocation2 + $0xf9] sm:$0xff]  ;;  %v3122_v31 = vld [vmem:[#allocation2 + $0x101] sm:$0xff]  ;;  %v2277_v33 = vpack.c.bf16 %v2228_v26, %v2227_v29  ;;  %v1401_v52 = vadd.f32 %v12823_v8, %v1400_v28  ;;  %v1716_v59 = vmax.f32 %v1398_v42, 0.0 }
 0x177   : > { %v3171_v34 = vpack.c.bf16 %v3121_v30, %v3120_v24  ;;  %v3172_v35 = vpack.c.bf16 %v3123_v27, %v3122_v31  ;;  %v1719_v62 = vmax.f32 %v1409_v47, 0.0  ;;  %v13010_v28 = vld [vmem:[%s14434_s3 + $0x40] sm:$0xff]  }
 0x178   : > { %10756 = vmatprep.mubr.msk.bf16.mxu0 %vm331_vm3, %v2277_v33  ;;  %v1717_v2 = vmax.f32 %v1401_v52, 0.0 }
 0x179   : > { %10889 = vmatmul.mubr.msk.bf16.vlgmr.msra.gmra.mrb[0].mxu1 %vm331_vm3, %v3171_v34  ;;  %10757 = vmatmul.mubr.msk.bf16.gmra.mrb[156].mxu0 %vm331_vm3, %v2278_v32 }
 0x17a   : > { %10892 = vmatprep.mubr.msk.bf16.mxu1 %vm331_vm3, %v3172_v35  ;;  %v1938_v40 = vld [vmem:[#allocation4 + $0xf0] ss:$2 sm:$0xff]  ;;  %v2002_v41 = vld [vmem:[#allocation4 + $0xf1] ss:$2 sm:$0xff]  ;;  %v10666_v43 = vpop.f32.mrb[68].mxu0  ;;  %10929 = vmatpush3.bf16.msra.mxu1 %v12932_v50  ;;  %v12310_v50 = vld [vmem:[%s14434_s3 + $0x8] sm:$0xff]  }
 0x17b   : > { %v2050_v44 = vmax.f32 %v1938_v40, %v2002_v41  ;;  %v1936_v45 = vld [vmem:[#allocation4 + $0xe0] ss:$2 sm:$0xff]  ;;  %v2000_v46 = vld [vmem:[#allocation4 + $0xe1] ss:$2 sm:$0xff]  ;;  %v1422_v48 = vadd.f32 %v10666_v43, %v12823_v8  ;;  %v1413_v49 = vpop.f32.mrb[69].mxu0  ;;  %10930 = vmatprep.subr.bf16.mxu1 %v12308_v36  ;;  %10794 = vmatprep.subr.bf16.mxu0 %v12310_v50 }
 0x17c   : > { %v2049_v51 = vmax.f32 %v1936_v45, %v2000_v46  ;;  %v1414_v53 = vadd.f32 %v12823_v8, %v1413_v49  ;;  %v10667_v54 = vpop.f32.mrb[70].mxu0  ;;  %10795 = vmatpush3.bf16.msra.mxu0 %v12310_v50 }
 0x17d   : > { %2082 = vst.msk [vmem:[#allocation2 + $0x128] sm:$0xff] %vm331_vm3, %v2050_v44  ;;  %v1722_v56 = vmax.f32 %v1422_v48, 0.0  ;;  %v1425_v57 = vadd.f32 %v10667_v54, %v12823_v8  ;;  %v1416_v58 = vpop.f32.mrb[71].mxu0  ;;  %10860 = vmatprep.subr.bf16.mxu0 %v12809_v0 }
 0x17e   : > { %2081 = vst.msk [vmem:[#allocation2 + $0x120] sm:$0xff] %vm331_vm3, %v2049_v51  ;;  %v1720_v60 = vmax.f32 %v1414_v53, 0.0  ;;  %v1417_v61 = vadd.f32 %v12823_v8, %v1416_v58  ;;  %10931 = vmatpush3.bf16.msra.mxu1 %v12308_v36 }
 0x17f   : > { %v1814_v63 = vmax.f32 %v1718_v55, %v1722_v56  ;;  %v1723_v1 = vmax.f32 %v1425_v57, 0.0  ;;  %10996 = vmatprep.subr.bf16.mxu1 %v13010_v28  ;;  %v2237_v56 = vld [vmem:[#allocation2 + $0x150] sm:$0xff]  ;;  %v2238_v57 = vld [vmem:[#allocation2 + $0x158] sm:$0xff] }
 0x180   : > { %v1812_v3 = vmax.f32 %v1716_v59, %v1720_v60  ;;  %v1721_v4 = vmax.f32 %v1417_v61, 0.0  ;;  %v3128_v59 = vld [vmem:[#allocation2 + $0x131] sm:$0xff] }
 0x181   : > { %1878 = vst.msk [vmem:[#allocation4 + $0x110] sm:$0xff] %vm331_vm3, %v1814_v63  ;;  %v1815_v5 = vmax.f32 %v1719_v62, %v1723_v1 }
 0x182   : > { %1876 = vst.msk [vmem:[#allocation4 + $0x100] sm:$0xff] %vm331_vm3, %v1812_v3  ;;  %v1813_v6 = vmax.f32 %v1717_v2, %v1721_v4  ;;  %v10670_v7 = vpop.f32.mrb[72].mxu0  ;;  %v2282_v3 = vpack.c.bf16 %v2238_v57, %v2237_v56 }
 0x183   : > { %1879 = vst.msk [vmem:[#allocation4 + $0x118] sm:$0xff] %vm331_vm3, %v1815_v5  ;;  %v1429_v11 = vpop.f32.mrb[73].mxu0  ;;  %v1438_v23 = vadd.f32 %v10670_v7, %v12823_v8  ;;  %v13030_v7 = vld [vmem:[%s14433_s2] ss:$0 sm:$0xff] }
 0x184   : > { %1877 = vst.msk [vmem:[#allocation4 + $0x108] sm:$0xff] %vm331_vm3, %v1813_v6  ;;  %v10671_v13 = vpop.f32.mrb[74].mxu0  ;;  %v2232_v14 = vld [vmem:[#allocation2 + $0x128] sm:$0xff]  ;;  %v1430_v26 = vadd.f32 %v12823_v8, %v1429_v11 }
 0x185   : > { %v3127_v15 = vld [vmem:[#allocation2 + $0x129] sm:$0xff]  ;;  %v1432_v16 = vpop.f32.mrb[75].mxu0  ;;  %v2231_v0 = vld [vmem:[#allocation2 + $0x120] sm:$0xff]  ;;  %v1441_v32 = vadd.f32 %v10671_v13, %v12823_v8  ;;  %v1726_v40 = vmax.f32 %v1438_v23, 0.0 }
 0x186   : > { %v3125_v17 = vld [vmem:[#allocation2 + $0x119] sm:$0xff]  ;;  %v3126_v18 = vld [vmem:[#allocation2 + $0x121] sm:$0xff]  ;;  %v2279_v20 = vpack.c.bf16 %v2232_v14, %v2231_v0  ;;  %v1433_v36 = vadd.f32 %v12823_v8, %v1432_v16  ;;  %v1724_v44 = vmax.f32 %v1430_v26, 0.0 }
 0x187   : > { %v3173_v21 = vpack.c.bf16 %v3125_v17, %v3124_v12  ;;  %v3174_v22 = vpack.c.bf16 %v3127_v15, %v3126_v18  ;;  %v1727_v47 = vmax.f32 %v1441_v32, 0.0 }
 0x188   : > { %10760 = vmatprep.mubr.msk.bf16.mxu0 %vm331_vm3, %v2279_v20  ;;  %v1725_v51 = vmax.f32 %v1433_v36, 0.0 }
 0x189   : > { %10893 = vmatmul.mubr.msk.bf16.gmra.mrb[4].mxu1 %vm331_vm3, %v3173_v21  ;;  %10761 = vmatmul.mubr.msk.bf16.gmra.mrb[160].mxu0 %vm331_vm3, %v2280_v19 }
 0x18a   : > { %10896 = vmatprep.mubr.msk.bf16.mxu1 %vm331_vm3, %v3174_v22  ;;  %v1942_v24 = vld [vmem:[#allocation4 + $0x110] ss:$2 sm:$0xff]  ;;  %v2006_v25 = vld [vmem:[#allocation4 + $0x111] ss:$2 sm:$0xff]  ;;  %v10674_v27 = vpop.f32.mrb[76].mxu0 }
 0x18b   : > { %v2052_v29 = vmax.f32 %v1942_v24, %v2006_v25  ;;  %v1940_v30 = vld [vmem:[#allocation4 + $0x100] ss:$2 sm:$0xff]  ;;  %v2004_v31 = vld [vmem:[#allocation4 + $0x101] ss:$2 sm:$0xff]  ;;  %v1454_v33 = vadd.f32 %v10674_v27, %v12823_v8  ;;  %v1445_v34 = vpop.f32.mrb[77].mxu0 }
 0x18c   : > { %v2051_v35 = vmax.f32 %v1940_v30, %v2004_v31  ;;  %v1446_v38 = vadd.f32 %v12823_v8, %v1445_v34  ;;  %v10675_v39 = vpop.f32.mrb[78].mxu0 }
 0x18d   : > { %2084 = vst.msk [vmem:[#allocation2 + $0x148] sm:$0xff] %vm331_vm3, %v2052_v29  ;;  %v1730_v41 = vmax.f32 %v1454_v33, 0.0  ;;  %v1457_v42 = vadd.f32 %v10675_v39, %v12823_v8  ;;  %v1448_v43 = vpop.f32.mrb[79].mxu0 }
 0x18e   : > { %2083 = vst.msk [vmem:[#allocation2 + $0x140] sm:$0xff] %vm331_vm3, %v2051_v35  ;;  %v1728_v45 = vmax.f32 %v1446_v38, 0.0  ;;  %v1449_v46 = vadd.f32 %v12823_v8, %v1448_v43 }
 0x18f   : > { %v1818_v48 = vmax.f32 %v1726_v40, %v1730_v41  ;;  %v1731_v49 = vmax.f32 %v1457_v42, 0.0  ;;  %v2241_v41 = vld [vmem:[#allocation2 + $0x170] sm:$0xff]  ;;  %v2242_v42 = vld [vmem:[#allocation2 + $0x178] sm:$0xff] }
 0x190   : > { %v1816_v52 = vmax.f32 %v1724_v44, %v1728_v45  ;;  %v1729_v53 = vmax.f32 %v1449_v46, 0.0  ;;  %v3132_v44 = vld [vmem:[#allocation2 + $0x151] sm:$0xff] }
 0x191   : > { %1882 = vst.msk [vmem:[#allocation4 + $0x130] sm:$0xff] %vm331_vm3, %v1818_v48  ;;  %v1819_v54 = vmax.f32 %v1727_v47, %v1731_v49 }
 0x192   : > { %1880 = vst.msk [vmem:[#allocation4 + $0x120] sm:$0xff] %vm331_vm3, %v1816_v52  ;;  %v1817_v50 = vmax.f32 %v1725_v51, %v1729_v53  ;;  %v10678_v55 = vpop.f32.mrb[80].mxu0  ;;  %v2284_v53 = vpack.c.bf16 %v2242_v42, %v2241_v41 }
 0x193   : > { %1883 = vst.msk [vmem:[#allocation4 + $0x138] sm:$0xff] %vm331_vm3, %v1819_v54  ;;  %v1461_v58 = vpop.f32.mrb[81].mxu0  ;;  %v1470_v9 = vadd.f32 %v13030_v7, %v10678_v55 }
 0x194   : > { %1881 = vst.msk [vmem:[#allocation4 + $0x128] sm:$0xff] %vm331_vm3, %v1817_v50  ;;  %v10679_v8 = vpop.f32.mrb[82].mxu0  ;;  %v2236_v60 = vld [vmem:[#allocation2 + $0x148] sm:$0xff]  ;;  %v1462_v12 = vadd.f32 %v13030_v7, %v1461_v58 }
 0x195   : > { %v3131_v61 = vld [vmem:[#allocation2 + $0x149] sm:$0xff]  ;;  %v1464_v62 = vpop.f32.mrb[83].mxu0  ;;  %v2235_v63 = vld [vmem:[#allocation2 + $0x140] sm:$0xff]  ;;  %v1473_v0 = vadd.f32 %v13030_v7, %v10679_v8  ;;  %v1734_v23 = vmax.f32 %v1470_v9, 0.0 }
 0x196   : > { %v3129_v1 = vld [vmem:[#allocation2 + $0x139] sm:$0xff]  ;;  %v3130_v2 = vld [vmem:[#allocation2 + $0x141] sm:$0xff]  ;;  %v2281_v4 = vpack.c.bf16 %v2236_v60, %v2235_v63  ;;  %v1465_v20 = vadd.f32 %v13030_v7, %v1464_v62  ;;  %v1732_v27 = vmax.f32 %v1462_v12, 0.0 }
 0x197   : > { %v3175_v5 = vpack.c.bf16 %v3129_v1, %v3128_v59  ;;  %v3176_v6 = vpack.c.bf16 %v3131_v61, %v3130_v2  ;;  %v1735_v31 = vmax.f32 %v1473_v0, 0.0 }
 0x198   : > { %10764 = vmatprep.mubr.msk.bf16.mxu0 %vm331_vm3, %v2281_v4  ;;  %v1733_v34 = vmax.f32 %v1465_v20, 0.0 }
 0x199   : > { %10897 = vmatmul.mubr.msk.bf16.gmra.mrb[8].mxu1 %vm331_vm3, %v3175_v5  ;;  %10765 = vmatmul.mubr.msk.bf16.gmra.mrb[164].mxu0 %vm331_vm3, %v2282_v3 }
 0x19a   : > { %10900 = vmatprep.mubr.msk.bf16.mxu1 %vm331_vm3, %v3176_v6  ;;  %v1946_v10 = vld [vmem:[#allocation4 + $0x130] ss:$2 sm:$0xff]  ;;  %v2010_v11 = vld [vmem:[#allocation4 + $0x131] ss:$2 sm:$0xff]  ;;  %v10682_v13 = vpop.f32.mrb[84].mxu0 }
 0x19b   : > { %v2054_v14 = vmax.f32 %v1946_v10, %v2010_v11  ;;  %v1944_v15 = vld [vmem:[#allocation4 + $0x120] ss:$2 sm:$0xff]  ;;  %v2008_v16 = vld [vmem:[#allocation4 + $0x121] ss:$2 sm:$0xff]  ;;  %v1486_v17 = vadd.f32 %v13030_v7, %v10682_v13  ;;  %v1477_v18 = vpop.f32.mrb[85].mxu0 }
 0x19c   : > { %v2053_v19 = vmax.f32 %v1944_v15, %v2008_v16  ;;  %v1478_v21 = vadd.f32 %v13030_v7, %v1477_v18  ;;  %v10683_v22 = vpop.f32.mrb[86].mxu0 }
 0x19d   : > { %2086 = vst.msk [vmem:[#allocation2 + $0x168] sm:$0xff] %vm331_vm3, %v2054_v14  ;;  %v1738_v24 = vmax.f32 %v1486_v17, 0.0  ;;  %v1489_v25 = vadd.f32 %v13030_v7, %v10683_v22  ;;  %v1480_v26 = vpop.f32.mrb[87].mxu0 }
 0x19e   : > { %2085 = vst.msk [vmem:[#allocation2 + $0x160] sm:$0xff] %vm331_vm3, %v2053_v19  ;;  %v1736_v29 = vmax.f32 %v1478_v21, 0.0  ;;  %v1481_v30 = vadd.f32 %v13030_v7, %v1480_v26 }
 0x19f   : > { %v1822_v32 = vmax.f32 %v1734_v23, %v1738_v24  ;;  %v1739_v33 = vmax.f32 %v1489_v25, 0.0  ;;  %v2245_v24 = vld [vmem:[#allocation2 + $0x190] sm:$0xff]  ;;  %v2246_v25 = vld [vmem:[#allocation2 + $0x198] sm:$0xff] }
 0x1a0   : > { %v1820_v35 = vmax.f32 %v1732_v27, %v1736_v29  ;;  %v1737_v36 = vmax.f32 %v1481_v30, 0.0  ;;  %v3136_v27 = vld [vmem:[#allocation2 + $0x171] sm:$0xff] }
 0x1a1   : > { %1886 = vst.msk [vmem:[#allocation4 + $0x150] sm:$0xff] %vm331_vm3, %v1822_v32  ;;  %v1823_v38 = vmax.f32 %v1735_v31, %v1739_v33 }
 0x1a2   : > { %1884 = vst.msk [vmem:[#allocation4 + $0x140] sm:$0xff] %vm331_vm3, %v1820_v35  ;;  %v1821_v39 = vmax.f32 %v1733_v34, %v1737_v36  ;;  %v10686_v40 = vpop.f32.mrb[88].mxu0  ;;  %v2286_v36 = vpack.c.bf16 %v2246_v25, %v2245_v24 }
 0x1a3   : > { %1887 = vst.msk [vmem:[#allocation4 + $0x158] sm:$0xff] %vm331_vm3, %v1823_v38  ;;  %v1493_v43 = vpop.f32.mrb[89].mxu0  ;;  %v1502_v56 = vadd.f32 %v13030_v7, %v10686_v40 }
 0x1a4   : > { %1885 = vst.msk [vmem:[#allocation4 + $0x148] sm:$0xff] %vm331_vm3, %v1821_v39  ;;  %v10687_v45 = vpop.f32.mrb[90].mxu0  ;;  %v2240_v46 = vld [vmem:[#allocation2 + $0x168] sm:$0xff]  ;;  %v1494_v59 = vadd.f32 %v13030_v7, %v1493_v43 }
 0x1a5   : > { %v3135_v47 = vld [vmem:[#allocation2 + $0x169] sm:$0xff]  ;;  %v1496_v48 = vpop.f32.mrb[91].mxu0  ;;  %v2239_v49 = vld [vmem:[#allocation2 + $0x160] sm:$0xff]  ;;  %v1505_v63 = vadd.f32 %v13030_v7, %v10687_v45  ;;  %v1742_v9 = vmax.f32 %v1502_v56, 0.0 }
 0x1a6   : > { %v3133_v51 = vld [vmem:[#allocation2 + $0x159] sm:$0xff]  ;;  %v3134_v52 = vld [vmem:[#allocation2 + $0x161] sm:$0xff]  ;;  %v2283_v54 = vpack.c.bf16 %v2240_v46, %v2239_v49  ;;  %v1497_v4 = vadd.f32 %v13030_v7, %v1496_v48  ;;  %v1740_v13 = vmax.f32 %v1494_v59, 0.0 }
 0x1a7   : > { %v3177_v50 = vpack.c.bf16 %v3133_v51, %v3132_v44  ;;  %v3178_v55 = vpack.c.bf16 %v3135_v47, %v3134_v52  ;;  %v1743_v16 = vmax.f32 %v1505_v63, 0.0 }
 0x1a8   : > { %10768 = vmatprep.mubr.msk.bf16.mxu0 %vm331_vm3, %v2283_v54  ;;  %v1741_v18 = vmax.f32 %v1497_v4, 0.0 }
 0x1a9   : > { %10901 = vmatmul.mubr.msk.bf16.gmra.mrb[12].mxu1 %vm331_vm3, %v3177_v50  ;;  %10769 = vmatmul.mubr.msk.bf16.gmra.mrb[168].mxu0 %vm331_vm3, %v2284_v53 }
 0x1aa   : > { %10904 = vmatprep.mubr.msk.bf16.mxu1 %vm331_vm3, %v3178_v55  ;;  %v1950_v57 = vld [vmem:[#allocation4 + $0x150] ss:$2 sm:$0xff]  ;;  %v2014_v58 = vld [vmem:[#allocation4 + $0x151] ss:$2 sm:$0xff]  ;;  %v10690_v8 = vpop.f32.mrb[92].mxu0 }
 0x1ab   : > { %v2056_v60 = vmax.f32 %v1950_v57, %v2014_v58  ;;  %v1948_v61 = vld [vmem:[#allocation4 + $0x140] ss:$2 sm:$0xff]  ;;  %v2012_v62 = vld [vmem:[#allocation4 + $0x141] ss:$2 sm:$0xff]  ;;  %v1518_v1 = vadd.f32 %v13030_v7, %v10690_v8  ;;  %v1509_v2 = vpop.f32.mrb[93].mxu0 }
 0x1ac   : > { %v2055_v3 = vmax.f32 %v1948_v61, %v2012_v62  ;;  %v1510_v5 = vadd.f32 %v13030_v7, %v1509_v2  ;;  %v10691_v6 = vpop.f32.mrb[94].mxu0 }
 0x1ad   : > { %2088 = vst.msk [vmem:[#allocation2 + $0x188] sm:$0xff] %vm331_vm3, %v2056_v60  ;;  %v1746_v10 = vmax.f32 %v1518_v1, 0.0  ;;  %v1521_v11 = vadd.f32 %v13030_v7, %v10691_v6  ;;  %v1512_v12 = vpop.f32.mrb[95].mxu0 }
 0x1ae   : > { %2087 = vst.msk [vmem:[#allocation2 + $0x180] sm:$0xff] %vm331_vm3, %v2055_v3  ;;  %v1744_v14 = vmax.f32 %v1510_v5, 0.0  ;;  %v1513_v15 = vadd.f32 %v13030_v7, %v1512_v12 }
 0x1af   : > { %v1826_v0 = vmax.f32 %v1742_v9, %v1746_v10  ;;  %v1747_v17 = vmax.f32 %v1521_v11, 0.0  ;;  %v2249_v10 = vld [vmem:[#allocation2 + $0x1b0] sm:$0xff]  ;;  %v2250_v11 = vld [vmem:[#allocation2 + $0x1b8] sm:$0xff] }
 0x1b0   : > { %v1824_v19 = vmax.f32 %v1740_v13, %v1744_v14  ;;  %v1745_v20 = vmax.f32 %v1513_v15, 0.0  ;;  %v3140_v13 = vld [vmem:[#allocation2 + $0x191] sm:$0xff] }
 0x1b1   : > { %1890 = vst.msk [vmem:[#allocation4 + $0x170] sm:$0xff] %vm331_vm3, %v1826_v0  ;;  %v1827_v21 = vmax.f32 %v1743_v16, %v1747_v17 }
 0x1b2   : > { %1888 = vst.msk [vmem:[#allocation4 + $0x160] sm:$0xff] %vm331_vm3, %v1824_v19  ;;  %v1825_v22 = vmax.f32 %v1741_v18, %v1745_v20  ;;  %v10694_v23 = vpop.f32.mrb[96].mxu0  ;;  %v2288_v20 = vpack.c.bf16 %v2250_v11, %v2249_v10 }
 0x1b3   : > { %1891 = vst.msk [vmem:[#allocation4 + $0x178] sm:$0xff] %vm331_vm3, %v1827_v21  ;;  %v1525_v26 = vpop.f32.mrb[97].mxu0  ;;  %v1534_v41 = vadd.f32 %v13030_v7, %v10694_v23 }
 0x1b4   : > { %1889 = vst.msk [vmem:[#allocation4 + $0x168] sm:$0xff] %vm331_vm3, %v1825_v22  ;;  %v10695_v29 = vpop.f32.mrb[98].mxu0  ;;  %v2244_v30 = vld [vmem:[#allocation2 + $0x188] sm:$0xff]  ;;  %v1526_v44 = vadd.f32 %v13030_v7, %v1525_v26 }
 0x1b5   : > { %v3139_v31 = vld [vmem:[#allocation2 + $0x189] sm:$0xff]  ;;  %v1528_v32 = vpop.f32.mrb[99].mxu0  ;;  %v2243_v33 = vld [vmem:[#allocation2 + $0x180] sm:$0xff]  ;;  %v1537_v49 = vadd.f32 %v13030_v7, %v10695_v29  ;;  %v1750_v56 = vmax.f32 %v1534_v41, 0.0 }
 0x1b6   : > { %v3137_v34 = vld [vmem:[#allocation2 + $0x179] sm:$0xff]  ;;  %v3138_v35 = vld [vmem:[#allocation2 + $0x181] sm:$0xff]  ;;  %v2285_v38 = vpack.c.bf16 %v2244_v30, %v2243_v33  ;;  %v1529_v54 = vadd.f32 %v13030_v7, %v1528_v32  ;;  %v1748_v8 = vmax.f32 %v1526_v44, 0.0 }
 0x1b7   : > { %v3179_v39 = vpack.c.bf16 %v3137_v34, %v3136_v27  ;;  %v3180_v40 = vpack.c.bf16 %v3139_v31, %v3138_v35  ;;  %v1751_v62 = vmax.f32 %v1537_v49, 0.0 }
 0x1b8   : > { %10772 = vmatprep.mubr.msk.bf16.mxu0 %vm331_vm3, %v2285_v38  ;;  %v1749_v2 = vmax.f32 %v1529_v54, 0.0 }
 0x1b9   : > { %10905 = vmatmul.mubr.msk.bf16.gmra.mrb[16].mxu1 %vm331_vm3, %v3179_v39  ;;  %10773 = vmatmul.mubr.msk.bf16.gmra.mrb[172].mxu0 %vm331_vm3, %v2286_v36 }
 0x1ba   : > { %10908 = vmatprep.mubr.msk.bf16.mxu1 %vm331_vm3, %v3180_v40  ;;  %v1954_v42 = vld [vmem:[#allocation4 + $0x170] ss:$2 sm:$0xff]  ;;  %v2018_v43 = vld [vmem:[#allocation4 + $0x171] ss:$2 sm:$0xff]  ;;  %v10698_v45 = vpop.f32.mrb[100].mxu0 }
 0x1bb   : > { %v2058_v46 = vmax.f32 %v1954_v42, %v2018_v43  ;;  %v1952_v47 = vld [vmem:[#allocation4 + $0x160] ss:$2 sm:$0xff]  ;;  %v2016_v48 = vld [vmem:[#allocation4 + $0x161] ss:$2 sm:$0xff]  ;;  %v1550_v51 = vadd.f32 %v13030_v7, %v10698_v45  ;;  %v1541_v52 = vpop.f32.mrb[101].mxu0 }
 0x1bc   : > { %v2057_v53 = vmax.f32 %v1952_v47, %v2016_v48  ;;  %v1542_v50 = vadd.f32 %v13030_v7, %v1541_v52  ;;  %v10699_v55 = vpop.f32.mrb[102].mxu0 }
 0x1bd   : > { %2090 = vst.msk [vmem:[#allocation2 + $0x1a8] sm:$0xff] %vm331_vm3, %v2058_v46  ;;  %v1754_v57 = vmax.f32 %v1550_v51, 0.0  ;;  %v1553_v58 = vadd.f32 %v13030_v7, %v10699_v55  ;;  %v1544_v59 = vpop.f32.mrb[103].mxu0 }
 0x1be   : > { %2089 = vst.msk [vmem:[#allocation2 + $0x1a0] sm:$0xff] %vm331_vm3, %v2057_v53  ;;  %v1752_v60 = vmax.f32 %v1542_v50, 0.0  ;;  %v1545_v61 = vadd.f32 %v13030_v7, %v1544_v59 }
 0x1bf   : > { %v1830_v63 = vmax.f32 %v1750_v56, %v1754_v57  ;;  %v1755_v1 = vmax.f32 %v1553_v58, 0.0  ;;  %v2253_v57 = vld [vmem:[#allocation2 + $0x1d0] sm:$0xff]  ;;  %v2254_v58 = vld [vmem:[#allocation2 + $0x1d8] sm:$0xff] }
 0x1c0   : > { %v1828_v3 = vmax.f32 %v1748_v8, %v1752_v60  ;;  %v1753_v4 = vmax.f32 %v1545_v61, 0.0  ;;  %v3144_v8 = vld [vmem:[#allocation2 + $0x1b1] sm:$0xff] }
 0x1c1   : > { %1894 = vst.msk [vmem:[#allocation4 + $0x190] sm:$0xff] %vm331_vm3, %v1830_v63  ;;  %v1831_v5 = vmax.f32 %v1751_v62, %v1755_v1 }
 0x1c2   : > { %1892 = vst.msk [vmem:[#allocation4 + $0x180] sm:$0xff] %vm331_vm3, %v1828_v3  ;;  %v1829_v6 = vmax.f32 %v1749_v2, %v1753_v4  ;;  %v10702_v9 = vpop.f32.mrb[104].mxu0  ;;  %v13102_v4 = vpack.c.bf16 %v2254_v58, %v2253_v57 }
 0x1c3   : > { %1895 = vst.msk [vmem:[#allocation4 + $0x198] sm:$0xff] %vm331_vm3, %v1831_v5  ;;  %v1557_v12 = vpop.f32.mrb[105].mxu0  ;;  %v1566_v24 = vadd.f32 %v13030_v7, %v10702_v9 }
 0x1c4   : > { %1893 = vst.msk [vmem:[#allocation4 + $0x188] sm:$0xff] %vm331_vm3, %v1829_v6  ;;  %v10703_v14 = vpop.f32.mrb[106].mxu0  ;;  %v2248_v15 = vld [vmem:[#allocation2 + $0x1a8] sm:$0xff]  ;;  %v1558_v27 = vadd.f32 %v13030_v7, %v1557_v12 }
 0x1c5   : > { %v3143_v16 = vld [vmem:[#allocation2 + $0x1a9] sm:$0xff]  ;;  %v1560_v0 = vpop.f32.mrb[107].mxu0  ;;  %v2247_v17 = vld [vmem:[#allocation2 + $0x1a0] sm:$0xff]  ;;  %v1569_v33 = vadd.f32 %v13030_v7, %v10703_v14  ;;  %v1758_v41 = vmax.f32 %v1566_v24, 0.0 }
 0x1c6   : > { %v3141_v18 = vld [vmem:[#allocation2 + $0x199] sm:$0xff]  ;;  %v3142_v19 = vld [vmem:[#allocation2 + $0x1a1] sm:$0xff]  ;;  %v2287_v21 = vpack.c.bf16 %v2248_v15, %v2247_v17  ;;  %v1561_v38 = vadd.f32 %v13030_v7, %v1560_v0  ;;  %v1756_v45 = vmax.f32 %v1558_v27, 0.0 }
 0x1c7   : > { %v3181_v22 = vpack.c.bf16 %v3141_v18, %v3140_v13  ;;  %v3182_v23 = vpack.c.bf16 %v3143_v16, %v3142_v19  ;;  %v1759_v48 = vmax.f32 %v1569_v33, 0.0 }
 0x1c8   : > { %10776 = vmatprep.mubr.msk.bf16.mxu0 %vm331_vm3, %v2287_v21  ;;  %v1757_v52 = vmax.f32 %v1561_v38, 0.0 }
 0x1c9   : > { %10909 = vmatmul.mubr.msk.bf16.gmra.mrb[20].mxu1 %vm331_vm3, %v3181_v22  ;;  %10777 = vmatmul.mubr.msk.bf16.gmra.mrb[176].mxu0 %vm331_vm3, %v2288_v20 }
 0x1ca   : > { %10912 = vmatprep.mubr.msk.bf16.mxu1 %vm331_vm3, %v3182_v23  ;;  %v1958_v25 = vld [vmem:[#allocation4 + $0x190] ss:$2 sm:$0xff]  ;;  %v2022_v26 = vld [vmem:[#allocation4 + $0x191] ss:$2 sm:$0xff]  ;;  %v10706_v29 = vpop.f32.mrb[108].mxu0 }
 0x1cb   : > { %v2060_v30 = vmax.f32 %v1958_v25, %v2022_v26  ;;  %v1956_v31 = vld [vmem:[#allocation4 + $0x180] ss:$2 sm:$0xff]  ;;  %v2020_v32 = vld [vmem:[#allocation4 + $0x181] ss:$2 sm:$0xff]  ;;  %v1582_v34 = vadd.f32 %v13030_v7, %v10706_v29  ;;  %v1573_v35 = vpop.f32.mrb[109].mxu0 }
 0x1cc   : > { %v2059_v36 = vmax.f32 %v1956_v31, %v2020_v32  ;;  %v1574_v39 = vadd.f32 %v13030_v7, %v1573_v35  ;;  %v10707_v40 = vpop.f32.mrb[110].mxu0 }
 0x1cd   : > { %2092 = vst.msk [vmem:[#allocation2 + $0x1c8] sm:$0xff] %vm331_vm3, %v2060_v30  ;;  %v1762_v42 = vmax.f32 %v1582_v34, 0.0  ;;  %v1585_v43 = vadd.f32 %v13030_v7, %v10707_v40  ;;  %v1576_v44 = vpop.f32.mrb[111].mxu0 }
 0x1ce   : > { %2091 = vst.msk [vmem:[#allocation2 + $0x1c0] sm:$0xff] %vm331_vm3, %v2059_v36  ;;  %v1760_v46 = vmax.f32 %v1574_v39, 0.0  ;;  %v1577_v47 = vadd.f32 %v13030_v7, %v1576_v44 }
 0x1cf   : > { %v1834_v49 = vmax.f32 %v1758_v41, %v1762_v42  ;;  %v1763_v51 = vmax.f32 %v1585_v43, 0.0  ;;  %v2257_v42 = vld [vmem:[#allocation2 + $0x1f0] sm:$0xff]  ;;  %v2258_v43 = vld [vmem:[#allocation2 + $0x1f8] sm:$0xff] }
 0x1d0   : > { %v1832_v53 = vmax.f32 %v1756_v45, %v1760_v46  ;;  %v1761_v54 = vmax.f32 %v1577_v47, 0.0  ;;  %v3148_v45 = vld [vmem:[#allocation2 + $0x1d1] sm:$0xff] }
 0x1d1   : > { %1898 = vst.msk [vmem:[#allocation4 + $0x1b0] sm:$0xff] %vm331_vm3, %v1834_v49  ;;  %v1835_v50 = vmax.f32 %v1759_v48, %v1763_v51 }
 0x1d2   : > { %1896 = vst.msk [vmem:[#allocation4 + $0x1a0] sm:$0xff] %vm331_vm3, %v1832_v53  ;;  %v1833_v55 = vmax.f32 %v1757_v52, %v1761_v54  ;;  %v10710_v56 = vpop.f32.mrb[112].mxu0  ;;  %v13123_v54 = vpack.c.bf16 %v2258_v43, %v2257_v42 }
 0x1d3   : > { %1899 = vst.msk [vmem:[#allocation4 + $0x1b8] sm:$0xff] %vm331_vm3, %v1835_v50  ;;  %v1589_v59 = vpop.f32.mrb[113].mxu0  ;;  %v1598_v10 = vadd.f32 %v13030_v7, %v10710_v56 }
 0x1d4   : > { %1897 = vst.msk [vmem:[#allocation4 + $0x1a8] sm:$0xff] %vm331_vm3, %v1833_v55  ;;  %v10711_v60 = vpop.f32.mrb[114].mxu0  ;;  %v2252_v61 = vld [vmem:[#allocation2 + $0x1c8] sm:$0xff]  ;;  %v1590_v13 = vadd.f32 %v13030_v7, %v1589_v59 }
 0x1d5   : > { %v3147_v62 = vld [vmem:[#allocation2 + $0x1c9] sm:$0xff]  ;;  %v1592_v63 = vpop.f32.mrb[115].mxu0  ;;  %v2251_v1 = vld [vmem:[#allocation2 + $0x1c0] sm:$0xff]  ;;  %v1601_v17 = vadd.f32 %v13030_v7, %v10711_v60  ;;  %v1766_v24 = vmax.f32 %v1598_v10, 0.0 }
 0x1d6   : > { %v3145_v2 = vld [vmem:[#allocation2 + $0x1b9] sm:$0xff]  ;;  %v3146_v3 = vld [vmem:[#allocation2 + $0x1c1] sm:$0xff]  ;;  %v2289_v5 = vpack.c.bf16 %v2252_v61, %v2251_v1  ;;  %v1593_v21 = vadd.f32 %v13030_v7, %v1592_v63  ;;  %v1764_v29 = vmax.f32 %v1590_v13, 0.0 }
 0x1d7   : > { %v3183_v6 = vpack.c.bf16 %v3145_v2, %v3144_v8  ;;  %v3184_v9 = vpack.c.bf16 %v3147_v62, %v3146_v3  ;;  %v1767_v32 = vmax.f32 %v1601_v17, 0.0 }
 0x1d8   : > { %10780 = vmatprep.mubr.msk.bf16.mxu0 %vm331_vm3, %v2289_v5  ;;  %v1765_v35 = vmax.f32 %v1593_v21, 0.0 }
 0x1d9   : > { %10913 = vmatmul.mubr.msk.bf16.gmra.mrb[24].mxu1 %vm331_vm3, %v3183_v6  ;;  %10781 = vmatmul.mubr.msk.bf16.gmra.mrb[180].mxu0 %vm331_vm3, %v13102_v4 }
 0x1da   : > { %10916 = vmatprep.mubr.msk.bf16.mxu1 %vm331_vm3, %v3184_v9  ;;  %v1962_v11 = vld [vmem:[#allocation4 + $0x1b0] ss:$2 sm:$0xff]  ;;  %v2026_v12 = vld [vmem:[#allocation4 + $0x1b1] ss:$2 sm:$0xff]  ;;  %v10714_v14 = vpop.f32.mrb[116].mxu0 }
 0x1db   : > { %v2062_v15 = vmax.f32 %v1962_v11, %v2026_v12  ;;  %v1960_v16 = vld [vmem:[#allocation4 + $0x1a0] ss:$2 sm:$0xff]  ;;  %v2024_v0 = vld [vmem:[#allocation4 + $0x1a1] ss:$2 sm:$0xff]  ;;  %v1614_v18 = vadd.f32 %v13030_v7, %v10714_v14  ;;  %v1605_v19 = vpop.f32.mrb[117].mxu0 }
 0x1dc   : > { %v2061_v20 = vmax.f32 %v1960_v16, %v2024_v0  ;;  %v1606_v22 = vadd.f32 %v13030_v7, %v1605_v19  ;;  %v10715_v23 = vpop.f32.mrb[118].mxu0 }
 0x1dd   : > { %2094 = vst.msk [vmem:[#allocation2 + $0x1e8] sm:$0xff] %vm331_vm3, %v2062_v15  ;;  %v1770_v25 = vmax.f32 %v1614_v18, 0.0  ;;  %v1617_v26 = vadd.f32 %v13030_v7, %v10715_v23  ;;  %v1608_v27 = vpop.f32.mrb[119].mxu0 }
 0x1de   : > { %2093 = vst.msk [vmem:[#allocation2 + $0x1e0] sm:$0xff] %vm331_vm3, %v2061_v20  ;;  %v1768_v30 = vmax.f32 %v1606_v22, 0.0  ;;  %v1609_v31 = vadd.f32 %v13030_v7, %v1608_v27  ;;  %v3152_v27 = vld [vmem:[#allocation2 + $0x1f1] sm:$0xff] }
 0x1df   : > { %v1838_v33 = vmax.f32 %v1766_v24, %v1770_v25  ;;  %v1771_v34 = vmax.f32 %v1617_v26, 0.0  ;;  %v2261_v25 = vld [vmem:[#allocation2 + $0x210] sm:$0xff]  ;;  %v2262_v26 = vld [vmem:[#allocation2 + $0x218] sm:$0xff] }
 0x1e0   : > { %v1836_v36 = vmax.f32 %v1764_v29, %v1768_v30  ;;  %v1769_v38 = vmax.f32 %v1609_v31, 0.0  ;;  %v2099_v29 = vld [vmem:[#allocation2 + $0x1f] sm:$0xff]  ;;  %v2100_v30 = vld [vmem:[#allocation2 + $0x27] sm:$0xff] }
 0x1e1   : > { %1902 = vst.msk [vmem:[#allocation4 + $0x1d0] sm:$0xff] %vm331_vm3, %v1838_v33  ;;  %v1839_v39 = vmax.f32 %v1767_v32, %v1771_v34  ;;  %v13147_v34 = vpack.c.bf16 %v2262_v26, %v2261_v25  ;;  %v2123_v25 = vld [vmem:[#allocation2 + $0xdf] sm:$0xff]  ;;  %v2124_v26 = vld [vmem:[#allocation2 + $0xe7] sm:$0xff] }
 0x1e2   : > { %1900 = vst.msk [vmem:[#allocation4 + $0x1c0] sm:$0xff] %vm331_vm3, %v1836_v36  ;;  %v1837_v40 = vmax.f32 %v1765_v35, %v1769_v38  ;;  %v10718_v41 = vpop.f32.mrb[120].mxu0 }
 0x1e3   : > { %1903 = vst.msk [vmem:[#allocation4 + $0x1d8] sm:$0xff] %vm331_vm3, %v1839_v39  ;;  %v1621_v44 = vpop.f32.mrb[121].mxu0  ;;  %v1630_v57 = vadd.f32 %v13030_v7, %v10718_v41  ;;  %v2101_v41 = vld [vmem:[#allocation2 + $0x2f] sm:$0xff] }
 0x1e4   : > { %1901 = vst.msk [vmem:[#allocation4 + $0x1c8] sm:$0xff] %vm331_vm3, %v1837_v40  ;;  %v10719_v46 = vpop.f32.mrb[122].mxu0  ;;  %v2256_v47 = vld [vmem:[#allocation2 + $0x1e8] sm:$0xff]  ;;  %v1622_v8 = vadd.f32 %v13030_v7, %v1621_v44  ;;  %v2163_v40 = vpack.c.bf16 %v2100_v30, %v2099_v29  ;;  %v2102_v44 = vld [vmem:[#allocation2 + $0x37] sm:$0xff]  ;;  %v2175_v29 = vpack.c.bf16 %v2124_v26, %v2123_v25 }
 0x1e5   : > { %v3151_v48 = vld [vmem:[#allocation2 + $0x1e9] sm:$0xff]  ;;  %v1624_v49 = vpop.f32.mrb[123].mxu0  ;;  %v2255_v51 = vld [vmem:[#allocation2 + $0x1e0] sm:$0xff]  ;;  %v1633_v1 = vadd.f32 %v13030_v7, %v10719_v46  ;;  %v1774_v11 = vmax.f32 %v1630_v57, 0.0 }
 0x1e6   : > { %v3149_v52 = vld [vmem:[#allocation2 + $0x1d9] sm:$0xff]  ;;  %v3150_v53 = vld [vmem:[#allocation2 + $0x1e1] sm:$0xff]  ;;  %v13125_v50 = vpack.c.bf16 %v2256_v47, %v2255_v51  ;;  %v1625_v6 = vadd.f32 %v13030_v7, %v1624_v49  ;;  %v1772_v15 = vmax.f32 %v1622_v8, 0.0  ;;  %v2164_v49 = vpack.c.bf16 %v2102_v44, %v2101_v41  ;;  %v2125_v30 = vld [vmem:[#allocation2 + $0xef] sm:$0xff] }
 0x1e7   : > { %v3185_v55 = vpack.c.bf16 %v3149_v52, %v3148_v45  ;;  %v3186_v56 = vpack.c.bf16 %v3151_v48, %v3150_v53  ;;  %v1775_v17 = vmax.f32 %v1633_v1, 0.0  ;;  %v2103_v51 = vld [vmem:[#allocation2 + $0x3f] sm:$0xff]  ;;  %v2104_v52 = vld [vmem:[#allocation2 + $0x47] sm:$0xff]  ;;  %v2133_v44 = vld [vmem:[#allocation2 + $0x12f] sm:$0xff] }
 0x1e8   : > { %10784 = vmatprep.mubr.msk.bf16.mxu0 %vm331_vm3, %v13125_v50  ;;  %v1773_v20 = vmax.f32 %v1625_v6, 0.0  ;;  %v2165_v53 = vpack.c.bf16 %v2104_v52, %v2103_v51  ;;  %v12359_v57 = vld [vmem:[%s14434_s3 + $0x28] sm:$0xff]   ;;  %v2138_v52 = vld [vmem:[#allocation2 + $0x157] sm:$0xff] }
 0x1e9   : > { %10917 = vmatmul.mubr.msk.bf16.gmra.mrb[28].mxu1 %vm331_vm3, %v3185_v55  ;;  %10785 = vmatmul.mubr.msk.bf16.gmra.mrb[184].mxu0 %vm331_vm3, %v13123_v54  ;;  %v12358_v55 = vld [vmem:[%s14434_s3 + $0x20] sm:$0xff]   ;;  %v2137_v51 = vld [vmem:[#allocation2 + $0x14f] sm:$0xff] }
 0x1ea   : > { %10920 = vmatprep.mubr.msk.bf16.mxu1 %vm331_vm3, %v3186_v56  ;;  %v1966_v58 = vld [vmem:[#allocation4 + $0x1d0] ss:$2 sm:$0xff]  ;;  %v2030_v59 = vld [vmem:[#allocation4 + $0x1d1] ss:$2 sm:$0xff]  ;;  %v10722_v60 = vpop.f32.mrb[124].mxu0  ;;  %v2112_v6 = vld [vmem:[#allocation2 + $0x87] sm:$0xff] }
 0x1eb   : > { %v2064_v61 = vmax.f32 %v1966_v58, %v2030_v59  ;;  %v1964_v62 = vld [vmem:[#allocation4 + $0x1c0] ss:$2 sm:$0xff]  ;;  %v2028_v63 = vld [vmem:[#allocation4 + $0x1c1] ss:$2 sm:$0xff]  ;;  %v1646_v2 = vadd.f32 %v13030_v7, %v10722_v60  ;;  %v1637_v3 = vpop.f32.mrb[125].mxu0  ;;  %v3156_v56 = vld [vmem:[#allocation2 + $0x211] sm:$0xff] }
 0x1ec   : > { %v2063_v5 = vmax.f32 %v1964_v62, %v2028_v63  ;;  %v1638_v9 = vadd.f32 %v13030_v7, %v1637_v3  ;;  %v10723_v10 = vpop.f32.mrb[126].mxu0  ;;  %v2105_v58 = vld [vmem:[#allocation2 + $0x4f] sm:$0xff]  ;;  %v2106_v59 = vld [vmem:[#allocation2 + $0x57] sm:$0xff]  ;;  %v2107_v60 = vld [vmem:[#allocation2 + $0x5f] sm:$0xff] }
 0x1ed   : > { %2096 = vst.msk [vmem:[#allocation2 + $0x208] sm:$0xff] %vm331_vm3, %v2064_v61  ;;  %v1778_v12 = vmax.f32 %v1646_v2, 0.0  ;;  %v1649_v13 = vadd.f32 %v13030_v7, %v10723_v10  ;;  %v1640_v14 = vpop.f32.mrb[127].mxu0  ;;  %v2108_v61 = vld [vmem:[#allocation2 + $0x67] sm:$0xff]  ;;  %v2166_v63 = vpack.c.bf16 %v2106_v59, %v2105_v58  ;;  %v2109_v2 = vld [vmem:[#allocation2 + $0x6f] sm:$0xff]  ;;  %v2110_v3 = vld [vmem:[#allocation2 + $0x77] sm:$0xff] }
 0x1ee   : > { %2095 = vst.msk [vmem:[#allocation2 + $0x200] sm:$0xff] %vm331_vm3, %v2063_v5  ;;  %v1776_v16 = vmax.f32 %v1638_v9, 0.0  ;;  %v1641_v0 = vadd.f32 %v13030_v7, %v1640_v14  ;;  %v2167_v1 = vpack.c.bf16 %v2108_v61, %v2107_v60  ;;  %v2111_v5 = vld [vmem:[#allocation2 + $0x7f] sm:$0xff]  ;;  %v2168_v9 = vpack.c.bf16 %v2110_v3, %v2109_v2  ;;  %v12312_v10 = vld [vmem:[%s14434_s3 + $0x48] sm:$0xff]   ;;  %v2114_v14 = vld [vmem:[#allocation2 + $0x97] sm:$0xff] }
 0x1ef   : > { %v1842_v18 = vmax.f32 %v1774_v11, %v1778_v12  ;;  %v1779_v19 = vmax.f32 %v1649_v13, 0.0  ;;  %v2169_v11 = vpack.c.bf16 %v2112_v6, %v2111_v5  ;;  %v13183_v12 = vld [vmem:[%s14434_s3 + $0x50] sm:$0xff]   ;;  %v2132_v41 = vld [vmem:[#allocation2 + $0x127] sm:$0xff]  ;;  %v2147_v2 = vld [vmem:[#allocation2 + $0x19f] sm:$0xff] }
 0x1f0   : > { %v1840_v21 = vmax.f32 %v1772_v15, %v1776_v16  ;;  %v1777_v22 = vmax.f32 %v1641_v0, 0.0  ;;  %v2113_v13 = vld [vmem:[#allocation2 + $0x8f] sm:$0xff]  ;;  %v2115_v15 = vld [vmem:[#allocation2 + $0x9f] sm:$0xff]  ;;  %v2116_v16 = vld [vmem:[#allocation2 + $0xa7] sm:$0xff] }
 0x1f1   : > { %1906 = vst.msk [vmem:[#allocation4 + $0x1f0] sm:$0xff] %vm331_vm3, %v1842_v18  ;;  %v1843_v23 = vmax.f32 %v1775_v17, %v1779_v19  ;;  %v2171_v0 = vpack.c.bf16 %v2116_v16, %v2115_v15  ;;  %v2117_v17 = vld [vmem:[#allocation2 + $0xaf] sm:$0xff]  ;;  %v2118_v18 = vld [vmem:[#allocation2 + $0xb7] sm:$0xff]  ;;  %v2119_v19 = vld [vmem:[#allocation2 + $0xbf] sm:$0xff] }
 0x1f2   : > { %1904 = vst.msk [vmem:[#allocation4 + $0x1e0] sm:$0xff] %vm331_vm3, %v1840_v21  ;;  %v1841_v24 = vmax.f32 %v1773_v20, %v1777_v22  ;;  %v2120_v20 = vld [vmem:[#allocation2 + $0xc7] sm:$0xff]  ;;  %v2172_v21 = vpack.c.bf16 %v2118_v18, %v2117_v17  ;;  %v2141_v58 = vld [vmem:[#allocation2 + $0x16f] sm:$0xff]  ;;  %v2142_v59 = vld [vmem:[#allocation2 + $0x177] sm:$0xff] }
 0x1f3   : > { %1907 = vst.msk [vmem:[#allocation4 + $0x1f8] sm:$0xff] %vm331_vm3, %v1843_v23  ;;  %v2173_v22 = vpack.c.bf16 %v2120_v20, %v2119_v19  ;;  %v2121_v23 = vld [vmem:[#allocation2 + $0xcf] sm:$0xff]  ;;  %v2144_v60 = vld [vmem:[#allocation2 + $0x187] sm:$0xff]  ;;  %v2184_v61 = vpack.c.bf16 %v2142_v59, %v2141_v58  ;;  %v4221_v59 = vld [vmem:[#allocation2 + $0x58] sm:$0xff] }
 0x1f4   : > { %1905 = vst.msk [vmem:[#allocation4 + $0x1e8] sm:$0xff] %vm331_vm3, %v1841_v24  ;;  %v2260_v7 = vld [vmem:[#allocation2 + $0x208] sm:$0xff]  ;;  %v2122_v24 = vld [vmem:[#allocation2 + $0xd7] sm:$0xff] }
 0x1f5   : > { %v3155_v31 = vld [vmem:[#allocation2 + $0x209] sm:$0xff]  ;;  %v2259_v32 = vld [vmem:[#allocation2 + $0x200] sm:$0xff] }
 0x1f6   : > { %v3153_v33 = vld [vmem:[#allocation2 + $0x1f9] sm:$0xff]  ;;  %v3154_v35 = vld [vmem:[#allocation2 + $0x201] sm:$0xff]  ;;  %v13149_v36 = vpack.c.bf16 %v2260_v7, %v2259_v32  ;;  %v2153_v16 = vld [vmem:[#allocation2 + $0x1cf] sm:$0xff] }
 0x1f7   : > { %v3187_v38 = vpack.c.bf16 %v3153_v33, %v3152_v27  ;;  %v3188_v39 = vpack.c.bf16 %v3155_v31, %v3154_v35  ;;  %v2174_v27 = vpack.c.bf16 %v2122_v24, %v2121_v23  ;;  %v2126_v7 = vld [vmem:[#allocation2 + $0xf7] sm:$0xff]  ;;  %v2127_v31 = vld [vmem:[#allocation2 + $0xff] sm:$0xff]  ;;  %v2128_v32 = vld [vmem:[#allocation2 + $0x107] sm:$0xff] }
 0x1f8   : > { %10788 = vmatprep.mubr.msk.bf16.mxu0 %vm331_vm3, %v13149_v36  ;;  %v2176_v33 = vpack.c.bf16 %v2126_v7, %v2125_v30  ;;  %v2177_v35 = vpack.c.bf16 %v2128_v32, %v2127_v31  ;;  %v2148_v3 = vld [vmem:[#allocation2 + $0x1a7] sm:$0xff]  ;;  %v2157_v20 = vld [vmem:[#allocation2 + $0x1ef] sm:$0xff]  ;;  %v2162_v30 = vld [vmem:[#allocation2 + $0x217] sm:$0xff] }
 0x1f9   : > { %10921 = vmatmul.mubr.msk.bf16.gmra.mrb[32].mxu1 %vm331_vm3, %v3187_v38  ;;  %10789 = vmatmul.mubr.msk.bf16.gmra.mrb[188].mxu0 %vm331_vm3, %v13147_v34  ;;  %v2129_v38 = vld [vmem:[#allocation2 + $0x10f] sm:$0xff]  ;;  %v2187_v6 = vpack.c.bf16 %v2148_v3, %v2147_v2  ;;  %v2156_v17 = vld [vmem:[#allocation2 + $0x1e7] sm:$0xff] }
 0x1fa   : > { %10924 = vmatprep.mubr.msk.bf16.mxu1 %vm331_vm3, %v3188_v39  ;;  %v1970_v42 = vld [vmem:[#allocation4 + $0x1f0] ss:$2 sm:$0xff]  ;;  %v2034_v43 = vld [vmem:[#allocation4 + $0x1f1] ss:$2 sm:$0xff]  ;;  %10796 = vmatprep.mubr.msk.bf16.mxu0 %vm331_vm3, %v2163_v40  ;;  %v2160_v23 = vld [vmem:[#allocation2 + $0x207] sm:$0xff] }
 0x1fb   : > { %v2066_v45 = vmax.f32 %v1970_v42, %v2034_v43  ;;  %v1968_v46 = vld [vmem:[#allocation4 + $0x1e0] ss:$2 sm:$0xff]  ;;  %v2032_v47 = vld [vmem:[#allocation4 + $0x1e1] ss:$2 sm:$0xff]  ;;  %v2130_v39 = vld [vmem:[#allocation2 + $0x117] sm:$0xff] }
 0x1fc   : > { %v2065_v48 = vmax.f32 %v1968_v46, %v2032_v47  ;;  %v2131_v40 = vld [vmem:[#allocation2 + $0x11f] sm:$0xff]  ;;  %v2178_v42 = vpack.c.bf16 %v2130_v39, %v2129_v38  ;;  %v2136_v47 = vld [vmem:[#allocation2 + $0x147] sm:$0xff]  ;;  %v3096_v32 = vld [vmem:[#allocation2 + $0x31] sm:$0xff] }
 0x1fd   : > { %2098 = vst.msk [vmem:[#allocation2 + $0x228] sm:$0xff] %vm331_vm3, %v2066_v45  ;;  %v2179_v43 = vpack.c.bf16 %v2132_v41, %v2131_v40  ;;  %v2134_v45 = vld [vmem:[#allocation2 + $0x137] sm:$0xff]  ;;  %v2135_v46 = vld [vmem:[#allocation2 + $0x13f] sm:$0xff]  ;;  %v3099_v40 = vld [vmem:[#allocation2 + $0x49] sm:$0xff] }
 0x1fe   : > { %2097 = vst.msk [vmem:[#allocation2 + $0x220] sm:$0xff] %vm331_vm3, %v2065_v48  ;;  %v2180_v48 = vpack.c.bf16 %v2134_v45, %v2133_v44  ;;  %v3094_v26 = vld [vmem:[#allocation2 + $0x21] sm:$0xff]  ;;  %v3719_v45 = vld [vmem:[#allocation2 + $0x237] sm:$0xff]  ;;  %v3107_v2 = vld [vmem:[#allocation2 + $0x89] sm:$0xff] }
 0x1ff   : > { %v3098_v39 = vld [vmem:[#allocation2 + $0x41] sm:$0xff]  ;;  %v4220_v58 = vld [vmem:[#allocation2 + $0x50] sm:$0xff] }
 0x201   : > { %10797 = vmatmul.mubr.msk.bf16.vlgmr.msra.gmra.mrb[128].mxu0 %vm331_vm3, %v2164_v49  ;;  %v2181_v49 = vpack.c.bf16 %v2136_v47, %v2135_v46  ;;  %v3100_v46 = vld [vmem:[#allocation2 + $0x51] sm:$0xff]  ;;  %v3101_v47 = vld [vmem:[#allocation2 + $0x59] sm:$0xff] }
 0x202   : > { %10800 = vmatprep.mubr.msk.bf16.mxu0 %vm331_vm3, %v2165_v53  ;;  %10861 = vmatpush3.bf16.msra.mxu0 %v12358_v55  ;;  %v2140_v55 = vld [vmem:[#allocation2 + $0x167] sm:$0xff] }
 0x203   : > { %10862 = vmatprep.subr.bf16.mxu0 %v12359_v57 }
 0x204   : > { %v3718_v44 = vld [vmem:[#allocation2 + $0x22f] sm:$0xff] }
 0x205   : > { %v3157_v8 = vld [vmem:[#allocation2 + $0x219] sm:$0xff]  ;;  %v3717_v38 = vld [vmem:[#allocation2 + $0x227] sm:$0xff] }
 0x206   : > { %v3189_v62 = vpack.c.bf16 %v3157_v8, %v3156_v56  ;;  %10863 = vmatpush3.bf16.msra.mxu0 %v12359_v57  ;;  %v2182_v56 = vpack.c.bf16 %v2138_v52, %v2137_v51  ;;  %v2143_v8 = vld [vmem:[#allocation2 + $0x17f] sm:$0xff]  ;;  %v3103_v52 = vld [vmem:[#allocation2 + $0x69] sm:$0xff] }
 0x207   : > { %v3102_v51 = vld [vmem:[#allocation2 + $0x61] sm:$0xff] }
 0x208   : > { %10925 = vmatmul.mubr.msk.bf16.gmra.mrb[36].mxu1 %vm331_vm3, %v3189_v62  ;;  %v2185_v62 = vpack.c.bf16 %v2144_v60, %v2143_v8  ;;  %v4283_v8 = vpack.c.bf16 %v4221_v59, %v4220_v58  ;;  %v3104_v60 = vld [vmem:[#allocation2 + $0x71] sm:$0xff] }
 0x209   : > { %10801 = vmatmul.mubr.msk.bf16.gmra.mrb[132].mxu0 %vm331_vm3, %v2166_v63  ;;  %10932 = vmatprep.mubr.msk.bf16.mxu1 %vm331_vm3, %v2165_v53  ;;  %v2139_v53 = vld [vmem:[#allocation2 + $0x15f] sm:$0xff]  ;;  %v4240_v58 = vld [vmem:[#allocation2 + $0xf0] sm:$0xff] }
 0x20a   : > { %10804 = vmatprep.mubr.msk.bf16.mxu0 %vm331_vm3, %v2167_v1  ;;  %v2183_v57 = vpack.c.bf16 %v2140_v55, %v2139_v53  ;;  %v13248_v53 = vpack.c.bf16 %v3719_v45, %v3718_v44  ;;  %v13250_v55 = vpack.c.bf16 %v3101_v47, %v3100_v46  ;;  %v4235_v44 = vld [vmem:[#allocation2 + $0xc8] sm:$0xff]  ;;  %v4236_v47 = vld [vmem:[#allocation2 + $0xd0] sm:$0xff]  ;;  %v4241_v59 = vld [vmem:[#allocation2 + $0xf8] sm:$0xff] }
 0x210   : > { %10933 = vmatmul.mubr.msk.bf16.vlgmr.msra.gmra.mrb[40].mxu1 %vm331_vm3, %v2166_v63  ;;  %v2145_v63 = vld [vmem:[#allocation2 + $0x18f] sm:$0xff] }
 0x211   : > { %10997 = vmatpush3.bf16.msra.mxu1 %v13010_v28  ;;  %10805 = vmatmul.mubr.msk.bf16.gmra.mrb[136].mxu0 %vm331_vm3, %v2168_v9  ;;  %v2170_v28 = vpack.c.bf16 %v2114_v14, %v2113_v13  ;;  %v2152_v13 = vld [vmem:[#allocation2 + $0x1c7] sm:$0xff] }
 0x212   : > { %10936 = vmatprep.mubr.msk.bf16.mxu1 %vm331_vm3, %v2167_v1  ;;  %10808 = vmatprep.mubr.msk.bf16.mxu0 %vm331_vm3, %v2169_v11  ;;  %v2146_v1 = vld [vmem:[#allocation2 + $0x197] sm:$0xff] }
 0x213   : > { %10998 = vmatprep.subr.bf16.mxu1 %v12312_v10  ;;  %v2186_v5 = vpack.c.bf16 %v2146_v1, %v2145_v63  ;;  %v4223_v63 = vld [vmem:[#allocation2 + $0x68] sm:$0xff] }
 0x214   : > { %v3106_v1 = vld [vmem:[#allocation2 + $0x81] sm:$0xff] }
 0x215   : > { %10999 = vmatpush3.bf16.msra.mxu1 %v12312_v10  ;;  %v2150_v10 = vld [vmem:[#allocation2 + $0x1b7] sm:$0xff] }
 0x216   : > { %11064 = vmatprep.subr.bf16.mxu1 %v13183_v12 }
 0x218   : > { %10937 = vmatmul.mubr.msk.bf16.gmra.mrb[44].mxu1 %vm331_vm3, %v2168_v9  ;;  %v2149_v9 = vld [vmem:[#allocation2 + $0x1af] sm:$0xff] }
 0x219   : > { %10809 = vmatmul.mubr.msk.bf16.gmra.mrb[140].mxu0 %vm331_vm3, %v2170_v28  ;;  %10940 = vmatprep.mubr.msk.bf16.mxu1 %vm331_vm3, %v2169_v11  ;;  %v2151_v11 = vld [vmem:[#allocation2 + $0x1bf] sm:$0xff]  ;;  %v2188_v14 = vpack.c.bf16 %v2150_v10, %v2149_v9  ;;  %v13269_v9 = vpack.c.bf16 %v3107_v2, %v3106_v1  ;;  %v4224_v10 = vld [vmem:[#allocation2 + $0x70] sm:$0xff] }
 0x21a   : > { %10812 = vmatprep.mubr.msk.bf16.mxu0 %vm331_vm3, %v2171_v0  ;;  %v2189_v15 = vpack.c.bf16 %v2152_v13, %v2151_v11  ;;  %v4225_v11 = vld [vmem:[#allocation2 + $0x78] sm:$0xff]  ;;  %v13281_v13 = vld [vmem:[%s14434_s3 + $0x60] sm:$0xff]  }
 0x21b   : > { %v4245_v1 = vld [vmem:[#allocation2 + $0x118] sm:$0xff] }
 0x220   : > { %10941 = vmatmul.mubr.msk.bf16.gmra.mrb[48].mxu1 %vm331_vm3, %v2170_v28  ;;  %v2154_v28 = vld [vmem:[#allocation2 + $0x1d7] sm:$0xff] }
 0x221   : > { %10813 = vmatmul.mubr.msk.bf16.gmra.mrb[144].mxu0 %vm331_vm3, %v2172_v21  ;;  %10944 = vmatprep.mubr.msk.bf16.mxu1 %vm331_vm3, %v2171_v0  ;;  %v2155_v0 = vld [vmem:[#allocation2 + $0x1df] sm:$0xff]  ;;  %v2190_v18 = vpack.c.bf16 %v2154_v28, %v2153_v16  ;;  %v4227_v28 = vld [vmem:[#allocation2 + $0x88] sm:$0xff] }
 0x222   : > { %10816 = vmatprep.mubr.msk.bf16.mxu0 %vm331_vm3, %v2173_v22  ;;  %v2191_v19 = vpack.c.bf16 %v2156_v17, %v2155_v0  ;;  %v4226_v16 = vld [vmem:[#allocation2 + $0x80] sm:$0xff]  ;;  %v3111_v17 = vld [vmem:[#allocation2 + $0xa9] sm:$0xff] }
 0x223   : > { %v3110_v0 = vld [vmem:[#allocation2 + $0xa1] sm:$0xff] }
 0x228   : > { %10945 = vmatmul.mubr.msk.bf16.gmra.mrb[52].mxu1 %vm331_vm3, %v2172_v21  ;;  %v2158_v21 = vld [vmem:[#allocation2 + $0x1f7] sm:$0xff] }
 0x229   : > { %10817 = vmatmul.mubr.msk.bf16.gmra.mrb[148].mxu0 %vm331_vm3, %v2174_v27  ;;  %10948 = vmatprep.mubr.msk.bf16.mxu1 %vm331_vm3, %v2173_v22  ;;  %v2159_v22 = vld [vmem:[#allocation2 + $0x1ff] sm:$0xff]  ;;  %v2192_v24 = vpack.c.bf16 %v2158_v21, %v2157_v20  ;;  %v13292_v20 = vpack.c.bf16 %v3111_v17, %v3110_v0  ;;  %v4228_v21 = vld [vmem:[#allocation2 + $0x90] sm:$0xff]  ;;  %v4251_v0 = vld [vmem:[#allocation2 + $0x148] sm:$0xff] }
 0x22a   : > { %10820 = vmatprep.mubr.msk.bf16.mxu0 %vm331_vm3, %v2175_v29  ;;  %v2193_v25 = vpack.c.bf16 %v2160_v23, %v2159_v22  ;;  %v4229_v22 = vld [vmem:[#allocation2 + $0x98] sm:$0xff] }
 0x22b   : > { %v3112_v23 = vld [vmem:[#allocation2 + $0xb1] sm:$0xff] }
 0x230   : > { %10949 = vmatmul.mubr.msk.bf16.gmra.mrb[56].mxu1 %vm331_vm3, %v2174_v27  ;;  %v3095_v27 = vld [vmem:[#allocation2 + $0x29] sm:$0xff] }
 0x231   : > { %10821 = vmatmul.mubr.msk.bf16.gmra.mrb[152].mxu0 %vm331_vm3, %v2176_v33  ;;  %10952 = vmatprep.mubr.msk.bf16.mxu1 %vm331_vm3, %v2175_v29  ;;  %v2161_v29 = vld [vmem:[#allocation2 + $0x20f] sm:$0xff]  ;;  %v3158_v7 = vpack.c.bf16 %v3095_v27, %v3094_v26  ;;  %v4230_v26 = vld [vmem:[#allocation2 + $0xa0] sm:$0xff] }
 0x232   : > { %10824 = vmatprep.mubr.msk.bf16.mxu0 %vm331_vm3, %v2177_v35  ;;  %v2194_v31 = vpack.c.bf16 %v2162_v30, %v2161_v29  ;;  %v4231_v27 = vld [vmem:[#allocation2 + $0xa8] sm:$0xff] }
 0x233   : > { %v3114_v29 = vld [vmem:[#allocation2 + $0xc1] sm:$0xff]  ;;  %v3115_v30 = vld [vmem:[#allocation2 + $0xc9] sm:$0xff] }
 0x238   : > { %10953 = vmatmul.mubr.msk.bf16.gmra.mrb[60].mxu1 %vm331_vm3, %v2176_v33  ;;  %v3097_v33 = vld [vmem:[#allocation2 + $0x39] sm:$0xff] }
 0x239   : > { %10825 = vmatmul.mubr.msk.bf16.gmra.mrb[156].mxu0 %vm331_vm3, %v2178_v42  ;;  %10956 = vmatprep.mubr.msk.bf16.mxu1 %vm331_vm3, %v2177_v35  ;;  %v3716_v35 = vld [vmem:[#allocation2 + $0x21f] sm:$0xff]  ;;  %v3159_v41 = vpack.c.bf16 %v3097_v33, %v3096_v32  ;;  %v13308_v32 = vpack.c.bf16 %v3115_v30, %v3114_v29  ;;  %v4232_v33 = vld [vmem:[#allocation2 + $0xb0] sm:$0xff] }
 0x23a   : > { %10828 = vmatprep.mubr.msk.bf16.mxu0 %vm331_vm3, %v2179_v43  ;;  %v4256_v29 = vld [vmem:[#allocation2 + $0x170] sm:$0xff]  ;;  %v4257_v30 = vld [vmem:[#allocation2 + $0x178] sm:$0xff] }
 0x240   : > { %10957 = vmatmul.mubr.msk.bf16.gmra.mrb[0].mxu1 %vm331_vm3, %v2178_v42  ;;  %v13238_v42 = vpack.c.bf16 %v3717_v38, %v3716_v35  ;;  %v4233_v35 = vld [vmem:[#allocation2 + $0xb8] sm:$0xff] }
 0x241   : > { %10829 = vmatmul.mubr.msk.bf16.gmra.mrb[160].mxu0 %vm331_vm3, %v2180_v48  ;;  %10960 = vmatprep.mubr.msk.bf16.mxu1 %vm331_vm3, %v2179_v43  ;;  %v13241_v43 = vpack.c.bf16 %v3099_v40, %v3098_v39  ;;  %v3116_v38 = vld [vmem:[#allocation2 + $0xd1] sm:$0xff]  ;;  %v13316_v39 = vpack.c.bf16 %v4233_v35, %v4232_v33  ;;  %v3117_v40 = vld [vmem:[#allocation2 + $0xd9] sm:$0xff]  ;;  %v13368_v33 = vpack.c.bf16 %v4257_v30, %v4256_v29 }
 0x242   : > { %10832 = vmatprep.mubr.msk.bf16.mxu0 %vm331_vm3, %v2181_v49  ;;  %v13318_v45 = vpack.c.bf16 %v3117_v40, %v3116_v38  ;;  %v4258_v35 = vld [vmem:[#allocation2 + $0x180] sm:$0xff]  ;;  %v4259_v38 = vld [vmem:[#allocation2 + $0x188] sm:$0xff] }
 0x243   : > { %v13370_v40 = vpack.c.bf16 %v4259_v38, %v4258_v35 }
 0x248   : > { %10961 = vmatmul.mubr.msk.bf16.gmra.mrb[4].mxu1 %vm331_vm3, %v2180_v48  ;;  %v4218_v48 = vld [vmem:[#allocation2 + $0x40] sm:$0xff] }
 0x249   : > { %10833 = vmatmul.mubr.msk.bf16.gmra.mrb[164].mxu0 %vm331_vm3, %v2182_v56  ;;  %10964 = vmatprep.mubr.msk.bf16.mxu1 %vm331_vm3, %v2181_v49  ;;  %v4219_v49 = vld [vmem:[#allocation2 + $0x48] sm:$0xff] }
 0x24a   : > { %10836 = vmatprep.mubr.msk.bf16.mxu0 %vm331_vm3, %v2183_v57 }
 0x250   : > { %10965 = vmatmul.mubr.msk.bf16.gmra.mrb[8].mxu1 %vm331_vm3, %v2182_v56  ;;  %v4282_v56 = vpack.c.bf16 %v4219_v49, %v4218_v48  ;;  %v4237_v48 = vld [vmem:[#allocation2 + $0xd8] sm:$0xff] }
 0x251   : > { %10837 = vmatmul.mubr.msk.bf16.gmra.mrb[168].mxu0 %vm331_vm3, %v2184_v61  ;;  %10968 = vmatprep.mubr.msk.bf16.mxu1 %vm331_vm3, %v2183_v57  ;;  %v13254_v57 = vpack.c.bf16 %v3103_v52, %v3102_v51  ;;  %v13328_v49 = vpack.c.bf16 %v4237_v48, %v4236_v47  ;;  %v4238_v51 = vld [vmem:[#allocation2 + $0xe0] sm:$0xff]  ;;  %v4239_v52 = vld [vmem:[#allocation2 + $0xe8] sm:$0xff] }
 0x252   : > { %10840 = vmatprep.mubr.msk.bf16.mxu0 %vm331_vm3, %v2185_v62  ;;  %v4262_v48 = vld [vmem:[#allocation2 + $0x1a0] sm:$0xff] }
 0x258   : > { %10969 = vmatmul.mubr.msk.bf16.gmra.mrb[12].mxu1 %vm331_vm3, %v2184_v61  ;;  %v3105_v61 = vld [vmem:[#allocation2 + $0x79] sm:$0xff] }
 0x259   : > { %10841 = vmatmul.mubr.msk.bf16.gmra.mrb[172].mxu0 %vm331_vm3, %v2186_v5  ;;  %10972 = vmatprep.mubr.msk.bf16.mxu1 %vm331_vm3, %v2185_v62  ;;  %v4222_v62 = vld [vmem:[#allocation2 + $0x60] sm:$0xff]  ;;  %v13261_v3 = vpack.c.bf16 %v3105_v61, %v3104_v60  ;;  %v4243_v61 = vld [vmem:[#allocation2 + $0x108] sm:$0xff] }
 0x25a   : > { %10844 = vmatprep.mubr.msk.bf16.mxu0 %vm331_vm3, %v2187_v6  ;;  %v4242_v60 = vld [vmem:[#allocation2 + $0x100] sm:$0xff] }
 0x260   : > { %10973 = vmatmul.mubr.msk.bf16.gmra.mrb[16].mxu1 %vm331_vm3, %v2186_v5  ;;  %v12314_v5 = vld [vmem:[%s14434_s3 + $0x58] sm:$0xff]  }
 0x261   : > { %10845 = vmatmul.mubr.msk.bf16.gmra.mrb[176].mxu0 %vm331_vm3, %v2188_v14  ;;  %10976 = vmatprep.mubr.msk.bf16.mxu1 %vm331_vm3, %v2187_v6  ;;  %v13267_v6 = vpack.c.bf16 %v4223_v63, %v4222_v62  ;;  %v13338_v62 = vpack.c.bf16 %v4243_v61, %v4242_v60  ;;  %v4244_v63 = vld [vmem:[#allocation2 + $0x110] sm:$0xff]  ;;  %v4266_v61 = vld [vmem:[#allocation2 + $0x1c0] sm:$0xff] }
 0x262   : > { %10848 = vmatprep.mubr.msk.bf16.mxu0 %vm331_vm3, %v2189_v15  ;;  %v13344_v2 = vpack.c.bf16 %v4245_v1, %v4244_v63  ;;  %v4267_v63 = vld [vmem:[#allocation2 + $0x1c8] sm:$0xff] }
 0x263   : > { %v13386_v1 = vpack.c.bf16 %v4267_v63, %v4266_v61 }
 0x268   : > { %10977 = vmatmul.mubr.msk.bf16.gmra.mrb[20].mxu1 %vm331_vm3, %v2188_v14  ;;  %v3108_v14 = vld [vmem:[#allocation2 + $0x91] sm:$0xff] }
 0x269   : > { %10849 = vmatmul.mubr.msk.bf16.gmra.mrb[180].mxu0 %vm331_vm3, %v2190_v18  ;;  %10980 = vmatprep.mubr.msk.bf16.mxu1 %vm331_vm3, %v2189_v15  ;;  %v13283_v15 = vpack.c.bf16 %v4225_v11, %v4224_v10  ;;  %v4247_v10 = vld [vmem:[#allocation2 + $0x128] sm:$0xff] }
 0x26a   : > { %10852 = vmatprep.mubr.msk.bf16.mxu0 %vm331_vm3, %v2191_v19 }
 0x270   : > { %10981 = vmatmul.mubr.msk.bf16.gmra.mrb[24].mxu1 %vm331_vm3, %v2190_v18 }
 0x271   : > { %10853 = vmatmul.mubr.msk.bf16.gmra.mrb[184].mxu0 %vm331_vm3, %v2192_v24  ;;  %10984 = vmatprep.mubr.msk.bf16.mxu1 %vm331_vm3, %v2191_v19  ;;  %v13288_v19 = vpack.c.bf16 %v4227_v28, %v4226_v16  ;;  %v4250_v28 = vld [vmem:[#allocation2 + $0x140] sm:$0xff] }
 0x272   : > { %10856 = vmatprep.mubr.msk.bf16.mxu0 %vm331_vm3, %v2193_v25  ;;  %v13354_v17 = vpack.c.bf16 %v4251_v0, %v4250_v28 }
 0x278   : > { %10985 = vmatmul.mubr.msk.bf16.gmra.mrb[28].mxu1 %vm331_vm3, %v2192_v24  ;;  %v13300_v24 = vpack.c.bf16 %v4229_v22, %v4228_v21  ;;  %v4252_v21 = vld [vmem:[#allocation2 + $0x150] sm:$0xff]  ;;  %v4253_v22 = vld [vmem:[#allocation2 + $0x158] sm:$0xff] }
 0x279   : > { %10857 = vmatmul.mubr.msk.bf16.gmra.mrb[188].mxu0 %vm331_vm3, %v2194_v31  ;;  %10988 = vmatprep.mubr.msk.bf16.mxu1 %vm331_vm3, %v2193_v25  ;;  %v3113_v25 = vld [vmem:[#allocation2 + $0xb9] sm:$0xff] }
 0x27a   : > { %10864 = vmatprep.mubr.msk.bf16.mxu0 %vm331_vm3, %v3158_v7  ;;  %v13302_v7 = vpack.c.bf16 %v3113_v25, %v3112_v23  ;;  %v13360_v23 = vpack.c.bf16 %v4253_v22, %v4252_v21  ;;  %v4254_v25 = vld [vmem:[#allocation2 + $0x160] sm:$0xff] }
 0x280   : > { %10989 = vmatmul.mubr.msk.bf16.gmra.mrb[32].mxu1 %vm331_vm3, %v2194_v31  ;;  %v13304_v31 = vpack.c.bf16 %v4231_v27, %v4230_v26  ;;  %v4255_v26 = vld [vmem:[#allocation2 + $0x168] sm:$0xff] }
 0x281   : > { %10865 = vmatmul.mubr.msk.bf16.vlgmr.msra.gmra.mrb[128].mxu0 %vm331_vm3, %v3159_v41  ;;  %10992 = vmatprep.mubr.msk.bf16.mxu1 %vm331_vm3, %v13238_v42  ;;  %v4234_v41 = vld [vmem:[#allocation2 + $0xc0] sm:$0xff]  ;;  %v13362_v27 = vpack.c.bf16 %v4255_v26, %v4254_v25  ;;  %v12316_v25 = vld [vmem:[%s14434_s3 + $0x68] sm:$0xff]  }
 0x282   : > { %10868 = vmatprep.mubr.msk.bf16.mxu0 %vm331_vm3, %v13241_v43  ;;  %v13320_v46 = vpack.c.bf16 %v4235_v44, %v4234_v41  ;;  %v4260_v41 = vld [vmem:[#allocation2 + $0x190] sm:$0xff]  ;;  %v4261_v44 = vld [vmem:[#allocation2 + $0x198] sm:$0xff] }
 0x283   : > { %v13376_v47 = vpack.c.bf16 %v4261_v44, %v4260_v41 }
 0x288   : > { %10993 = vmatmul.mubr.msk.bf16.gmra.mrb[36].mxu1 %vm331_vm3, %v13248_v53 }
 0x289   : > { %10869 = vmatmul.mubr.msk.bf16.gmra.mrb[132].mxu0 %vm331_vm3, %v13250_v55  ;;  %11000 = vmatprep.mubr.msk.bf16.mxu1 %vm331_vm3, %v4282_v56  ;;  %v13330_v56 = vpack.c.bf16 %v4239_v52, %v4238_v51  ;;  %v4263_v51 = vld [vmem:[#allocation2 + $0x1a8] sm:$0xff] }
 0x28a   : > { %10872 = vmatprep.mubr.msk.bf16.mxu0 %vm331_vm3, %v13254_v57  ;;  %v13378_v52 = vpack.c.bf16 %v4263_v51, %v4262_v48 }
 0x290   : > { %11001 = vmatmul.mubr.msk.bf16.vlgmr.msra.gmra.mrb[40].mxu1 %vm331_vm3, %v4283_v8  ;;  %v13336_v8 = vpack.c.bf16 %v4241_v59, %v4240_v58  ;;  %v4264_v58 = vld [vmem:[#allocation2 + $0x1b0] sm:$0xff]  ;;  %v4265_v59 = vld [vmem:[#allocation2 + $0x1b8] sm:$0xff] }
 0x291   : > { %11065 = vmatpush3.bf16.msra.mxu1 %v13183_v12  ;;  %10873 = vmatmul.mubr.msk.bf16.gmra.mrb[136].mxu0 %vm331_vm3, %v13261_v3  ;;  %v3109_v12 = vld [vmem:[#allocation2 + $0x99] sm:$0xff]  ;;  %v13384_v60 = vpack.c.bf16 %v4265_v59, %v4264_v58  ;;  %v4800_v58 = vld [vmem:[#allocation2 + $0xe1] sm:$0xff]  ;;  %v4801_v59 = vld [vmem:[#allocation2 + $0xe9] sm:$0xff] }
 0x292   : > { %11004 = vmatprep.mubr.msk.bf16.mxu1 %vm331_vm3, %v13267_v6  ;;  %10876 = vmatprep.mubr.msk.bf16.mxu0 %vm331_vm3, %v13269_v9  ;;  %v13286_v18 = vpack.c.bf16 %v3109_v12, %v3108_v14  ;;  %v4248_v14 = vld [vmem:[#allocation2 + $0x130] sm:$0xff]  ;;  %v4249_v12 = vld [vmem:[#allocation2 + $0x138] sm:$0xff] }
 0x293   : > { %11066 = vmatprep.subr.bf16.mxu1 %v12314_v5  ;;  %v13352_v16 = vpack.c.bf16 %v4249_v12, %v4248_v14  ;;  %v4281_v12 = vld [vmem:[#allocation2 + $0x238] sm:$0xff] }
 0x295   : > { %11067 = vmatpush3.bf16.msra.mxu1 %v12314_v5  ;;  %v4246_v5 = vld [vmem:[#allocation2 + $0x120] sm:$0xff] }
 0x296   : > { %11132 = vmatprep.subr.bf16.mxu1 %v13281_v13  ;;  %v13346_v11 = vpack.c.bf16 %v4247_v10, %v4246_v5  ;;  %v4278_v5 = vld [vmem:[#allocation2 + $0x220] sm:$0xff]  ;;  %v4279_v10 = vld [vmem:[#allocation2 + $0x228] sm:$0xff] }
 0x297   : > { %v13400_v14 = vpack.c.bf16 %v4279_v10, %v4278_v5  ;;  %v4803_v5 = vld [vmem:[#allocation2 + $0xf9] sm:$0xff] }
 0x298   : > { %11005 = vmatmul.mubr.msk.bf16.gmra.mrb[44].mxu1 %vm331_vm3, %v13283_v15 }
 0x299   : > { %10877 = vmatmul.mubr.msk.bf16.gmra.mrb[140].mxu0 %vm331_vm3, %v13286_v18  ;;  %11008 = vmatprep.mubr.msk.bf16.mxu1 %vm331_vm3, %v13288_v19 }
 0x29a   : > { %10880 = vmatprep.mubr.msk.bf16.mxu0 %vm331_vm3, %v13292_v20 }
 0x2a0   : > { %11009 = vmatmul.mubr.msk.bf16.gmra.mrb[48].mxu1 %vm331_vm3, %v13300_v24 }
 0x2a1   : > { %10881 = vmatmul.mubr.msk.bf16.gmra.mrb[144].mxu0 %vm331_vm3, %v13302_v7  ;;  %11012 = vmatprep.mubr.msk.bf16.mxu1 %vm331_vm3, %v13304_v31 }
 0x2a2   : > { %10884 = vmatprep.mubr.msk.bf16.mxu0 %vm331_vm3, %v13308_v32 }
 0x2a8   : > { %11013 = vmatmul.mubr.msk.bf16.gmra.mrb[52].mxu1 %vm331_vm3, %v13316_v39 }
 0x2a9   : > { %10885 = vmatmul.mubr.msk.bf16.gmra.mrb[148].mxu0 %vm331_vm3, %v13318_v45  ;;  %11016 = vmatprep.mubr.msk.bf16.mxu1 %vm331_vm3, %v13320_v46 }
 0x2b0   : > { %11017 = vmatmul.mubr.msk.bf16.gmra.mrb[56].mxu1 %vm331_vm3, %v13328_v49 }
 0x2b1   : > { %11020 = vmatprep.mubr.msk.bf16.mxu1 %vm331_vm3, %v13330_v56 }
 0x2b8   : > { %11021 = vmatmul.mubr.msk.bf16.gmra.mrb[60].mxu1 %vm331_vm3, %v13336_v8 }
 0x2b9   : > { %11024 = vmatprep.mubr.msk.bf16.mxu1 %vm331_vm3, %v13338_v62 }
 0x2c0   : > { %11025 = vmatmul.mubr.msk.bf16.gmra.mrb[0].mxu1 %vm331_vm3, %v13344_v2 }
 0x2c1   : > { %11028 = vmatprep.mubr.msk.bf16.mxu1 %vm331_vm3, %v13346_v11 }
 0x2c8   : > { %11029 = vmatmul.mubr.msk.bf16.gmra.mrb[4].mxu1 %vm331_vm3, %v13352_v16 }
 0x2c9   : > { %11032 = vmatprep.mubr.msk.bf16.mxu1 %vm331_vm3, %v13354_v17 }
 0x2d0   : > { %11033 = vmatmul.mubr.msk.bf16.gmra.mrb[8].mxu1 %vm331_vm3, %v13360_v23 }
 0x2d1   : > { %11036 = vmatprep.mubr.msk.bf16.mxu1 %vm331_vm3, %v13362_v27 }
 0x2d8   : > { %11037 = vmatmul.mubr.msk.bf16.gmra.mrb[12].mxu1 %vm331_vm3, %v13368_v33 }
 0x2d9   : > { %11040 = vmatprep.mubr.msk.bf16.mxu1 %vm331_vm3, %v13370_v40 }
 0x2e0   : > { %11041 = vmatmul.mubr.msk.bf16.gmra.mrb[16].mxu1 %vm331_vm3, %v13376_v47 }
 0x2e1   : > { %11044 = vmatprep.mubr.msk.bf16.mxu1 %vm331_vm3, %v13378_v52 }
 0x2e8   : > { %11045 = vmatmul.mubr.msk.bf16.gmra.mrb[20].mxu1 %vm331_vm3, %v13384_v60 }
 0x2e9   : > { %11048 = vmatprep.mubr.msk.bf16.mxu1 %vm331_vm3, %v13386_v1 }
 0x2f0   : > { %11049 = vmatmul.mubr.msk.bf16.gmra.mrb[24].mxu1 %vm331_vm3, %v13102_v4  ;;  %v4280_v4 = vld [vmem:[#allocation2 + $0x230] sm:$0xff] }
 0x2f1   : > { %11052 = vmatprep.mubr.msk.bf16.mxu1 %vm331_vm3, %v13125_v50  ;;  %v13406_v50 = vpack.c.bf16 %v4281_v12, %v4280_v4  ;;  %v4805_v4 = vld [vmem:[#allocation2 + $0x109] sm:$0xff] }
 0x2f8   : > { %11053 = vmatmul.mubr.msk.bf16.gmra.mrb[28].mxu1 %vm331_vm3, %v13123_v54 }
 0x2f9   : > { %11056 = vmatprep.mubr.msk.bf16.mxu1 %vm331_vm3, %v13149_v36 }
 0x300   : > { %11057 = vmatmul.mubr.msk.bf16.gmra.mrb[32].mxu1 %vm331_vm3, %v13147_v34 }
 0x301   : > { %11060 = vmatprep.mubr.msk.bf16.mxu1 %vm331_vm3, %v13400_v14 }
 0x304   : > { %v10822_v28 = vpop.f32.mrb[152].mxu0 }
 0x305   : > { %v13408_v0 = vpop.f32.mrb[153].mxu0 }
 0x306   : > { %14447 = vst [vmem:[#allocation10_spill] sm:$0xff] %v13408_v0  ;;  %v10823_v54 = vpop.f32.mrb[154].mxu0 }
 0x307   : > { %v13410_v21 = vpop.f32.mrb[155].mxu0 }
 0x308   : > { %14448 = vst [vmem:[#allocation11_spill] sm:$0xff] %v13410_v21  ;;  %11061 = vmatmul.mubr.msk.bf16.gmra.mrb[36].mxu1 %vm331_vm3, %v13406_v50  ;;  %v4837_v21 = vld [vmem:[#allocation2 + $0x209] sm:$0xff] }
 0x309   : > { %11068 = vmatprep.mubr.msk.bf16.mxu1 %vm331_vm3, %v13241_v43  ;;  %v13431_v43 = vld [vmem:[%s14434_s3 + $0x70] sm:$0xff]  }
 0x30c   : > { %v10826_v34 = vpop.f32.mrb[156].mxu0 }
 0x30d   : > { %v13416_v36 = vpop.f32.mrb[157].mxu0 }
 0x30e   : > { %14449 = vst [vmem:[#allocation12_spill] sm:$0xff] %v13416_v36  ;;  %v10827_v22 = vpop.f32.mrb[158].mxu0  ;;  %v4836_v36 = vld [vmem:[#allocation2 + $0x201] sm:$0xff] }
 0x30f   : > { %v13421_v26 = vpop.f32.mrb[159].mxu0 }
 0x310   : > { %14450 = vst [vmem:[#allocation13_spill] sm:$0xff] %v13421_v26  ;;  %11069 = vmatmul.mubr.msk.bf16.vlgmr.msra.gmra.mrb[40].mxu1 %vm331_vm3, %v13250_v55  ;;  %v4835_v26 = vld [vmem:[#allocation2 + $0x1f9] sm:$0xff] }
 0x311   : > { %11133 = vmatpush3.bf16.msra.mxu1 %v13281_v13  ;;  %11072 = vmatprep.mubr.msk.bf16.mxu1 %vm331_vm3, %v13254_v57 }
 0x312   : > { %11134 = vmatprep.subr.bf16.mxu1 %v12316_v25 }
 0x314   : > { %v10830_v29 = vpop.f32.mrb[160].mxu0 }
 0x315   : > { %v13433_v30 = vpop.f32.mrb[161].mxu0  ;;  %11135 = vmatpush3.bf16.msra.mxu1 %v12316_v25  ;;  %v4807_v25 = vld [vmem:[#allocation2 + $0x119] sm:$0xff] }
 0x316   : > { %14451 = vst [vmem:[#allocation14_spill] sm:$0xff] %v13433_v30  ;;  %v10831_v35 = vpop.f32.mrb[162].mxu0  ;;  %11200 = vmatprep.subr.bf16.mxu1 %v13431_v43 }
 0x317   : > { %v13436_v38 = vpop.f32.mrb[163].mxu0  ;;  %v4808_v35 = vld [vmem:[#allocation2 + $0x121] sm:$0xff] }
 0x318   : > { %14452 = vst [vmem:[#allocation15_spill] sm:$0xff] %v13436_v38  ;;  %11073 = vmatmul.mubr.msk.bf16.gmra.mrb[44].mxu1 %vm331_vm3, %v13261_v3  ;;  %v4833_v38 = vld [vmem:[#allocation2 + $0x1e9] sm:$0xff] }
 0x319   : > { %11076 = vmatprep.mubr.msk.bf16.mxu1 %vm331_vm3, %v13269_v9 }
 0x31c   : > { %v10834_v55 = vpop.f32.mrb[164].mxu0 }
 0x31d   : > { %v13442_v57 = vpop.f32.mrb[165].mxu0  ;;  %v4809_v55 = vld [vmem:[#allocation2 + $0x129] sm:$0xff] }
 0x31e   : > { %14453 = vst [vmem:[#allocation16_spill] sm:$0xff] %v13442_v57  ;;  %v10835_v13 = vpop.f32.mrb[166].mxu0  ;;  %v4832_v57 = vld [vmem:[#allocation2 + $0x1e1] sm:$0xff] }
 0x31f   : > { %v13444_v41 = vpop.f32.mrb[167].mxu0 }
 0x320   : > { %14454 = vst [vmem:[#allocation17_spill] sm:$0xff] %v13444_v41  ;;  %11077 = vmatmul.mubr.msk.bf16.gmra.mrb[48].mxu1 %vm331_vm3, %v13286_v18  ;;  %v4831_v41 = vld [vmem:[#allocation2 + $0x1d9] sm:$0xff] }
 0x321   : > { %11080 = vmatprep.mubr.msk.bf16.mxu1 %vm331_vm3, %v13292_v20  ;;  %v13462_v20 = vpack.c.bf16 %v4801_v59, %v4800_v58  ;;  %v13486_v58 = vpack.c.bf16 %v4809_v55, %v4808_v35  ;;  %v4810_v59 = vld [vmem:[#allocation2 + $0x131] sm:$0xff]  ;;  %v4815_v35 = vld [vmem:[#allocation2 + $0x159] sm:$0xff] }
 0x324   : > { %v10838_v44 = vpop.f32.mrb[168].mxu0 }
 0x325   : > { %v13450_v48 = vpop.f32.mrb[169].mxu0 }
 0x326   : > { %14455 = vst [vmem:[#allocation18_spill] sm:$0xff] %v13450_v48  ;;  %v10839_v51 = vpop.f32.mrb[170].mxu0 }
 0x327   : > { %v13452_v3 = vpop.f32.mrb[171].mxu0 }
 0x328   : > { %14456 = vst [vmem:[#allocation19_spill] sm:$0xff] %v13452_v3  ;;  %11081 = vmatmul.mubr.msk.bf16.gmra.mrb[52].mxu1 %vm331_vm3, %v13302_v7  ;;  %v4802_v7 = vld [vmem:[#allocation2 + $0xf1] sm:$0xff]  ;;  %v4829_v3 = vld [vmem:[#allocation2 + $0x1c9] sm:$0xff] }
 0x329   : > { %11084 = vmatprep.mubr.msk.bf16.mxu1 %vm331_vm3, %v13308_v32  ;;  %v4804_v32 = vld [vmem:[#allocation2 + $0x101] sm:$0xff]  ;;  %v13470_v54 = vpack.c.bf16 %v4803_v5, %v4802_v7 }
 0x32a   : > { %v13474_v22 = vpack.c.bf16 %v4805_v4, %v4804_v32  ;;  %v4812_v5 = vld [vmem:[#allocation2 + $0x141] sm:$0xff] }
 0x32c   : > { %v10842_v9 = vpop.f32.mrb[172].mxu0 }
 0x32d   : > { %v13458_v61 = vpop.f32.mrb[173].mxu0 }
 0x32e   : > { %14457 = vst [vmem:[#allocation20_spill] sm:$0xff] %v13458_v61  ;;  %v10843_v18 = vpop.f32.mrb[174].mxu0  ;;  %v4828_v61 = vld [vmem:[#allocation2 + $0x1c1] sm:$0xff] }
 0x32f   : > { %v13460_v63 = vpop.f32.mrb[175].mxu0  ;;  %v4811_v18 = vld [vmem:[#allocation2 + $0x139] sm:$0xff] }
 0x330   : > { %14458 = vst [vmem:[#allocation21_spill] sm:$0xff] %v13460_v63  ;;  %11085 = vmatmul.mubr.msk.bf16.gmra.mrb[56].mxu1 %vm331_vm3, %v13318_v45  ;;  %v4806_v45 = vld [vmem:[#allocation2 + $0x111] sm:$0xff]  ;;  %v4827_v63 = vld [vmem:[#allocation2 + $0x1b9] sm:$0xff] }
 0x331   : > { %11088 = vmatprep.mubr.msk.bf16.mxu1 %vm331_vm3, %v13462_v20  ;;  %v13482_v51 = vpack.c.bf16 %v4807_v25, %v4806_v45 }
 0x334   : > { %v10846_v10 = vpop.f32.mrb[176].mxu0 }
 0x335   : > { %v13468_v12 = vpop.f32.mrb[177].mxu0  ;;  %v4813_v10 = vld [vmem:[#allocation2 + $0x149] sm:$0xff] }
 0x336   : > { %14459 = vst [vmem:[#allocation22_spill] sm:$0xff] %v13468_v12  ;;  %v10847_v28 = vpop.f32.mrb[178].mxu0  ;;  %v13498_v25 = vpack.c.bf16 %v4813_v10, %v4812_v5  ;;  %v4818_v10 = vld [vmem:[#allocation2 + $0x171] sm:$0xff] }
 0x337   : > { %v13472_v34 = vpop.f32.mrb[179].mxu0  ;;  %v13494_v28 = vpack.c.bf16 %v4811_v18, %v4810_v59 }
 0x338   : > { %14460 = vst [vmem:[#allocation23_spill] sm:$0xff] %v13472_v34  ;;  %11089 = vmatmul.mubr.msk.bf16.gmra.mrb[60].mxu1 %vm331_vm3, %v13470_v54  ;;  %v4825_v34 = vld [vmem:[#allocation2 + $0x1a9] sm:$0xff] }
 0x339   : > { %11092 = vmatprep.mubr.msk.bf16.mxu1 %vm331_vm3, %v13474_v22 }
 0x33c   : > { %v10850_v29 = vpop.f32.mrb[180].mxu0 }
 0x33d   : > { %v13480_v13 = vpop.f32.mrb[181].mxu0  ;;  %v4814_v29 = vld [vmem:[#allocation2 + $0x151] sm:$0xff] }
 0x33e   : > { %14461 = vst [vmem:[#allocation24_spill] sm:$0xff] %v13480_v13  ;;  %v10851_v44 = vpop.f32.mrb[182].mxu0  ;;  %v13506_v59 = vpack.c.bf16 %v4815_v35, %v4814_v29 }
 0x33f   : > { %v13484_v9 = vpop.f32.mrb[183].mxu0  ;;  %v4816_v44 = vld [vmem:[#allocation2 + $0x161] sm:$0xff] }
 0x340   : > { %14462 = vst [vmem:[#allocation25_spill] sm:$0xff] %v13484_v9  ;;  %11093 = vmatmul.mubr.msk.bf16.gmra.mrb[0].mxu1 %vm331_vm3, %v13482_v51  ;;  %v4821_v9 = vld [vmem:[#allocation2 + $0x189] sm:$0xff] }
 0x341   : > { %11096 = vmatprep.mubr.msk.bf16.mxu1 %vm331_vm3, %v13486_v58 }
 0x344   : > { %v10854_v7 = vpop.f32.mrb[184].mxu0 }
 0x345   : > { %v13492_v32 = vpop.f32.mrb[185].mxu0  ;;  %v4817_v7 = vld [vmem:[#allocation2 + $0x169] sm:$0xff] }
 0x346   : > { %14463 = vst [vmem:[#allocation26_spill] sm:$0xff] %v13492_v32  ;;  %v10855_v4 = vpop.f32.mrb[186].mxu0  ;;  %v13510_v5 = vpack.c.bf16 %v4817_v7, %v4816_v44  ;;  %v4820_v32 = vld [vmem:[#allocation2 + $0x181] sm:$0xff]  ;;  %v4822_v7 = vld [vmem:[#allocation2 + $0x191] sm:$0xff] }
 0x347   : > { %v13496_v45 = vpop.f32.mrb[187].mxu0  ;;  %v13522_v44 = vpack.c.bf16 %v4821_v9, %v4820_v32  ;;  %v4826_v32 = vld [vmem:[#allocation2 + $0x1b1] sm:$0xff] }
 0x348   : > { %14464 = vst [vmem:[#allocation27_spill] sm:$0xff] %v13496_v45  ;;  %11097 = vmatmul.mubr.msk.bf16.gmra.mrb[4].mxu1 %vm331_vm3, %v13494_v28  ;;  %v4819_v45 = vld [vmem:[#allocation2 + $0x179] sm:$0xff] }
 0x349   : > { %11100 = vmatprep.mubr.msk.bf16.mxu1 %vm331_vm3, %v13498_v25  ;;  %v13518_v29 = vpack.c.bf16 %v4819_v45, %v4818_v10 }
 0x34c   : > { %v10858_v55 = vpop.f32.mrb[188].mxu0 }
 0x34d   : > { %v13504_v37 = vpop.f32.mrb[189].mxu0 }
 0x34e   : > { %14465 = vst [vmem:[#allocation28_spill] sm:$0xff] %v13504_v37  ;;  %v10859_v4 = vpop.f32.mrb[190].mxu0  ;;  %v4824_v37 = vld [vmem:[#allocation2 + $0x1a1] sm:$0xff] }
 0x34f   : > { %v13508_v18 = vpop.f32.mrb[191].mxu0  ;;  %v13534_v9 = vpack.c.bf16 %v4825_v34, %v4824_v37  ;;  %v13546_v37 = vpack.c.bf16 %v4829_v3, %v4828_v61  ;;  %v4830_v34 = vld [vmem:[#allocation2 + $0x1d1] sm:$0xff]  ;;  %v13558_v3 = vpack.c.bf16 %v4833_v38, %v4832_v57  ;;  %v13570_v38 = vpack.c.bf16 %v4837_v21, %v4836_v36 }
 0x350   : > { %14466 = vst [vmem:[#allocation29_spill] sm:$0xff] %v13508_v18  ;;  %11101 = vmatmul.mubr.msk.bf16.gmra.mrb[8].mxu1 %vm331_vm3, %v13506_v59  ;;  %v4823_v18 = vld [vmem:[#allocation2 + $0x199] sm:$0xff]  ;;  %v4834_v61 = vld [vmem:[#allocation2 + $0x1f1] sm:$0xff] }
 0x351   : > { %11104 = vmatprep.mubr.msk.bf16.mxu1 %vm331_vm3, %v13510_v5  ;;  %v13530_v45 = vpack.c.bf16 %v4823_v18, %v4822_v7  ;;  %v13542_v18 = vpack.c.bf16 %v4827_v63, %v4826_v32  ;;  %v13554_v63 = vpack.c.bf16 %v4831_v41, %v4830_v34  ;;  %v13566_v41 = vpack.c.bf16 %v4835_v26, %v4834_v61  ;;  %v4838_v57 = vld [vmem:[#allocation2 + $0x211] sm:$0xff] }
 0x352   : > { %v4842_v36 = vld [vmem:[#allocation2 + $0x231] sm:$0xff] }
 0x354   : > { %v10866_v55 = vpop.f32.mrb[128].mxu0 }
 0x355   : > { %v13516_v13 = vpop.f32.mrb[129].mxu0 }
 0x356   : > { %14467 = vst [vmem:[#allocation30_spill] sm:$0xff] %v13516_v13  ;;  %v10867_v4 = vpop.f32.mrb[130].mxu0  ;;  %v5356_v13 = vld [vmem:[#allocation2 + $0xcf] sm:$0xff] }
 0x357   : > { %v13520_v35 = vpop.f32.mrb[131].mxu0 }
 0x358   : > { %14468 = vst [vmem:[#allocation31_spill] sm:$0xff] %v13520_v35  ;;  %11105 = vmatmul.mubr.msk.bf16.gmra.mrb[12].mxu1 %vm331_vm3, %v13518_v29 }
 0x359   : > { %11108 = vmatprep.mubr.msk.bf16.mxu1 %vm331_vm3, %v13522_v44 }
 0x35c   : > { %v10870_v55 = vpop.f32.mrb[132].mxu0 }
 0x35d   : > { %v13528_v12 = vpop.f32.mrb[133].mxu0 }
 0x35e   : > { %14469 = vst [vmem:[#allocation32_spill] sm:$0xff] %v13528_v12  ;;  %v10871_v4 = vpop.f32.mrb[134].mxu0 }
 0x35f   : > { %v13532_v10 = vpop.f32.mrb[135].mxu0 }
 0x360   : > { %14470 = vst [vmem:[#allocation33_spill] sm:$0xff] %v13532_v10  ;;  %11109 = vmatmul.mubr.msk.bf16.gmra.mrb[16].mxu1 %vm331_vm3, %v13530_v45  ;;  %v5343_v10 = vld [vmem:[#allocation2 + $0x67] sm:$0xff] }
 0x361   : > { %11112 = vmatprep.mubr.msk.bf16.mxu1 %vm331_vm3, %v13534_v9 }
 0x364   : > { %v10874_v55 = vpop.f32.mrb[136].mxu0 }
 0x365   : > { %v13540_v48 = vpop.f32.mrb[137].mxu0 }
 0x366   : > { %14471 = vst [vmem:[#allocation34_spill] sm:$0xff] %v13540_v48  ;;  %v10875_v4 = vpop.f32.mrb[138].mxu0 }
 0x367   : > { %v13544_v7 = vpop.f32.mrb[139].mxu0 }
 0x368   : > { %14472 = vst [vmem:[#allocation35_spill] sm:$0xff] %v13544_v7  ;;  %11113 = vmatmul.mubr.msk.bf16.gmra.mrb[20].mxu1 %vm331_vm3, %v13542_v18  ;;  %v4841_v7 = vld [vmem:[#allocation2 + $0x229] sm:$0xff] }
 0x369   : > { %11116 = vmatprep.mubr.msk.bf16.mxu1 %vm331_vm3, %v13546_v37 }
 0x36c   : > { %v10878_v55 = vpop.f32.mrb[140].mxu0 }
 0x36d   : > { %v13552_v30 = vpop.f32.mrb[141].mxu0 }
 0x36e   : > { %14473 = vst [vmem:[#allocation36_spill] sm:$0xff] %v13552_v30  ;;  %v10879_v4 = vpop.f32.mrb[142].mxu0  ;;  %v4840_v30 = vld [vmem:[#allocation2 + $0x221] sm:$0xff] }
 0x36f   : > { %v13556_v32 = vpop.f32.mrb[143].mxu0  ;;  %v13582_v21 = vpack.c.bf16 %v4841_v7, %v4840_v30  ;;  %v5344_v30 = vld [vmem:[#allocation2 + $0x6f] sm:$0xff]  ;;  %v5345_v7 = vld [vmem:[#allocation2 + $0x77] sm:$0xff] }
 0x370   : > { %14474 = vst [vmem:[#allocation37_spill] sm:$0xff] %v13556_v32  ;;  %11117 = vmatmul.mubr.msk.bf16.gmra.mrb[24].mxu1 %vm331_vm3, %v13554_v63  ;;  %v4839_v32 = vld [vmem:[#allocation2 + $0x219] sm:$0xff] }
 0x371   : > { %11120 = vmatprep.mubr.msk.bf16.mxu1 %vm331_vm3, %v13558_v3  ;;  %v13578_v26 = vpack.c.bf16 %v4839_v32, %v4838_v57  ;;  %14479 = vst [vmem:[#allocation42_spill] sm:$0xff] %v13582_v21  ;;  %v5346_v32 = vld [vmem:[#allocation2 + $0x7f] sm:$0xff]  ;;  %v5347_v57 = vld [vmem:[#allocation2 + $0x87] sm:$0xff] }
 0x372   : > { %v5408_v12 = vpack.c.bf16 %v5347_v57, %v5346_v32  ;;  %v5354_v32 = vld [vmem:[#allocation2 + $0xbf] sm:$0xff]  ;;  %v5355_v57 = vld [vmem:[#allocation2 + $0xc7] sm:$0xff] }
 0x373   : > { %v5412_v35 = vpack.c.bf16 %v5355_v57, %v5354_v32  ;;  %v5365_v32 = vld [vmem:[#allocation2 + $0x117] sm:$0xff]  ;;  %v5366_v57 = vld [vmem:[#allocation2 + $0x11f] sm:$0xff] }
 0x374   : > { %v10882_v55 = vpop.f32.mrb[144].mxu0 }
 0x375   : > { %v13564_v0 = vpop.f32.mrb[145].mxu0 }
 0x376   : > { %14475 = vst [vmem:[#allocation38_spill] sm:$0xff] %v13564_v0  ;;  %v10883_v4 = vpop.f32.mrb[146].mxu0  ;;  %v5342_v0 = vld [vmem:[#allocation2 + $0x5f] sm:$0xff] }
 0x377   : > { %v13568_v34 = vpop.f32.mrb[147].mxu0 }
 0x378   : > { %14476 = vst [vmem:[#allocation39_spill] sm:$0xff] %v13568_v34  ;;  %11121 = vmatmul.mubr.msk.bf16.gmra.mrb[28].mxu1 %vm331_vm3, %v13566_v41  ;;  %v4843_v34 = vld [vmem:[#allocation2 + $0x239] sm:$0xff] }
 0x379   : > { %11124 = vmatprep.mubr.msk.bf16.mxu1 %vm331_vm3, %v13570_v38 }
 0x37c   : > { %v10886_v55 = vpop.f32.mrb[148].mxu0 }
 0x37d   : > { %v13576_v48 = vpop.f32.mrb[149].mxu0  ;;  %v13588_v55 = vpack.c.bf16 %v4843_v34, %v4842_v36  ;;  %v5350_v34 = vld [vmem:[#allocation2 + $0x9f] sm:$0xff]  ;;  %v5351_v36 = vld [vmem:[#allocation2 + $0xa7] sm:$0xff] }
 0x37e   : > { %14477 = vst [vmem:[#allocation40_spill] sm:$0xff] %v13576_v48  ;;  %v10887_v4 = vpop.f32.mrb[150].mxu0  ;;  %v5406_v48 = vpack.c.bf16 %v5343_v10, %v5342_v0  ;;  %v13602_v0 = vld [vmem:[%s14434_s3 + $0x80] sm:$0xff]   ;;  %v5349_v10 = vld [vmem:[#allocation2 + $0x97] sm:$0xff] }
 0x37f   : > { %v13580_v61 = vpop.f32.mrb[151].mxu0  ;;  %14480 = vst [vmem:[#allocation43_spill] sm:$0xff] %v13588_v55  ;;  %v5407_v4 = vpack.c.bf16 %v5345_v7, %v5344_v30  ;;  %v5410_v7 = vpack.c.bf16 %v5351_v36, %v5350_v34  ;;  %v5360_v36 = vld [vmem:[#allocation2 + $0xef] sm:$0xff] }
 0x380   : > { %14478 = vst [vmem:[#allocation41_spill] sm:$0xff] %v13580_v61  ;;  %11125 = vmatmul.mubr.msk.bf16.gmra.mrb[32].mxu1 %vm331_vm3, %v13578_v26  ;;  %v12318_v61 = vld [vmem:[%s14434_s3 + $0x78] sm:$0xff]  }
 0x381   : > { %11128 = vmatprep.mubr.msk.bf16.mxu1 %vm331_vm3, %v13582_v21  ;;  %v5363_v21 = vld [vmem:[#allocation2 + $0x107] sm:$0xff] }
 0x388   : > { %11129 = vmatmul.mubr.msk.bf16.gmra.mrb[36].mxu1 %vm331_vm3, %v13588_v55 }
 0x389   : > { %11136 = vmatprep.mubr.msk.bf16.mxu1 %vm331_vm3, %v5406_v48  ;;  %v5348_v48 = vld [vmem:[#allocation2 + $0x8f] sm:$0xff] }
 0x38a   : > { %v5409_v30 = vpack.c.bf16 %v5349_v10, %v5348_v48  ;;  %v5358_v48 = vld [vmem:[#allocation2 + $0xdf] sm:$0xff]  ;;  %v5359_v10 = vld [vmem:[#allocation2 + $0xe7] sm:$0xff] }
 0x38b   : > { %v5414_v34 = vpack.c.bf16 %v5359_v10, %v5358_v48  ;;  %v5369_v48 = vld [vmem:[#allocation2 + $0x137] sm:$0xff]  ;;  %v5370_v10 = vld [vmem:[#allocation2 + $0x13f] sm:$0xff] }
 0x390   : > { %11137 = vmatmul.mubr.msk.bf16.vlgmr.msra.gmra.mrb[40].mxu1 %vm331_vm3, %v5407_v4 }
 0x391   : > { %11201 = vmatpush3.bf16.msra.mxu1 %v13431_v43  ;;  %11140 = vmatprep.mubr.msk.bf16.mxu1 %vm331_vm3, %v5408_v12  ;;  %v5352_v43 = vld [vmem:[#allocation2 + $0xaf] sm:$0xff]  ;;  %v5353_v12 = vld [vmem:[#allocation2 + $0xb7] sm:$0xff] }
 0x392   : > { %11202 = vmatprep.subr.bf16.mxu1 %v12318_v61  ;;  %v5411_v4 = vpack.c.bf16 %v5353_v12, %v5352_v43 }
 0x395   : > { %11203 = vmatpush3.bf16.msra.mxu1 %v12318_v61  ;;  %v5357_v61 = vld [vmem:[#allocation2 + $0xd7] sm:$0xff] }
 0x396   : > { %11268 = vmatprep.subr.bf16.mxu1 %v13602_v0  ;;  %v5413_v55 = vpack.c.bf16 %v5357_v61, %v5356_v13 }
 0x398   : > { %11141 = vmatmul.mubr.msk.bf16.gmra.mrb[44].mxu1 %vm331_vm3, %v5409_v30  ;;  %v5361_v30 = vld [vmem:[#allocation2 + $0xf7] sm:$0xff] }
 0x399   : > { %11144 = vmatprep.mubr.msk.bf16.mxu1 %vm331_vm3, %v5410_v7  ;;  %v5362_v7 = vld [vmem:[#allocation2 + $0xff] sm:$0xff]  ;;  %v5415_v43 = vpack.c.bf16 %v5361_v30, %v5360_v36  ;;  %v5372_v30 = vld [vmem:[#allocation2 + $0x14f] sm:$0xff] }
 0x39a   : > { %v5416_v12 = vpack.c.bf16 %v5363_v21, %v5362_v7  ;;  %v5373_v7 = vld [vmem:[#allocation2 + $0x157] sm:$0xff] }
 0x3a0   : > { %11145 = vmatmul.mubr.msk.bf16.gmra.mrb[48].mxu1 %vm331_vm3, %v5411_v4  ;;  %v5367_v4 = vld [vmem:[#allocation2 + $0x127] sm:$0xff] }
 0x3a1   : > { %11148 = vmatprep.mubr.msk.bf16.mxu1 %vm331_vm3, %v5412_v35  ;;  %v5364_v35 = vld [vmem:[#allocation2 + $0x10f] sm:$0xff]  ;;  %v5418_v61 = vpack.c.bf16 %v5367_v4, %v5366_v57  ;;  %v5377_v4 = vld [vmem:[#allocation2 + $0x177] sm:$0xff] }
 0x3a2   : > { %v5417_v13 = vpack.c.bf16 %v5365_v32, %v5364_v35  ;;  %v5421_v35 = vpack.c.bf16 %v5373_v7, %v5372_v30  ;;  %v5376_v57 = vld [vmem:[#allocation2 + $0x16f] sm:$0xff] }
 0x3a8   : > { %11149 = vmatmul.mubr.msk.bf16.gmra.mrb[52].mxu1 %vm331_vm3, %v5413_v55  ;;  %v5368_v55 = vld [vmem:[#allocation2 + $0x12f] sm:$0xff] }
 0x3a9   : > { %11152 = vmatprep.mubr.msk.bf16.mxu1 %vm331_vm3, %v5414_v34  ;;  %v5371_v34 = vld [vmem:[#allocation2 + $0x147] sm:$0xff]  ;;  %v5419_v36 = vpack.c.bf16 %v5369_v48, %v5368_v55  ;;  %v5423_v55 = vpack.c.bf16 %v5377_v4, %v5376_v57 }
 0x3aa   : > { %v5420_v21 = vpack.c.bf16 %v5371_v34, %v5370_v10  ;;  %v5380_v10 = vld [vmem:[#allocation2 + $0x18f] sm:$0xff]  ;;  %v5381_v34 = vld [vmem:[#allocation2 + $0x197] sm:$0xff] }
 0x3ab   : > { %v5425_v30 = vpack.c.bf16 %v5381_v34, %v5380_v10 }
 0x3b0   : > { %11153 = vmatmul.mubr.msk.bf16.gmra.mrb[56].mxu1 %vm331_vm3, %v5415_v43  ;;  %v5374_v43 = vld [vmem:[#allocation2 + $0x15f] sm:$0xff] }
 0x3b1   : > { %11156 = vmatprep.mubr.msk.bf16.mxu1 %vm331_vm3, %v5416_v12  ;;  %v5375_v12 = vld [vmem:[#allocation2 + $0x167] sm:$0xff] }
 0x3b2   : > { %v5422_v32 = vpack.c.bf16 %v5375_v12, %v5374_v43  ;;  %v5384_v43 = vld [vmem:[#allocation2 + $0x1af] sm:$0xff]  ;;  %v5385_v12 = vld [vmem:[#allocation2 + $0x1b7] sm:$0xff] }
 0x3b3   : > { %v5427_v57 = vpack.c.bf16 %v5385_v12, %v5384_v43 }
 0x3b8   : > { %11157 = vmatmul.mubr.msk.bf16.gmra.mrb[60].mxu1 %vm331_vm3, %v5417_v13  ;;  %v5378_v13 = vld [vmem:[#allocation2 + $0x17f] sm:$0xff] }
 0x3b9   : > { %11160 = vmatprep.mubr.msk.bf16.mxu1 %vm331_vm3, %v5418_v61  ;;  %v5379_v61 = vld [vmem:[#allocation2 + $0x187] sm:$0xff] }
 0x3ba   : > { %v5424_v48 = vpack.c.bf16 %v5379_v61, %v5378_v13  ;;  %v5388_v13 = vld [vmem:[#allocation2 + $0x1cf] sm:$0xff]  ;;  %v5389_v61 = vld [vmem:[#allocation2 + $0x1d7] sm:$0xff] }
 0x3bb   : > { %v5429_v10 = vpack.c.bf16 %v5389_v61, %v5388_v13  ;;  %v5403_v13 = vld [vmem:[#allocation2 + $0x247] sm:$0xff] }
 0x3c0   : > { %11161 = vmatmul.mubr.msk.bf16.gmra.mrb[0].mxu1 %vm331_vm3, %v5419_v36  ;;  %v5382_v36 = vld [vmem:[#allocation2 + $0x19f] sm:$0xff] }
 0x3c1   : > { %11164 = vmatprep.mubr.msk.bf16.mxu1 %vm331_vm3, %v5420_v21  ;;  %v5383_v21 = vld [vmem:[#allocation2 + $0x1a7] sm:$0xff] }
 0x3c2   : > { %v5426_v7 = vpack.c.bf16 %v5383_v21, %v5382_v36  ;;  %v5392_v36 = vld [vmem:[#allocation2 + $0x1ef] sm:$0xff]  ;;  %v5393_v21 = vld [vmem:[#allocation2 + $0x1f7] sm:$0xff] }
 0x3c3   : > { %v5431_v43 = vpack.c.bf16 %v5393_v21, %v5392_v36  ;;  %v6471_v36 = vld [vmem:[#allocation2 + $0x89] sm:$0xff] }
 0x3c8   : > { %11165 = vmatmul.mubr.msk.bf16.gmra.mrb[4].mxu1 %vm331_vm3, %v5421_v35  ;;  %v5386_v35 = vld [vmem:[#allocation2 + $0x1bf] sm:$0xff] }
 0x3c9   : > { %11168 = vmatprep.mubr.msk.bf16.mxu1 %vm331_vm3, %v5422_v32  ;;  %v5387_v32 = vld [vmem:[#allocation2 + $0x1c7] sm:$0xff] }
 0x3ca   : > { %v5428_v4 = vpack.c.bf16 %v5387_v32, %v5386_v35  ;;  %v5396_v35 = vld [vmem:[#allocation2 + $0x20f] sm:$0xff]  ;;  %v5397_v32 = vld [vmem:[#allocation2 + $0x217] sm:$0xff] }
 0x3d0   : > { %11169 = vmatmul.mubr.msk.bf16.gmra.mrb[8].mxu1 %vm331_vm3, %v5423_v55  ;;  %v5390_v55 = vld [vmem:[#allocation2 + $0x1df] sm:$0xff] }
 0x3d1   : > { %11172 = vmatprep.mubr.msk.bf16.mxu1 %vm331_vm3, %v5424_v48  ;;  %v5391_v48 = vld [vmem:[#allocation2 + $0x1e7] sm:$0xff] }
 0x3d2   : > { %v5430_v34 = vpack.c.bf16 %v5391_v48, %v5390_v55  ;;  %v5404_v55 = vld [vmem:[#allocation2 + $0x24f] sm:$0xff]  ;;  %v5405_v48 = vld [vmem:[#allocation2 + $0x257] sm:$0xff] }
 0x3d8   : > { %11173 = vmatmul.mubr.msk.bf16.gmra.mrb[12].mxu1 %vm331_vm3, %v5425_v30  ;;  %v5394_v30 = vld [vmem:[#allocation2 + $0x1ff] sm:$0xff] }
 0x3d9   : > { %11176 = vmatprep.mubr.msk.bf16.mxu1 %vm331_vm3, %v5426_v7  ;;  %v5395_v7 = vld [vmem:[#allocation2 + $0x207] sm:$0xff] }
 0x3da   : > { %v5432_v12 = vpack.c.bf16 %v5395_v7, %v5394_v30  ;;  %v6473_v7 = vld [vmem:[#allocation2 + $0x99] sm:$0xff] }
 0x3e0   : > { %11177 = vmatmul.mubr.msk.bf16.gmra.mrb[16].mxu1 %vm331_vm3, %v5427_v57  ;;  %v5433_v57 = vpack.c.bf16 %v5397_v32, %v5396_v35 }
 0x3e1   : > { %11180 = vmatprep.mubr.msk.bf16.mxu1 %vm331_vm3, %v5428_v4  ;;  %v5402_v4 = vld [vmem:[#allocation2 + $0x23f] sm:$0xff] }
 0x3e2   : > { %v5436_v61 = vpack.c.bf16 %v5403_v13, %v5402_v4  ;;  %v6477_v4 = vld [vmem:[#allocation2 + $0xb9] sm:$0xff]  ;;  %v6478_v13 = vld [vmem:[#allocation2 + $0xc1] sm:$0xff] }
 0x3e8   : > { %11181 = vmatmul.mubr.msk.bf16.gmra.mrb[20].mxu1 %vm331_vm3, %v5429_v10  ;;  %v5437_v10 = vpack.c.bf16 %v5405_v48, %v5404_v55 }
 0x3e9   : > { %11184 = vmatprep.mubr.msk.bf16.mxu1 %vm331_vm3, %v5430_v34  ;;  %v6470_v34 = vld [vmem:[#allocation2 + $0x81] sm:$0xff] }
 0x3ea   : > { %v6532_v30 = vpack.c.bf16 %v6471_v36, %v6470_v34  ;;  %v14488_v36 = vld [vmem:[#allocation34_spill] sm:$0xff] }
 0x3f0   : > { %11185 = vmatmul.mubr.msk.bf16.gmra.mrb[24].mxu1 %vm331_vm3, %v5431_v43  ;;  %v6474_v43 = vld [vmem:[#allocation2 + $0xa1] sm:$0xff] }
 0x3f1   : > { %11188 = vmatprep.mubr.msk.bf16.mxu1 %vm331_vm3, %v5432_v12  ;;  %v6475_v12 = vld [vmem:[#allocation2 + $0xa9] sm:$0xff] }
 0x3f2   : > { %v6534_v32 = vpack.c.bf16 %v6475_v12, %v6474_v43 }
 0x3f8   : > { %11189 = vmatmul.mubr.msk.bf16.gmra.mrb[28].mxu1 %vm331_vm3, %v5433_v57  ;;  %v6476_v57 = vld [vmem:[#allocation2 + $0xb1] sm:$0xff] }
 0x3f9   : > { %11192 = vmatprep.mubr.msk.bf16.mxu1 %vm331_vm3, %v13238_v42  ;;  %v12320_v42 = vld [vmem:[%s14434_s3 + $0x88] sm:$0xff]   ;;  %v6535_v55 = vpack.c.bf16 %v6477_v4, %v6476_v57  ;;  %v14490_v57 = vld [vmem:[#allocation36_spill] sm:$0xff] }
 0x400   : > { %11193 = vmatmul.mubr.msk.bf16.gmra.mrb[32].mxu1 %vm331_vm3, %v13248_v53  ;;  %v5950_v53 = vld [vmem:[#allocation2 + $0x1d0] sm:$0xff] }
 0x401   : > { %11196 = vmatprep.mubr.msk.bf16.mxu1 %vm331_vm3, %v5436_v61  ;;  %v6479_v61 = vld [vmem:[#allocation2 + $0xc9] sm:$0xff] }
 0x402   : > { %v6536_v48 = vpack.c.bf16 %v6479_v61, %v6478_v13 }
 0x408   : > { %11197 = vmatmul.mubr.msk.bf16.gmra.mrb[36].mxu1 %vm331_vm3, %v5437_v10  ;;  %v6480_v10 = vld [vmem:[#allocation2 + $0xd1] sm:$0xff] }
 0x409   : > { %11204 = vmatprep.mubr.msk.bf16.mxu1 %vm331_vm3, %v13267_v6  ;;  %v5951_v6 = vld [vmem:[#allocation2 + $0x1d8] sm:$0xff] }
 0x410   : > { %11205 = vmatmul.mubr.msk.bf16.vlgmr.msra.gmra.mrb[40].mxu1 %vm331_vm3, %v13283_v15  ;;  %v5991_v15 = vpack.c.bf16 %v5951_v6, %v5950_v53 }
 0x411   : > { %11269 = vmatpush3.bf16.msra.mxu1 %v13602_v0  ;;  %11208 = vmatprep.mubr.msk.bf16.mxu1 %vm331_vm3, %v13288_v19  ;;  %v5952_v19 = vld [vmem:[#allocation2 + $0x1e0] sm:$0xff]  ;;  %v6468_v0 = vld [vmem:[#allocation2 + $0x71] sm:$0xff] }
 0x412   : > { %11270 = vmatprep.subr.bf16.mxu1 %v12320_v42 }
 0x415   : > { %11271 = vmatpush3.bf16.msra.mxu1 %v12320_v42  ;;  %v6481_v42 = vld [vmem:[#allocation2 + $0xd9] sm:$0xff] }
 0x416   : > { %v6537_v53 = vpack.c.bf16 %v6481_v42, %v6480_v10 }
 0x418   : > { %11209 = vmatmul.mubr.msk.bf16.gmra.mrb[44].mxu1 %vm331_vm3, %v13300_v24  ;;  %v5953_v24 = vld [vmem:[#allocation2 + $0x1e8] sm:$0xff] }
 0x419   : > { %11212 = vmatprep.mubr.msk.bf16.mxu1 %vm331_vm3, %v13304_v31  ;;  %v5992_v31 = vpack.c.bf16 %v5953_v24, %v5952_v19  ;;  %v14485_v24 = vld [vmem:[#allocation31_spill] sm:$0xff] }
 0x420   : > { %11213 = vmatmul.mubr.msk.bf16.gmra.mrb[48].mxu1 %vm331_vm3, %v13316_v39  ;;  %v5954_v39 = vld [vmem:[#allocation2 + $0x1f0] sm:$0xff] }
 0x421   : > { %11216 = vmatprep.mubr.msk.bf16.mxu1 %vm331_vm3, %v13320_v46  ;;  %v5955_v46 = vld [vmem:[#allocation2 + $0x1f8] sm:$0xff] }
 0x428   : > { %11217 = vmatmul.mubr.msk.bf16.gmra.mrb[52].mxu1 %vm331_vm3, %v13328_v49  ;;  %v5993_v49 = vpack.c.bf16 %v5955_v46, %v5954_v39  ;;  %v13819_v39 = vld [vmem:[%s14435_s4] ss:$0 sm:$0xff] }
 0x429   : > { %11220 = vmatprep.mubr.msk.bf16.mxu1 %vm331_vm3, %v13330_v56  ;;  %v5956_v56 = vld [vmem:[#allocation2 + $0x200] sm:$0xff] }
 0x430   : > { %11221 = vmatmul.mubr.msk.bf16.gmra.mrb[56].mxu1 %vm331_vm3, %v13336_v8  ;;  %v5957_v8 = vld [vmem:[#allocation2 + $0x208] sm:$0xff] }
 0x431   : > { %11224 = vmatprep.mubr.msk.bf16.mxu1 %vm331_vm3, %v13338_v62  ;;  %v5994_v62 = vpack.c.bf16 %v5957_v8, %v5956_v56  ;;  %v14486_v8 = vld [vmem:[#allocation32_spill] sm:$0xff] }
 0x438   : > { %11225 = vmatmul.mubr.msk.bf16.gmra.mrb[60].mxu1 %vm331_vm3, %v13344_v2  ;;  %v5958_v2 = vld [vmem:[#allocation2 + $0x210] sm:$0xff] }
 0x439   : > { %11228 = vmatprep.mubr.msk.bf16.mxu1 %vm331_vm3, %v13346_v11  ;;  %v5959_v11 = vld [vmem:[#allocation2 + $0x218] sm:$0xff] }
 0x440   : > { %11229 = vmatmul.mubr.msk.bf16.gmra.mrb[0].mxu1 %vm331_vm3, %v13352_v16  ;;  %v5995_v16 = vpack.c.bf16 %v5959_v11, %v5958_v2 }
 0x441   : > { %11232 = vmatprep.mubr.msk.bf16.mxu1 %vm331_vm3, %v13354_v17  ;;  %v5964_v17 = vld [vmem:[#allocation2 + $0x240] sm:$0xff] }
 0x448   : > { %11233 = vmatmul.mubr.msk.bf16.gmra.mrb[4].mxu1 %vm331_vm3, %v13360_v23  ;;  %v5965_v23 = vld [vmem:[#allocation2 + $0x248] sm:$0xff] }
 0x449   : > { %11236 = vmatprep.mubr.msk.bf16.mxu1 %vm331_vm3, %v13362_v27  ;;  %v5998_v27 = vpack.c.bf16 %v5965_v23, %v5964_v17  ;;  %v14487_v23 = vld [vmem:[#allocation33_spill] sm:$0xff] }
 0x450   : > { %11237 = vmatmul.mubr.msk.bf16.gmra.mrb[8].mxu1 %vm331_vm3, %v13368_v33  ;;  %v5966_v33 = vld [vmem:[#allocation2 + $0x250] sm:$0xff] }
 0x451   : > { %11240 = vmatprep.mubr.msk.bf16.mxu1 %vm331_vm3, %v13370_v40  ;;  %v5967_v40 = vld [vmem:[#allocation2 + $0x258] sm:$0xff] }
 0x458   : > { %11241 = vmatmul.mubr.msk.bf16.gmra.mrb[12].mxu1 %vm331_vm3, %v13376_v47  ;;  %v5999_v47 = vpack.c.bf16 %v5967_v40, %v5966_v33 }
 0x459   : > { %11244 = vmatprep.mubr.msk.bf16.mxu1 %vm331_vm3, %v13378_v52  ;;  %v6466_v52 = vld [vmem:[#allocation2 + $0x61] sm:$0xff] }
 0x460   : > { %11245 = vmatmul.mubr.msk.bf16.gmra.mrb[16].mxu1 %vm331_vm3, %v13384_v60  ;;  %v6467_v60 = vld [vmem:[#allocation2 + $0x69] sm:$0xff] }
 0x461   : > { %11248 = vmatprep.mubr.msk.bf16.mxu1 %vm331_vm3, %v13386_v1  ;;  %v6530_v1 = vpack.c.bf16 %v6467_v60, %v6466_v52 }
 0x468   : > { %11249 = vmatmul.mubr.msk.bf16.gmra.mrb[20].mxu1 %vm331_vm3, %v5991_v15 }
 0x469   : > { %11252 = vmatprep.mubr.msk.bf16.mxu1 %vm331_vm3, %v5992_v31 }
 0x470   : > { %11253 = vmatmul.mubr.msk.bf16.gmra.mrb[24].mxu1 %vm331_vm3, %v5993_v49 }
 0x471   : > { %11256 = vmatprep.mubr.msk.bf16.mxu1 %vm331_vm3, %v5994_v62 }
 0x478   : > { %11257 = vmatmul.mubr.msk.bf16.gmra.mrb[28].mxu1 %vm331_vm3, %v5995_v16 }
 0x479   : > { %11260 = vmatprep.mubr.msk.bf16.mxu1 %vm331_vm3, %v13400_v14  ;;  %v6469_v14 = vld [vmem:[#allocation2 + $0x79] sm:$0xff] }
 0x47a   : > { %v6531_v21 = vpack.c.bf16 %v6469_v14, %v6468_v0 }
 0x480   : > { %11261 = vmatmul.mubr.msk.bf16.gmra.mrb[32].mxu1 %vm331_vm3, %v13406_v50  ;;  %v6472_v50 = vld [vmem:[#allocation2 + $0x91] sm:$0xff] }
 0x481   : > { %11264 = vmatprep.mubr.msk.bf16.mxu1 %vm331_vm3, %v5998_v27  ;;  %v6533_v35 = vpack.c.bf16 %v6473_v7, %v6472_v50  ;;  %v14489_v7 = vld [vmem:[#allocation35_spill] sm:$0xff] }
 0x488   : > { %11265 = vmatmul.mubr.msk.bf16.gmra.mrb[36].mxu1 %vm331_vm3, %v5999_v47 }
 0x489   : > { %11272 = vmatprep.mubr.msk.bf16.mxu1 %vm331_vm3, %v6530_v1 }
 0x490   : > { %11273 = vmatmul.mubr.msk.bf16.vlgmr.msra.gmra.mrb[40].mxu1 %vm331_vm3, %v6531_v21 }
 0x491   : > { %11276 = vmatprep.mubr.msk.bf16.mxu1 %vm331_vm3, %v6532_v30 }
 0x498   : > { %11277 = vmatmul.mubr.msk.bf16.gmra.mrb[44].mxu1 %vm331_vm3, %v6533_v35 }
 0x499   : > { %11280 = vmatprep.mubr.msk.bf16.mxu1 %vm331_vm3, %v6534_v32 }
 0x4a0   : > { %11281 = vmatmul.mubr.msk.bf16.gmra.mrb[48].mxu1 %vm331_vm3, %v6535_v55 }
 0x4a1   : > { %11284 = vmatprep.mubr.msk.bf16.mxu1 %vm331_vm3, %v6536_v48 }
 0x4a8   : > { %11285 = vmatmul.mubr.msk.bf16.gmra.mrb[52].mxu1 %vm331_vm3, %v6537_v53 }
 0x4a9   : > { %11288 = vmatprep.mubr.msk.bf16.mxu1 %vm331_vm3, %v13462_v20  ;;  %v14481_v20 = vmov 0.0  }
 0x4aa   : > { %414 = vst.msk [vmem:[#allocation3 + $0x8] sm:$0xff] %vm412_vm4, %v14481_v20  ;;  %415 = vst.msk [vmem:[#allocation3 + $0x10] sm:$0xff] %vm412_vm4, %v14481_v20 }
 0x4ab   : > { %416 = vst.msk [vmem:[#allocation3 + $0x18] sm:$0xff] %vm412_vm4, %v14481_v20  ;;  %417 = vst.msk [vmem:[#allocation3 + $0x20] sm:$0xff] %vm412_vm4, %v14481_v20 }
 0x4ac   : > { %418 = vst.msk [vmem:[#allocation3 + $0x28] sm:$0xff] %vm412_vm4, %v14481_v20  ;;  %419 = vst.msk [vmem:[#allocation3 + $0x30] sm:$0xff] %vm412_vm4, %v14481_v20 }
 0x4ad   : > { %420 = vst.msk [vmem:[#allocation3 + $0x38] sm:$0xff] %vm412_vm4, %v14481_v20  ;;  %421 = vst.msk [vmem:[#allocation3 + $0x40] sm:$0xff] %vm412_vm4, %v14481_v20 }
 0x4ae   : > { %422 = vst.msk [vmem:[#allocation3 + $0x48] sm:$0xff] %vm412_vm4, %v14481_v20  ;;  %423 = vst.msk [vmem:[#allocation3 + $0x50] sm:$0xff] %vm412_vm4, %v14481_v20 }
 0x4af   : > { %424 = vst.msk [vmem:[#allocation3 + $0x58] sm:$0xff] %vm412_vm4, %v14481_v20  ;;  %425 = vst.msk [vmem:[#allocation3 + $0x60] sm:$0xff] %vm412_vm4, %v14481_v20 }
 0x4b0   : > { %11289 = vmatmul.mubr.msk.bf16.gmra.mrb[56].mxu1 %vm331_vm3, %v13470_v54  ;;  %426 = vst.msk [vmem:[#allocation3 + $0x68] sm:$0xff] %vm412_vm4, %v14481_v20  ;;  %427 = vst.msk [vmem:[#allocation3 + $0x70] sm:$0xff] %vm412_vm4, %v14481_v20  ;;  %v14482_v54 = vld [vmem:[#allocation42_spill] sm:$0xff] }
 0x4b1   : > { %11292 = vmatprep.mubr.msk.bf16.mxu1 %vm331_vm3, %v13474_v22  ;;  %428 = vst.msk [vmem:[#allocation3 + $0x78] sm:$0xff] %vm412_vm4, %v14481_v20  ;;  %429 = vst.msk [vmem:[#allocation3 + $0x80] sm:$0xff] %vm412_vm4, %v14481_v20  ;;  %v6526_v22 = vld [vmem:[#allocation2 + $0x241] sm:$0xff] }
 0x4b2   : > { %430 = vst.msk [vmem:[#allocation3 + $0x88] sm:$0xff] %vm412_vm4, %v14481_v20  ;;  %431 = vst.msk [vmem:[#allocation3 + $0x90] sm:$0xff] %vm412_vm4, %v14481_v20 }
 0x4b3   : > { %432 = vst.msk [vmem:[#allocation3 + $0x98] sm:$0xff] %vm412_vm4, %v14481_v20  ;;  %433 = vst.msk [vmem:[#allocation3 + $0xa0] sm:$0xff] %vm412_vm4, %v14481_v20 }
 0x4b4   : > { %434 = vst.msk [vmem:[#allocation3 + $0xa8] sm:$0xff] %vm412_vm4, %v14481_v20  ;;  %435 = vst.msk [vmem:[#allocation3 + $0xb0] sm:$0xff] %vm412_vm4, %v14481_v20  ;;  %v14491_v20 = vld [vmem:[#allocation37_spill] sm:$0xff] }
 0x4b8   : > { %11293 = vmatmul.mubr.msk.bf16.gmra.mrb[60].mxu1 %vm331_vm3, %v13482_v51  ;;  %v6527_v51 = vld [vmem:[#allocation2 + $0x249] sm:$0xff] }
 0x4b9   : > { %11296 = vmatprep.mubr.msk.bf16.mxu1 %vm331_vm3, %v13486_v58  ;;  %v6560_v58 = vpack.c.bf16 %v6527_v51, %v6526_v22 }
 0x4c0   : > { %11297 = vmatmul.mubr.msk.bf16.gmra.mrb[0].mxu1 %vm331_vm3, %v13494_v28  ;;  %v14483_v28 = vld [vmem:[#allocation43_spill] sm:$0xff] }
 0x4c1   : > { %11300 = vmatprep.mubr.msk.bf16.mxu1 %vm331_vm3, %v13498_v25  ;;  %v6528_v25 = vld [vmem:[#allocation2 + $0x251] sm:$0xff] }
 0x4c8   : > { %11301 = vmatmul.mubr.msk.bf16.gmra.mrb[4].mxu1 %vm331_vm3, %v13506_v59  ;;  %v6529_v59 = vld [vmem:[#allocation2 + $0x259] sm:$0xff] }
 0x4c9   : > { %11304 = vmatprep.mubr.msk.bf16.mxu1 %vm331_vm3, %v13510_v5  ;;  %v12321_v5 = vld [vmem:[%s14436_s5 + $0x20] sm:$0xff]  }
 0x4ca   : > { %11336 = vmatprep.subr.bf16.mxu0 %v12321_v5 }
 0x4cb   : > { %11337 = vmatpush3.bf16.msra.mxu0 %v12321_v5 }
 0x4d0   : > { %11305 = vmatmul.mubr.msk.bf16.gmra.mrb[8].mxu1 %vm331_vm3, %v13518_v29  ;;  %v6561_v29 = vpack.c.bf16 %v6529_v59, %v6528_v25 }
 0x4d1   : > { %11308 = vmatprep.mubr.msk.bf16.mxu1 %vm331_vm3, %v13522_v44  ;;  %v12322_v44 = vld [vmem:[%s14436_s5 + $0x28] sm:$0xff]  }
 0x4d2   : > { %11338 = vmatprep.subr.bf16.mxu0 %v12322_v44 }
 0x4d3   : > { %11339 = vmatpush3.bf16.msra.mxu0 %v12322_v44 }
 0x4d8   : > { %11309 = vmatmul.mubr.msk.bf16.gmra.mrb[12].mxu1 %vm331_vm3, %v13530_v45  ;;  %v12323_v45 = vld [vmem:[%s14436_s5 + $0x30] sm:$0xff]  }
 0x4d9   : > { %11312 = vmatprep.mubr.msk.bf16.mxu1 %vm331_vm3, %v13534_v9  ;;  %11340 = vmatprep.subr.bf16.mxu0 %v12323_v45  ;;  %v12324_v9 = vld [vmem:[%s14436_s5 + $0x38] sm:$0xff]  }
 0x4da   : > { %11341 = vmatpush3.bf16.msra.mxu0 %v12323_v45  ;;  %v14492_v45 = vld [vmem:[#allocation38_spill] sm:$0xff] }
 0x4db   : > { %11342 = vmatprep.subr.bf16.mxu0 %v12324_v9 }
 0x4de   : > { %11343 = vmatpush3.bf16.msra.mxu0 %v12324_v9 }
 0x4e0   : > { %11313 = vmatmul.mubr.msk.bf16.gmra.mrb[16].mxu1 %vm331_vm3, %v13542_v18  ;;  %v7306_v18 = vld [vmem:[#allocation3 + $0x10] sm:$0xff] }
 0x4e1   : > { %11316 = vmatprep.mubr.msk.bf16.mxu1 %vm331_vm3, %v13546_v37  ;;  %v7307_v37 = vld [vmem:[#allocation3 + $0x18] sm:$0xff] }
 0x4e8   : > { %11317 = vmatmul.mubr.msk.bf16.gmra.mrb[20].mxu1 %vm331_vm3, %v13554_v63  ;;  %v7322_v63 = vpack.c.bf16 %v7307_v37, %v7306_v18 }
 0x4e9   : > { %11320 = vmatprep.mubr.msk.bf16.mxu1 %vm331_vm3, %v13558_v3  ;;  %v13811_v3 = vld [vmem:[%s14436_s5] sm:$0xff]  }
 0x4ea   : > { %11344 = vmatprep.mubr.msk.bf16.mxu0 %vm412_vm4, %v7322_v63  ;;  %11360 = vmatprep.subr.bf16.mxu0 %v13811_v3  ;;  %v7309_v63 = vld [vmem:[#allocation3 + $0x28] sm:$0xff] }
 0x4f0   : > { %11321 = vmatmul.mubr.msk.bf16.gmra.mrb[24].mxu1 %vm331_vm3, %v13566_v41 }
 0x4f1   : > { %11324 = vmatprep.mubr.msk.bf16.mxu1 %vm331_vm3, %v13570_v38 }
 0x4f8   : > { %11325 = vmatmul.mubr.msk.bf16.gmra.mrb[28].mxu1 %vm331_vm3, %v13578_v26  ;;  %v14484_v26 = vld [vmem:[#allocation30_spill] sm:$0xff] }
 0x4f9   : > { %11328 = vmatprep.mubr.msk.bf16.mxu1 %vm331_vm3, %v14482_v54 }
 0x500   : > { %11329 = vmatmul.mubr.msk.bf16.gmra.mrb[32].mxu1 %vm331_vm3, %v14483_v28 }
 0x501   : > { %11332 = vmatprep.mubr.msk.bf16.mxu1 %vm331_vm3, %v6560_v58 }
 0x508   : > { %11333 = vmatmul.mubr.msk.bf16.gmra.mrb[36].mxu1 %vm331_vm3, %v6561_v29 }
 0x563   : > { %v11274_v41 = vpop.f32.mrb[40].mxu1 }
 0x564   : > { %v6709_v38 = vpop.f32.mrb[41].mxu1  ;;  %v14493_v41 = vld [vmem:[#allocation39_spill] sm:$0xff] }
 0x565   : > { %v11557_v6 = vadd.f32 %v6709_v38, %v14484_v26  ;;  %v11275_v15 = vpop.f32.mrb[42].mxu1 }
 0x566   : > { %v6712_v19 = vpop.f32.mrb[43].mxu1  ;;  %v12326_v15 = vld [vmem:[%s14436_s5 + $0x8] sm:$0xff]  }
 0x567   : > { %v11559_v31 = vadd.f32 %v6712_v19, %v14485_v24  ;;  %v7035_v56 = vadd.f32 %v11557_v6, %v13819_v39 }
 0x569   : > { %v7036_v16 = vadd.f32 %v11559_v31, %v13819_v39  ;;  %v7099_v33 = vmax.f32 %v7035_v56, 0.0 }
 0x56b   : > { %v11278_v46 = vpop.f32.mrb[44].mxu1  ;;  %v7100_v52 = vmax.f32 %v7036_v16, 0.0 }
 0x56c   : > { %v6725_v49 = vpop.f32.mrb[45].mxu1  ;;  %v14494_v46 = vld [vmem:[#allocation40_spill] sm:$0xff] }
 0x56d   : > { %v11561_v62 = vadd.f32 %v6725_v49, %v14486_v8  ;;  %v11279_v2 = vpop.f32.mrb[46].mxu1  ;;  %v12327_v8 = vld [vmem:[%s14436_s5 + $0x10] sm:$0xff]  }
 0x56e   : > { %v6728_v11 = vpop.f32.mrb[47].mxu1 }
 0x56f   : > { %v7039_v17 = vadd.f32 %v11561_v62, %v13819_v39  ;;  %v11563_v27 = vadd.f32 %v6728_v11, %v14487_v23 }
 0x571   : > { %v7103_v40 = vmax.f32 %v7039_v17, 0.0  ;;  %v7040_v47 = vadd.f32 %v11563_v27, %v13819_v39  ;;  %v14495_v27 = vld [vmem:[#allocation41_spill] sm:$0xff] }
 0x573   : > { %v7163_v60 = vmax.f32 %v7099_v33, %v7103_v40  ;;  %v7104_v1 = vmax.f32 %v7040_v47, 0.0  ;;  %v11282_v0 = vpop.f32.mrb[48].mxu1 }
 0x574   : > { %v6741_v14 = vpop.f32.mrb[49].mxu1 }
 0x575   : > { %7195 = vst.msk [vmem:[#allocation5] sm:$0xff] %vm412_vm4, %v7163_v60  ;;  %v7164_v34 = vmax.f32 %v7100_v52, %v7104_v1  ;;  %v11565_v21 = vadd.f32 %v6741_v14, %v14488_v36  ;;  %v11283_v30 = vpop.f32.mrb[50].mxu1  ;;  %v12328_v52 = vld [vmem:[%s14436_s5 + $0x18] sm:$0xff]  }
 0x576   : > { %v6744_v50 = vpop.f32.mrb[51].mxu1 }
 0x577   : > { %7196 = vst.msk [vmem:[#allocation5 + $0x8] sm:$0xff] %vm412_vm4, %v7164_v34  ;;  %v11567_v43 = vadd.f32 %v6744_v50, %v14489_v7  ;;  %v7043_v32 = vadd.f32 %v11565_v21, %v13819_v39  ;;  %v14496_v21 = vld [vmem:[#allocation10_spill] sm:$0xff] }
 0x578   : > { %v13868_v7 = vld [vmem:[%s14436_s5 + $0x40] sm:$0xff]  }
 0x579   : > { %v7044_v42 = vadd.f32 %v11567_v43, %v13819_v39  ;;  %v7107_v22 = vmax.f32 %v7043_v32, 0.0 }
 0x57b   : > { %v11286_v12 = vpop.f32.mrb[52].mxu1  ;;  %v7108_v28 = vmax.f32 %v7044_v42, 0.0 }
 0x57c   : > { %v6757_v35 = vpop.f32.mrb[53].mxu1  ;;  %v7311_v12 = vld [vmem:[#allocation3 + $0x38] sm:$0xff] }
 0x57d   : > { %v11569_v4 = vadd.f32 %v6757_v35, %v14490_v57  ;;  %v11287_v13 = vpop.f32.mrb[54].mxu1  ;;  %v14497_v35 = vld [vmem:[#allocation11_spill] sm:$0xff] }
 0x57e   : > { %v7227_v61 = vld [vmem:[#allocation5] ss:$2 sm:$0xff]  ;;  %v7243_v55 = vld [vmem:[#allocation5 + $0x1] ss:$2 sm:$0xff]  ;;  %v6760_v48 = vpop.f32.mrb[55].mxu1 }
 0x57f   : > { %v7258_v10 = vmax.f32 %v7227_v61, %v7243_v55  ;;  %v7047_v53 = vadd.f32 %v11569_v4, %v13819_v39  ;;  %v11571_v54 = vadd.f32 %v6760_v48, %v14491_v20  ;;  %v14498_v48 = vld [vmem:[#allocation12_spill] sm:$0xff] }
 0x581   : > { %7266 = vst.msk [vmem:[#allocation3 + $0x20] sm:$0xff] %vm412_vm4, %v7258_v10  ;;  %v7111_v51 = vmax.f32 %v7047_v53, 0.0  ;;  %v7048_v58 = vadd.f32 %v11571_v54, %v13819_v39 }
 0x583   : > { %v7167_v25 = vmax.f32 %v7107_v22, %v7111_v51  ;;  %v7112_v59 = vmax.f32 %v7048_v58, 0.0  ;;  %v11290_v5 = vpop.f32.mrb[56].mxu1 }
 0x584   : > { %v6773_v29 = vpop.f32.mrb[57].mxu1 }
 0x585   : > { %7199 = vst.msk [vmem:[#allocation5 + $0x20] sm:$0xff] %vm412_vm4, %v7167_v25  ;;  %v7168_v44 = vmax.f32 %v7108_v28, %v7112_v59  ;;  %v11573_v9 = vadd.f32 %v6773_v29, %v14492_v45  ;;  %v11291_v18 = vpop.f32.mrb[58].mxu1  ;;  %v14499_v28 = vld [vmem:[#allocation13_spill] sm:$0xff] }
 0x586   : > { %v6776_v37 = vpop.f32.mrb[59].mxu1 }
 0x587   : > { %7200 = vst.msk [vmem:[#allocation5 + $0x28] sm:$0xff] %vm412_vm4, %v7168_v44  ;;  %v11575_v38 = vadd.f32 %v6776_v37, %v14493_v41  ;;  %v7051_v31 = vadd.f32 %v11573_v9, %v13819_v39  ;;  %v14500_v41 = vld [vmem:[#allocation14_spill] sm:$0xff] }
 0x588   : > { %v7308_v26 = vld [vmem:[#allocation3 + $0x20] sm:$0xff] }
 0x589   : > { %v13842_v6 = vpack.c.bf16 %v7309_v63, %v7308_v26  ;;  %v7052_v17 = vadd.f32 %v11575_v38, %v13819_v39  ;;  %v7115_v33 = vmax.f32 %v7051_v31, 0.0 }
 0x58b   : > { %v11294_v19 = vpop.f32.mrb[60].mxu1  ;;  %11345 = vmatmul.mubr.msk.bf16.vlgmr.msra.gmra.mrb[192].mxu0 %vm412_vm4, %v13842_v6  ;;  %v7116_v60 = vmax.f32 %v7052_v17, 0.0 }
 0x58c   : > { %v6789_v24 = vpop.f32.mrb[61].mxu1  ;;  %11361 = vmatpush3.bf16.msra.mxu0 %v13811_v3  ;;  %v7313_v19 = vld [vmem:[#allocation3 + $0x48] sm:$0xff] }
 0x58d   : > { %v11577_v49 = vadd.f32 %v6789_v24, %v14494_v46  ;;  %v11295_v56 = vpop.f32.mrb[62].mxu1  ;;  %11362 = vmatprep.subr.bf16.mxu0 %v12326_v15  ;;  %v14501_v24 = vld [vmem:[#allocation15_spill] sm:$0xff] }
 0x58e   : > { %v7229_v62 = vld [vmem:[#allocation5 + $0x20] ss:$2 sm:$0xff]  ;;  %v7245_v2 = vld [vmem:[#allocation5 + $0x21] ss:$2 sm:$0xff]  ;;  %v6792_v11 = vpop.f32.mrb[63].mxu1 }
 0x58f   : > { %v7259_v16 = vmax.f32 %v7229_v62, %v7245_v2  ;;  %v7055_v23 = vadd.f32 %v11577_v49, %v13819_v39  ;;  %v11579_v3 = vadd.f32 %v6792_v11, %v14495_v27  ;;  %v14502_v2 = vld [vmem:[#allocation16_spill] sm:$0xff] }
 0x590   : > { %11363 = vmatpush3.bf16.msra.mxu0 %v12326_v15 }
 0x591   : > { %7267 = vst.msk [vmem:[#allocation3 + $0x30] sm:$0xff] %vm412_vm4, %v7259_v16  ;;  %v7119_v40 = vmax.f32 %v7055_v23, 0.0  ;;  %v7056_v47 = vadd.f32 %v11579_v3, %v13819_v39  ;;  %11364 = vmatprep.subr.bf16.mxu0 %v12327_v8 }
 0x593   : > { %v7171_v1 = vmax.f32 %v7115_v33, %v7119_v40  ;;  %v7120_v0 = vmax.f32 %v7056_v47, 0.0  ;;  %v11298_v14 = vpop.f32.mrb[0].mxu1  ;;  %v14503_v47 = vld [vmem:[#allocation17_spill] sm:$0xff] }
 0x594   : > { %v6805_v34 = vpop.f32.mrb[1].mxu1  ;;  %11365 = vmatpush3.bf16.msra.mxu0 %v12327_v8 }
 0x595   : > { %7203 = vst.msk [vmem:[#allocation5 + $0x40] sm:$0xff] %vm412_vm4, %v7171_v1  ;;  %v7172_v36 = vmax.f32 %v7116_v60, %v7120_v0  ;;  %v11581_v30 = vadd.f32 %v6805_v34, %v14496_v21  ;;  %v11299_v50 = vpop.f32.mrb[2].mxu1  ;;  %11366 = vmatprep.subr.bf16.mxu0 %v12328_v52 }
 0x596   : > { %v6808_v43 = vpop.f32.mrb[3].mxu1 }
 0x597   : > { %7204 = vst.msk [vmem:[#allocation5 + $0x48] sm:$0xff] %vm412_vm4, %v7172_v36  ;;  %v11583_v32 = vadd.f32 %v6808_v43, %v14497_v35  ;;  %v7059_v55 = vadd.f32 %v11581_v30, %v13819_v39  ;;  %v14504_v43 = vld [vmem:[#allocation18_spill] sm:$0xff] }
 0x598   : > { %v7310_v57 = vld [vmem:[#allocation3 + $0x30] sm:$0xff]  ;;  %11367 = vmatpush3.bf16.msra.mxu0 %v12328_v52 }
 0x599   : > { %v13872_v4 = vpack.c.bf16 %v7311_v12, %v7310_v57  ;;  %11384 = vmatprep.subr.bf16.mxu0 %v13868_v7  ;;  %v7060_v51 = vadd.f32 %v11583_v32, %v13819_v39  ;;  %v7123_v59 = vmax.f32 %v7059_v55, 0.0  ;;  %v7315_v57 = vld [vmem:[#allocation3 + $0x58] sm:$0xff] }
 0x59b   : > { %v11302_v13 = vpop.f32.mrb[4].mxu1  ;;  %11348 = vmatprep.mubr.msk.bf16.mxu0 %vm412_vm4, %v13872_v4  ;;  %v7124_v44 = vmax.f32 %v7060_v51, 0.0 }
 0x59c   : > { %v6821_v61 = vpop.f32.mrb[5].mxu1  ;;  %v14505_v13 = vld [vmem:[#allocation19_spill] sm:$0xff] }
 0x59d   : > { %v11585_v10 = vadd.f32 %v6821_v61, %v14498_v48  ;;  %v11303_v42 = vpop.f32.mrb[6].mxu1 }
 0x59e   : > { %v7231_v53 = vld [vmem:[#allocation5 + $0x40] ss:$2 sm:$0xff]  ;;  %v7247_v20 = vld [vmem:[#allocation5 + $0x41] ss:$2 sm:$0xff]  ;;  %v6824_v54 = vpop.f32.mrb[7].mxu1 }
 0x59f   : > { %v7260_v22 = vmax.f32 %v7231_v53, %v7247_v20  ;;  %v7063_v58 = vadd.f32 %v11585_v10, %v13819_v39  ;;  %v11587_v25 = vadd.f32 %v6824_v54, %v14499_v28  ;;  %v14506_v20 = vld [vmem:[#allocation20_spill] sm:$0xff] }
 0x5a1   : > { %7268 = vst.msk [vmem:[#allocation3 + $0x40] sm:$0xff] %vm412_vm4, %v7260_v22  ;;  %v7127_v5 = vmax.f32 %v7063_v58, 0.0  ;;  %v7064_v29 = vadd.f32 %v11587_v25, %v13819_v39 }
 0x5a3   : > { %v7175_v45 = vmax.f32 %v7123_v59, %v7127_v5  ;;  %v7128_v9 = vmax.f32 %v7064_v29, 0.0  ;;  %v11306_v18 = vpop.f32.mrb[8].mxu1  ;;  %v14507_v29 = vld [vmem:[#allocation21_spill] sm:$0xff] }
 0x5a4   : > { %v6837_v37 = vpop.f32.mrb[9].mxu1 }
 0x5a5   : > { %7207 = vst.msk [vmem:[#allocation5 + $0x60] sm:$0xff] %vm412_vm4, %v7175_v45  ;;  %v7176_v63 = vmax.f32 %v7124_v44, %v7128_v9  ;;  %v11589_v38 = vadd.f32 %v6837_v37, %v14500_v41  ;;  %v11307_v26 = vpop.f32.mrb[10].mxu1 }
 0x5a6   : > { %v6840_v15 = vpop.f32.mrb[11].mxu1 }
 0x5a7   : > { %7208 = vst.msk [vmem:[#allocation5 + $0x68] sm:$0xff] %vm412_vm4, %v7176_v63  ;;  %v11591_v31 = vadd.f32 %v6840_v15, %v14501_v24  ;;  %v7067_v62 = vadd.f32 %v11589_v38, %v13819_v39 }
 0x5a8   : > { %v7312_v46 = vld [vmem:[#allocation3 + $0x40] sm:$0xff] }
 0x5a9   : > { %v13888_v49 = vpack.c.bf16 %v7313_v19, %v7312_v46  ;;  %v7068_v33 = vadd.f32 %v11591_v31, %v13819_v39  ;;  %v7131_v60 = vmax.f32 %v7067_v62, 0.0  ;;  %v14508_v19 = vld [vmem:[#allocation22_spill] sm:$0xff] }
 0x5ab   : > { %v11310_v56 = vpop.f32.mrb[12].mxu1  ;;  %11349 = vmatmul.mubr.msk.bf16.gmra.mrb[196].mxu0 %vm412_vm4, %v13888_v49  ;;  %v7132_v14 = vmax.f32 %v7068_v33, 0.0 }
 0x5ac   : > { %v6853_v8 = vpop.f32.mrb[13].mxu1  ;;  %v7317_v56 = vld [vmem:[#allocation3 + $0x68] sm:$0xff] }
 0x5ad   : > { %v11593_v11 = vadd.f32 %v6853_v8, %v14502_v2  ;;  %v11311_v16 = vpop.f32.mrb[14].mxu1  ;;  %v14509_v8 = vld [vmem:[#allocation23_spill] sm:$0xff] }
 0x5ae   : > { %v7233_v17 = vld [vmem:[#allocation5 + $0x60] ss:$2 sm:$0xff]  ;;  %v7249_v23 = vld [vmem:[#allocation5 + $0x61] ss:$2 sm:$0xff]  ;;  %v6856_v27 = vpop.f32.mrb[15].mxu1 }
 0x5af   : > { %v7261_v3 = vmax.f32 %v7233_v17, %v7249_v23  ;;  %v7071_v40 = vadd.f32 %v11593_v11, %v13819_v39  ;;  %v11595_v52 = vadd.f32 %v6856_v27, %v14503_v47  ;;  %v14510_v27 = vld [vmem:[#allocation24_spill] sm:$0xff] }
 0x5b1   : > { %7269 = vst.msk [vmem:[#allocation3 + $0x50] sm:$0xff] %vm412_vm4, %v7261_v3  ;;  %v7135_v1 = vmax.f32 %v7071_v40, 0.0  ;;  %v7072_v0 = vadd.f32 %v11595_v52, %v13819_v39 }
 0x5b3   : > { %v7179_v34 = vmax.f32 %v7131_v60, %v7135_v1  ;;  %v7136_v36 = vmax.f32 %v7072_v0, 0.0  ;;  %v11314_v21 = vpop.f32.mrb[16].mxu1 }
 0x5b4   : > { %v6869_v30 = vpop.f32.mrb[17].mxu1 }
 0x5b5   : > { %7211 = vst.msk [vmem:[#allocation5 + $0x80] sm:$0xff] %vm412_vm4, %v7179_v34  ;;  %v7180_v50 = vmax.f32 %v7132_v14, %v7136_v36  ;;  %v11597_v12 = vadd.f32 %v6869_v30, %v14504_v43  ;;  %v11315_v35 = vpop.f32.mrb[18].mxu1  ;;  %v14511_v14 = vld [vmem:[#allocation25_spill] sm:$0xff] }
 0x5b6   : > { %v6872_v32 = vpop.f32.mrb[19].mxu1 }
 0x5b7   : > { %7212 = vst.msk [vmem:[#allocation5 + $0x88] sm:$0xff] %vm412_vm4, %v7180_v50  ;;  %v11599_v61 = vadd.f32 %v6872_v32, %v14505_v13  ;;  %v7075_v53 = vadd.f32 %v11597_v12, %v13819_v39  ;;  %v14512_v13 = vld [vmem:[#allocation26_spill] sm:$0xff] }
 0x5b8   : > { %v7314_v55 = vld [vmem:[#allocation3 + $0x50] sm:$0xff] }
 0x5b9   : > { %v13903_v48 = vpack.c.bf16 %v7315_v57, %v7314_v55  ;;  %v7076_v59 = vadd.f32 %v11599_v61, %v13819_v39  ;;  %v7139_v45 = vmax.f32 %v7075_v53, 0.0  ;;  %v14513_v53 = vld [vmem:[#allocation27_spill] sm:$0xff] }
 0x5bb   : > { %v11318_v10 = vpop.f32.mrb[20].mxu1  ;;  %11352 = vmatprep.mubr.msk.bf16.mxu0 %vm412_vm4, %v13903_v48  ;;  %v7140_v37 = vmax.f32 %v7076_v59, 0.0 }
 0x5bc   : > { %v6885_v42 = vpop.f32.mrb[21].mxu1 }
 0x5bd   : > { %v11601_v54 = vadd.f32 %v6885_v42, %v14506_v20  ;;  %v11319_v22 = vpop.f32.mrb[22].mxu1  ;;  %v7319_v42 = vld [vmem:[#allocation3 + $0x78] sm:$0xff] }
 0x5be   : > { %v7235_v51 = vld [vmem:[#allocation5 + $0x80] ss:$2 sm:$0xff]  ;;  %v7251_v58 = vld [vmem:[#allocation5 + $0x81] ss:$2 sm:$0xff]  ;;  %v6888_v28 = vpop.f32.mrb[23].mxu1 }
 0x5bf   : > { %v7262_v25 = vmax.f32 %v7235_v51, %v7251_v58  ;;  %v7079_v5 = vadd.f32 %v11601_v54, %v13819_v39  ;;  %v11603_v44 = vadd.f32 %v6888_v28, %v14507_v29 }
 0x5c1   : > { %7270 = vst.msk [vmem:[#allocation3 + $0x60] sm:$0xff] %vm412_vm4, %v7262_v25  ;;  %v7143_v9 = vmax.f32 %v7079_v5, 0.0  ;;  %v7080_v18 = vadd.f32 %v11603_v44, %v13819_v39  ;;  %v14514_v25 = vld [vmem:[#allocation28_spill] sm:$0xff] }
 0x5c3   : > { %v7183_v63 = vmax.f32 %v7139_v45, %v7143_v9  ;;  %v7144_v41 = vmax.f32 %v7080_v18, 0.0  ;;  %v11322_v38 = vpop.f32.mrb[24].mxu1 }
 0x5c4   : > { %v6901_v26 = vpop.f32.mrb[25].mxu1 }
 0x5c5   : > { %7215 = vst.msk [vmem:[#allocation5 + $0xa0] sm:$0xff] %vm412_vm4, %v7183_v63  ;;  %v7184_v15 = vmax.f32 %v7140_v37, %v7144_v41  ;;  %v11605_v24 = vadd.f32 %v6901_v26, %v14508_v19  ;;  %v11323_v31 = vpop.f32.mrb[26].mxu1  ;;  %v14515_v63 = vld [vmem:[#allocation29_spill] sm:$0xff] }
 0x5c6   : > { %v6904_v46 = vpop.f32.mrb[27].mxu1 }
 0x5c7   : > { %7216 = vst.msk [vmem:[#allocation5 + $0xa8] sm:$0xff] %vm412_vm4, %v7184_v15  ;;  %v11607_v62 = vadd.f32 %v6904_v46, %v14509_v8  ;;  %v7083_v23 = vadd.f32 %v11605_v24, %v13819_v39  ;;  %v7275_v8 = vld [vmem:[#allocation3 + $0x17] sm:$0xff] }
 0x5c8   : > { %v7316_v2 = vld [vmem:[#allocation3 + $0x60] sm:$0xff] }
 0x5c9   : > { %v13918_v11 = vpack.c.bf16 %v7317_v56, %v7316_v2  ;;  %v7084_v1 = vadd.f32 %v11607_v62, %v13819_v39  ;;  %v7147_v36 = vmax.f32 %v7083_v23, 0.0  ;;  %v7274_v56 = vld [vmem:[#allocation3 + $0xf] sm:$0xff] }
 0x5ca   : > { %v7321_v62 = vld [vmem:[#allocation3 + $0x88] sm:$0xff] }
 0x5cb   : > { %v11326_v16 = vpop.f32.mrb[28].mxu1  ;;  %11353 = vmatmul.mubr.msk.bf16.gmra.mrb[200].mxu0 %vm412_vm4, %v13918_v11  ;;  %v7148_v50 = vmax.f32 %v7084_v1, 0.0 }
 0x5cc   : > { %v6917_v17 = vpop.f32.mrb[29].mxu1  ;;  %v7290_v16 = vpack.c.bf16 %v7275_v8, %v7274_v56 }
 0x5cd   : > { %v11609_v3 = vadd.f32 %v6917_v17, %v14510_v27  ;;  %v11327_v33 = vpop.f32.mrb[30].mxu1 }
 0x5ce   : > { %v7237_v40 = vld [vmem:[#allocation5 + $0xa0] ss:$2 sm:$0xff]  ;;  %v7253_v47 = vld [vmem:[#allocation5 + $0xa1] ss:$2 sm:$0xff]  ;;  %v6920_v52 = vpop.f32.mrb[31].mxu1 }
 0x5cf   : > { %v7263_v60 = vmax.f32 %v7237_v40, %v7253_v47  ;;  %v7087_v0 = vadd.f32 %v11609_v3, %v13819_v39  ;;  %v11611_v34 = vadd.f32 %v6920_v52, %v14511_v14  ;;  %v7277_v3 = vld [vmem:[#allocation3 + $0x27] sm:$0xff]  ;;  %v7278_v40 = vld [vmem:[#allocation3 + $0x2f] sm:$0xff]  ;;  %v7279_v47 = vld [vmem:[#allocation3 + $0x37] sm:$0xff] }
 0x5d0   : > { %v13957_v1 = vpack.c.bf16 %v7279_v47, %v7278_v40  ;;  %v7280_v14 = vld [vmem:[#allocation3 + $0x3f] sm:$0xff]  ;;  %v12342_v47 = vld [vmem:[%s14436_s5 + $0xa8] sm:$0xff]  }
 0x5d1   : > { %7271 = vst.msk [vmem:[#allocation3 + $0x70] sm:$0xff] %vm412_vm4, %v7263_v60  ;;  %v7151_v21 = vmax.f32 %v7087_v0, 0.0  ;;  %v7088_v30 = vadd.f32 %v11611_v34, %v13819_v39  ;;  %v12330_v60 = vld [vmem:[%s14436_s5 + $0x48] sm:$0xff]   ;;  %v12331_v0 = vld [vmem:[%s14436_s5 + $0x50] sm:$0xff]  }
 0x5d2   : > { %v7281_v34 = vld [vmem:[#allocation3 + $0x47] sm:$0xff] }
 0x5d3   : > { %v7187_v43 = vmax.f32 %v7147_v36, %v7151_v21  ;;  %v7152_v12 = vmax.f32 %v7088_v30, 0.0  ;;  %v11330_v35 = vpop.f32.mrb[32].mxu1  ;;  %v7282_v36 = vld [vmem:[#allocation3 + $0x4f] sm:$0xff]  ;;  %v7283_v21 = vld [vmem:[#allocation3 + $0x57] sm:$0xff]  ;;  %v13967_v30 = vpack.c.bf16 %v7281_v34, %v7280_v14 }
 0x5d4   : > { %v6933_v32 = vpop.f32.mrb[33].mxu1  ;;  %v7285_v35 = vld [vmem:[#allocation3 + $0x67] sm:$0xff]  ;;  %v12347_v34 = vld [vmem:[%s14436_s5 + $0xd0] sm:$0xff]  }
 0x5d5   : > { %7219 = vst.msk [vmem:[#allocation5 + $0xc0] sm:$0xff] %vm412_vm4, %v7187_v43  ;;  %v7188_v57 = vmax.f32 %v7148_v50, %v7152_v12  ;;  %v11613_v61 = vadd.f32 %v6933_v32, %v14512_v13  ;;  %v11331_v55 = vpop.f32.mrb[34].mxu1  ;;  %v13972_v50 = vpack.c.bf16 %v7283_v21, %v7282_v36  ;;  %v12333_v43 = vld [vmem:[%s14436_s5 + $0x60] sm:$0xff]   ;;  %v12346_v14 = vld [vmem:[%s14436_s5 + $0xc8] sm:$0xff]   ;;  %v12348_v36 = vld [vmem:[%s14436_s5 + $0xd8] sm:$0xff]  }
 0x5d6   : > { %v6936_v10 = vpop.f32.mrb[35].mxu1  ;;  %v7284_v12 = vld [vmem:[#allocation3 + $0x5f] sm:$0xff] }
 0x5d7   : > { %7220 = vst.msk [vmem:[#allocation5 + $0xc8] sm:$0xff] %vm412_vm4, %v7188_v57  ;;  %v11615_v20 = vadd.f32 %v6936_v10, %v14513_v53  ;;  %v7091_v28 = vadd.f32 %v11613_v61, %v13819_v39  ;;  %v13981_v13 = vpack.c.bf16 %v7285_v35, %v7284_v12  ;;  %v7630_v53 = vld [vmem:[#allocation3 + $0x19] sm:$0xff]  ;;  %v12350_v35 = vld [vmem:[%s14436_s5 + $0xe8] sm:$0xff]  }
 0x5d8   : > { %v7318_v54 = vld [vmem:[#allocation3 + $0x70] sm:$0xff]  ;;  %v12349_v21 = vld [vmem:[%s14436_s5 + $0xe0] sm:$0xff]  }
 0x5d9   : > { %v13933_v22 = vpack.c.bf16 %v7319_v42, %v7318_v54  ;;  %v7092_v18 = vadd.f32 %v11615_v20, %v13819_v39  ;;  %v7155_v38 = vmax.f32 %v7091_v28, 0.0  ;;  %v7286_v32 = vld [vmem:[#allocation3 + $0x6f] sm:$0xff]  ;;  %v7287_v57 = vld [vmem:[#allocation3 + $0x77] sm:$0xff]  ;;  %v7631_v28 = vld [vmem:[#allocation3 + $0x21] sm:$0xff] }
 0x5da   : > { %v13983_v61 = vpack.c.bf16 %v7287_v57, %v7286_v32  ;;  %v7629_v42 = vld [vmem:[#allocation3 + $0x11] sm:$0xff]  ;;  %v8420_v57 = vld [vmem:[#allocation3 + $0xa7] sm:$0xff] }
 0x5db   : > { %v11334_v51 = vpop.f32.mrb[36].mxu1  ;;  %11356 = vmatprep.mubr.msk.bf16.mxu0 %vm412_vm4, %v13933_v22  ;;  %v7156_v19 = vmax.f32 %v7092_v18, 0.0  ;;  %v7645_v54 = vpack.c.bf16 %v7630_v53, %v7629_v42  ;;  %v7635_v18 = vld [vmem:[#allocation3 + $0x41] sm:$0xff]  ;;  %v12351_v32 = vld [vmem:[%s14436_s5 + $0xf0] sm:$0xff]  }
 0x5dc   : > { %v6949_v58 = vpop.f32.mrb[37].mxu1  ;;  %v7632_v51 = vld [vmem:[#allocation3 + $0x29] sm:$0xff]  ;;  %v8601_v42 = vld [vmem:[#allocation3 + $0x40] sm:$0xff] }
 0x5dd   : > { %v11617_v59 = vadd.f32 %v6949_v58, %v14514_v25  ;;  %v11335_v5 = vpop.f32.mrb[38].mxu1  ;;  %v7634_v58 = vld [vmem:[#allocation3 + $0x39] sm:$0xff]  ;;  %v13994_v25 = vpack.c.bf16 %v7632_v51, %v7631_v28  ;;  %v8602_v53 = vld [vmem:[#allocation3 + $0x48] sm:$0xff]  ;;  %v12355_v51 = vld [vmem:[%s14436_s5 + $0x110] sm:$0xff]  }
 0x5de   : > { %v7239_v29 = vld [vmem:[#allocation5 + $0xc0] ss:$2 sm:$0xff]  ;;  %v7255_v44 = vld [vmem:[#allocation5 + $0xc1] ss:$2 sm:$0xff]  ;;  %v6952_v45 = vpop.f32.mrb[39].mxu1 }
 0x5df   : > { %v7264_v9 = vmax.f32 %v7239_v29, %v7255_v44  ;;  %v7095_v37 = vadd.f32 %v11617_v59, %v13819_v39  ;;  %v11619_v41 = vadd.f32 %v6952_v45, %v14515_v63  ;;  %v7633_v59 = vld [vmem:[#allocation3 + $0x31] sm:$0xff]  ;;  %v12334_v5 = vld [vmem:[%s14436_s5 + $0x68] sm:$0xff]  }
 0x5e0   : > { %v13999_v29 = vpack.c.bf16 %v7634_v58, %v7633_v59  ;;  %v12335_v44 = vld [vmem:[%s14436_s5 + $0x70] sm:$0xff]   ;;  %v12356_v58 = vld [vmem:[%s14436_s5 + $0x118] sm:$0xff]   ;;  %v8614_v28 = vld [vmem:[#allocation3 + $0xa8] sm:$0xff] }
 0x5e1   : > { %7272 = vst.msk [vmem:[#allocation3 + $0x80] sm:$0xff] %vm412_vm4, %v7264_v9  ;;  %v7159_v26 = vmax.f32 %v7095_v37, 0.0  ;;  %v7096_v15 = vadd.f32 %v11619_v41, %v13819_v39  ;;  %v7276_v39 = vld [vmem:[#allocation3 + $0x1f] sm:$0xff]  ;;  %v7636_v45 = vld [vmem:[#allocation3 + $0x49] sm:$0xff]  ;;  %v7637_v63 = vld [vmem:[#allocation3 + $0x51] sm:$0xff] }
 0x5e2   : > { %v13952_v52 = vpack.c.bf16 %v7277_v3, %v7276_v39  ;;  %v7638_v9 = vld [vmem:[#allocation3 + $0x59] sm:$0xff]  ;;  %v14008_v37 = vpack.c.bf16 %v7636_v45, %v7635_v18  ;;  %v12339_v39 = vld [vmem:[%s14436_s5 + $0x90] sm:$0xff]  }
 0x5e3   : > { %v7191_v24 = vmax.f32 %v7155_v38, %v7159_v26  ;;  %v7160_v31 = vmax.f32 %v7096_v15, 0.0  ;;  %v12336_v41 = vld [vmem:[%s14436_s5 + $0x78] sm:$0xff]   ;;  %v14013_v38 = vpack.c.bf16 %v7638_v9, %v7637_v63  ;;  %v12337_v26 = vld [vmem:[%s14436_s5 + $0x80] sm:$0xff]   ;;  %v7640_v15 = vld [vmem:[#allocation3 + $0x69] sm:$0xff] }
 0x5e4   : > { %v14187_v59 = vld [vmem:[%s14437_s6] ss:$0 sm:$0xff] }
 0x5e5   : > { %7223 = vst.msk [vmem:[#allocation5 + $0xe0] sm:$0xff] %vm412_vm4, %v7191_v24  ;;  %v7192_v46 = vmax.f32 %v7156_v19, %v7160_v31  ;;  %v7639_v24 = vld [vmem:[#allocation3 + $0x61] sm:$0xff] }
 0x5e6   : > { %v14022_v31 = vpack.c.bf16 %v7640_v15, %v7639_v24 }
 0x5e7   : > { %7224 = vst.msk [vmem:[#allocation5 + $0xe8] sm:$0xff] %vm412_vm4, %v7192_v46  ;;  %v7641_v46 = vld [vmem:[#allocation3 + $0x71] sm:$0xff] }
 0x5e8   : > { %v7320_v2 = vld [vmem:[#allocation3 + $0x80] sm:$0xff] }
 0x5e9   : > { %v13946_v17 = vpack.c.bf16 %v7321_v62, %v7320_v2  ;;  %v7288_v55 = vld [vmem:[#allocation3 + $0x7f] sm:$0xff]  ;;  %v7289_v10 = vld [vmem:[#allocation3 + $0x87] sm:$0xff] }
 0x5ea   : > { %v13989_v20 = vpack.c.bf16 %v7289_v10, %v7288_v55  ;;  %v7642_v19 = vld [vmem:[#allocation3 + $0x79] sm:$0xff]  ;;  %v7643_v62 = vld [vmem:[#allocation3 + $0x81] sm:$0xff]  ;;  %v8599_v55 = vld [vmem:[#allocation3 + $0x30] sm:$0xff] }
 0x5eb   : > { %11357 = vmatmul.mubr.msk.bf16.gmra.mrb[204].mxu0 %vm412_vm4, %v13946_v17  ;;  %v14024_v56 = vpack.c.bf16 %v7642_v19, %v7641_v46  ;;  %v8600_v10 = vld [vmem:[#allocation3 + $0x38] sm:$0xff] }
 0x5ec   : > { %11368 = vmatprep.mubr.msk.bf16.mxu0 %vm412_vm4, %v7290_v16  ;;  %v12338_v16 = vld [vmem:[%s14436_s5 + $0x88] sm:$0xff]  }
 0x5ee   : > { %v7241_v23 = vld [vmem:[#allocation5 + $0xe0] ss:$2 sm:$0xff]  ;;  %v7257_v27 = vld [vmem:[#allocation5 + $0xe1] ss:$2 sm:$0xff] }
 0x5ef   : > { %v7265_v33 = vmax.f32 %v7241_v23, %v7257_v27  ;;  %v12340_v23 = vld [vmem:[%s14436_s5 + $0x98] sm:$0xff]   ;;  %v12341_v27 = vld [vmem:[%s14436_s5 + $0xa0] sm:$0xff]  }
 0x5f1   : > { %7273 = vst.msk [vmem:[#allocation3 + $0x90] sm:$0xff] %vm412_vm4, %v7265_v33 }
 0x5f3   : > { %11369 = vmatmul.mubr.msk.bf16.vlgmr.msra.gmra.mrb[192].mxu0 %vm412_vm4, %v13952_v52 }
 0x5f4   : > { %11385 = vmatpush3.bf16.msra.mxu0 %v13868_v7  ;;  %11372 = vmatprep.mubr.msk.bf16.mxu0 %vm412_vm4, %v13957_v1  ;;  %v12332_v7 = vld [vmem:[%s14436_s5 + $0x58] sm:$0xff]  }
 0x5f5   : > { %11386 = vmatprep.subr.bf16.mxu0 %v12330_v60 }
 0x5f8   : > { %11387 = vmatpush3.bf16.msra.mxu0 %v12330_v60  ;;  %v7644_v8 = vld [vmem:[#allocation3 + $0x89] sm:$0xff]  ;;  %v7838_v33 = vld [vmem:[#allocation3 + $0x97] sm:$0xff] }
 0x5f9   : > { %11388 = vmatprep.subr.bf16.mxu0 %v12331_v0  ;;  %v14030_v2 = vpack.c.bf16 %v7644_v8, %v7643_v62  ;;  %v7837_v3 = vld [vmem:[#allocation3 + $0x8f] sm:$0xff]  ;;  %v8032_v60 = vld [vmem:[#allocation3 + $0x98] sm:$0xff] }
 0x5fa   : > { %v14060_v40 = vpack.c.bf16 %v7838_v33, %v7837_v3 }
 0x5fb   : > { %11373 = vmatmul.mubr.msk.bf16.gmra.mrb[196].mxu0 %vm412_vm4, %v13967_v30 }
 0x5fc   : > { %11376 = vmatprep.mubr.msk.bf16.mxu0 %vm412_vm4, %v13972_v50  ;;  %11389 = vmatpush3.bf16.msra.mxu0 %v12331_v0 }
 0x5fd   : > { %11390 = vmatprep.subr.bf16.mxu0 %v12332_v7 }
 0x600   : > { %11391 = vmatpush3.bf16.msra.mxu0 %v12332_v7  ;;  %v8225_v7 = vld [vmem:[#allocation3 + $0x91] sm:$0xff] }
 0x601   : > { %11408 = vmatprep.subr.bf16.mxu0 %v12333_v43 }
 0x603   : > { %11377 = vmatmul.mubr.msk.bf16.gmra.mrb[200].mxu0 %vm412_vm4, %v13981_v13 }
 0x604   : > { %11380 = vmatprep.mubr.msk.bf16.mxu0 %vm412_vm4, %v13983_v61 }
 0x60b   : > { %11381 = vmatmul.mubr.msk.bf16.gmra.mrb[204].mxu0 %vm412_vm4, %v13989_v20 }
 0x60c   : > { %11392 = vmatprep.mubr.msk.bf16.mxu0 %vm412_vm4, %v7645_v54  ;;  %v8616_v54 = vpack.c.bf16 %v8602_v53, %v8601_v42 }
 0x613   : > { %11393 = vmatmul.mubr.msk.bf16.vlgmr.msra.gmra.mrb[192].mxu0 %vm412_vm4, %v13994_v25 }
 0x614   : > { %11409 = vmatpush3.bf16.msra.mxu0 %v12333_v43  ;;  %11396 = vmatprep.mubr.msk.bf16.mxu0 %vm412_vm4, %v13999_v29  ;;  %v8226_v43 = vld [vmem:[#allocation3 + $0x99] sm:$0xff] }
 0x615   : > { %11410 = vmatprep.subr.bf16.mxu0 %v12334_v5  ;;  %v8234_v12 = vpack.c.bf16 %v8226_v43, %v8225_v7 }
 0x618   : > { %11411 = vmatpush3.bf16.msra.mxu0 %v12334_v5 }
 0x619   : > { %11412 = vmatprep.subr.bf16.mxu0 %v12335_v44 }
 0x61b   : > { %11397 = vmatmul.mubr.msk.bf16.gmra.mrb[196].mxu0 %vm412_vm4, %v14008_v37 }
 0x61c   : > { %11400 = vmatprep.mubr.msk.bf16.mxu0 %vm412_vm4, %v14013_v38  ;;  %11413 = vmatpush3.bf16.msra.mxu0 %v12335_v44 }
 0x61d   : > { %11414 = vmatprep.subr.bf16.mxu0 %v12336_v41 }
 0x620   : > { %11415 = vmatpush3.bf16.msra.mxu0 %v12336_v41 }
 0x621   : > { %11432 = vmatprep.subr.bf16.mxu0 %v12337_v26 }
 0x623   : > { %11401 = vmatmul.mubr.msk.bf16.gmra.mrb[200].mxu0 %vm412_vm4, %v14022_v31 }
 0x624   : > { %11404 = vmatprep.mubr.msk.bf16.mxu0 %vm412_vm4, %v14024_v56 }
 0x62b   : > { %11405 = vmatmul.mubr.msk.bf16.gmra.mrb[204].mxu0 %vm412_vm4, %v14030_v2 }
 0x62c   : > { %11416 = vmatprep.mubr.msk.bf16.mxu0 %vm412_vm4, %v13952_v52  ;;  %v12343_v52 = vld [vmem:[%s14436_s5 + $0xb0] sm:$0xff]  }
 0x633   : > { %11417 = vmatmul.mubr.msk.bf16.vlgmr.msra.gmra.mrb[192].mxu0 %vm412_vm4, %v13957_v1 }
 0x634   : > { %11433 = vmatpush3.bf16.msra.mxu0 %v12337_v26  ;;  %11420 = vmatprep.mubr.msk.bf16.mxu0 %vm412_vm4, %v13967_v30 }
 0x635   : > { %11434 = vmatprep.subr.bf16.mxu0 %v12338_v16 }
 0x638   : > { %11435 = vmatpush3.bf16.msra.mxu0 %v12338_v16 }
 0x639   : > { %11436 = vmatprep.subr.bf16.mxu0 %v12339_v39 }
 0x63b   : > { %11421 = vmatmul.mubr.msk.bf16.gmra.mrb[196].mxu0 %vm412_vm4, %v13972_v50 }
 0x63c   : > { %11424 = vmatprep.mubr.msk.bf16.mxu0 %vm412_vm4, %v13981_v13  ;;  %11437 = vmatpush3.bf16.msra.mxu0 %v12339_v39 }
 0x63d   : > { %11438 = vmatprep.subr.bf16.mxu0 %v12340_v23 }
 0x640   : > { %11439 = vmatpush3.bf16.msra.mxu0 %v12340_v23 }
 0x641   : > { %11456 = vmatprep.subr.bf16.mxu0 %v12341_v27 }
 0x643   : > { %11425 = vmatmul.mubr.msk.bf16.gmra.mrb[200].mxu0 %vm412_vm4, %v13983_v61 }
 0x644   : > { %11428 = vmatprep.mubr.msk.bf16.mxu0 %vm412_vm4, %v13989_v20 }
 0x64b   : > { %11429 = vmatmul.mubr.msk.bf16.gmra.mrb[204].mxu0 %vm412_vm4, %v14060_v40 }
 0x64c   : > { %11440 = vmatprep.mubr.msk.bf16.mxu0 %vm412_vm4, %v13842_v6  ;;  %v12344_v6 = vld [vmem:[%s14436_s5 + $0xb8] sm:$0xff]  }
 0x653   : > { %11441 = vmatmul.mubr.msk.bf16.vlgmr.msra.gmra.mrb[192].mxu0 %vm412_vm4, %v13872_v4  ;;  %v12345_v4 = vld [vmem:[%s14436_s5 + $0xc0] sm:$0xff]  }
 0x654   : > { %11457 = vmatpush3.bf16.msra.mxu0 %v12341_v27  ;;  %11444 = vmatprep.mubr.msk.bf16.mxu0 %vm412_vm4, %v13888_v49  ;;  %v8031_v49 = vld [vmem:[#allocation3 + $0x90] sm:$0xff] }
 0x655   : > { %11458 = vmatprep.subr.bf16.mxu0 %v12342_v47  ;;  %v14090_v0 = vpack.c.bf16 %v8032_v60, %v8031_v49 }
 0x658   : > { %11459 = vmatpush3.bf16.msra.mxu0 %v12342_v47  ;;  %v9061_v47 = vlaneseq }
 0x659   : > { %11460 = vmatprep.subr.bf16.mxu0 %v12343_v52 }
 0x65b   : > { %11445 = vmatmul.mubr.msk.bf16.gmra.mrb[196].mxu0 %vm412_vm4, %v13903_v48 }
 0x65c   : > { %11448 = vmatprep.mubr.msk.bf16.mxu0 %vm412_vm4, %v13918_v11  ;;  %11461 = vmatpush3.bf16.msra.mxu0 %v12343_v52 }
 0x65d   : > { %11462 = vmatprep.subr.bf16.mxu0 %v12344_v6 }
 0x660   : > { %11463 = vmatpush3.bf16.msra.mxu0 %v12344_v6 }
 0x661   : > { %11480 = vmatprep.subr.bf16.mxu0 %v12345_v4 }
 0x663   : > { %11449 = vmatmul.mubr.msk.bf16.gmra.mrb[200].mxu0 %vm412_vm4, %v13933_v22 }
 0x664   : > { %11452 = vmatprep.mubr.msk.bf16.mxu0 %vm412_vm4, %v13946_v17 }
 0x66b   : > { %11453 = vmatmul.mubr.msk.bf16.gmra.mrb[204].mxu0 %vm412_vm4, %v14090_v0 }
 0x66c   : > { %11464 = vmatprep.mubr.msk.bf16.mxu0 %vm412_vm4, %v13994_v25 }
 0x673   : > { %11465 = vmatmul.mubr.msk.bf16.vlgmr.msra.gmra.mrb[192].mxu0 %vm412_vm4, %v13999_v29 }
 0x674   : > { %11481 = vmatpush3.bf16.msra.mxu0 %v12345_v4  ;;  %11468 = vmatprep.mubr.msk.bf16.mxu0 %vm412_vm4, %v14008_v37 }
 0x675   : > { %11482 = vmatprep.subr.bf16.mxu0 %v12346_v14 }
 0x678   : > { %11483 = vmatpush3.bf16.msra.mxu0 %v12346_v14  ;;  %v9062_v14 = vshrl.u32 %v9061_v47, 7 }
 0x679   : > { %11484 = vmatprep.subr.bf16.mxu0 %v12347_v34 }
 0x67b   : > { %11469 = vmatmul.mubr.msk.bf16.gmra.mrb[196].mxu0 %vm412_vm4, %v14013_v38 }
 0x67c   : > { %11472 = vmatprep.mubr.msk.bf16.mxu0 %vm412_vm4, %v14022_v31  ;;  %11485 = vmatpush3.bf16.msra.mxu0 %v12347_v34 }
 0x67d   : > { %11486 = vmatprep.subr.bf16.mxu0 %v12348_v36 }
 0x680   : > { %11487 = vmatpush3.bf16.msra.mxu0 %v12348_v36 }
 0x681   : > { %11504 = vmatprep.subr.bf16.mxu0 %v12349_v21 }
 0x683   : > { %11473 = vmatmul.mubr.msk.bf16.gmra.mrb[200].mxu0 %vm412_vm4, %v14024_v56 }
 0x684   : > { %11476 = vmatprep.mubr.msk.bf16.mxu0 %vm412_vm4, %v14030_v2 }
 0x68b   : > { %11477 = vmatmul.mubr.msk.bf16.gmra.mrb[204].mxu0 %vm412_vm4, %v8234_v12 }
 0x68c   : > { %11488 = vmatprep.mubr.msk.bf16.mxu0 %vm412_vm4, %v13957_v1  ;;  %v12352_v1 = vld [vmem:[%s14436_s5 + $0xf8] sm:$0xff]  }
 0x693   : > { %11489 = vmatmul.mubr.msk.bf16.vlgmr.msra.gmra.mrb[192].mxu0 %vm412_vm4, %v13967_v30  ;;  %v12353_v30 = vld [vmem:[%s14436_s5 + $0x100] sm:$0xff]  }
 0x694   : > { %11505 = vmatpush3.bf16.msra.mxu0 %v12349_v21  ;;  %11492 = vmatprep.mubr.msk.bf16.mxu0 %vm412_vm4, %v13972_v50  ;;  %v8419_v50 = vld [vmem:[#allocation3 + $0x9f] sm:$0xff] }
 0x695   : > { %11506 = vmatprep.subr.bf16.mxu0 %v12350_v35 }
 0x698   : > { %11507 = vmatpush3.bf16.msra.mxu0 %v12350_v35 }
 0x699   : > { %11508 = vmatprep.subr.bf16.mxu0 %v12351_v32 }
 0x69b   : > { %11493 = vmatmul.mubr.msk.bf16.gmra.mrb[196].mxu0 %vm412_vm4, %v13981_v13  ;;  %v8428_v13 = vpack.c.bf16 %v8420_v57, %v8419_v50  ;;  %v9070_v57 = vand.u32 7, %v9062_v14 }
 0x69c   : > { %11496 = vmatprep.mubr.msk.bf16.mxu0 %vm412_vm4, %v13983_v61  ;;  %11509 = vmatpush3.bf16.msra.mxu0 %v12351_v32  ;;  %v8615_v61 = vpack.c.bf16 %v8600_v10, %v8599_v55  ;;  %v9064_v10 = vadd.s32 16, %v9062_v14 }
 0x69d   : > { %11510 = vmatprep.subr.bf16.mxu0 %v12352_v1  ;;  %vm9114_vm5 = vcmp.lt.s32.totalorder %v9070_v57, 4  ;;  %v10082_v57 = vld [vmem:[%s14438_s7 + $0x70] sm:$0xff] }
 0x6a0   : > { %11511 = vmatpush3.bf16.msra.mxu0 %v12352_v1 }
 0x6a1   : > { %11528 = vmatprep.subr.bf16.mxu0 %v12353_v30 }
 0x6a3   : > { %11497 = vmatmul.mubr.msk.bf16.gmra.mrb[200].mxu0 %vm412_vm4, %v13989_v20  ;;  %v12354_v20 = vld [vmem:[%s14436_s5 + $0x108] sm:$0xff]  }
 0x6a4   : > { %11500 = vmatprep.mubr.msk.bf16.mxu0 %vm412_vm4, %v14060_v40 }
 0x6ab   : > { %11501 = vmatmul.mubr.msk.bf16.gmra.mrb[204].mxu0 %vm412_vm4, %v8428_v13 }
 0x6ac   : > { %11512 = vmatprep.mubr.msk.bf16.mxu0 %vm412_vm4, %v8615_v61 }
 0x6b3   : > { %11513 = vmatmul.mubr.msk.bf16.vlgmr.msra.gmra.mrb[192].mxu0 %vm412_vm4, %v8616_v54 }
 0x6b4   : > { %11529 = vmatpush3.bf16.msra.mxu0 %v12353_v30  ;;  %11516 = vmatprep.mubr.msk.bf16.mxu0 %vm412_vm4, %v13903_v48  ;;  %v8613_v48 = vld [vmem:[#allocation3 + $0xa0] sm:$0xff] }
 0x6b5   : > { %11530 = vmatprep.subr.bf16.mxu0 %v12354_v20  ;;  %v8622_v25 = vpack.c.bf16 %v8614_v28, %v8613_v48 }
 0x6b8   : > { %11531 = vmatpush3.bf16.msra.mxu0 %v12354_v20 }
 0x6b9   : > { %11532 = vmatprep.subr.bf16.mxu0 %v12355_v51 }
 0x6bb   : > { %11517 = vmatmul.mubr.msk.bf16.gmra.mrb[196].mxu0 %vm412_vm4, %v13918_v11  ;;  %v8807_v11 = vld [vmem:[#allocation3 + $0xa1] sm:$0xff] }
 0x6bc   : > { %11520 = vmatprep.mubr.msk.bf16.mxu0 %vm412_vm4, %v13933_v22  ;;  %11533 = vmatpush3.bf16.msra.mxu0 %v12355_v51  ;;  %v8808_v22 = vld [vmem:[#allocation3 + $0xa9] sm:$0xff]  ;;  %v9065_v51 = vadd.s32 24, %v9062_v14 }
 0x6bd   : > { %11534 = vmatprep.subr.bf16.mxu0 %v12356_v58 }
 0x6c0   : > { %11535 = vmatpush3.bf16.msra.mxu0 %v12356_v58 }
 0x6c3   : > { %11521 = vmatmul.mubr.msk.bf16.gmra.mrb[200].mxu0 %vm412_vm4, %v13946_v17  ;;  %v8816_v17 = vpack.c.bf16 %v8808_v22, %v8807_v11 }
 0x6c4   : > { %11524 = vmatprep.mubr.msk.bf16.mxu0 %vm412_vm4, %v14090_v0 }
 0x6cb   : > { %11525 = vmatmul.mubr.msk.bf16.gmra.mrb[204].mxu0 %vm412_vm4, %v8622_v25 }
 0x6cc   : > { %11536 = vmatprep.mubr.msk.bf16.mxu0 %vm412_vm4, %v13999_v29 }
 0x6d3   : > { %11537 = vmatmul.mubr.msk.bf16.vlgmr.msra.gmra.mrb[192].mxu0 %vm412_vm4, %v14008_v37 }
 0x6d4   : > { %11540 = vmatprep.mubr.msk.bf16.mxu0 %vm412_vm4, %v14013_v38 }
 0x6db   : > { %11541 = vmatmul.mubr.msk.bf16.gmra.mrb[196].mxu0 %vm412_vm4, %v14022_v31 }
 0x6dc   : > { %11544 = vmatprep.mubr.msk.bf16.mxu0 %vm412_vm4, %v14024_v56 }
 0x6e3   : > { %11545 = vmatmul.mubr.msk.bf16.gmra.mrb[200].mxu0 %vm412_vm4, %v14030_v2 }
 0x6e4   : > { %11548 = vmatprep.mubr.msk.bf16.mxu0 %vm412_vm4, %v8234_v12  ;;  %v9063_v12 = vadd.s32 8, %v9062_v14  ;;  %v10089_v14 = vld [vmem:[%s14438_s7 + $0xa8] sm:$0xff] }
 0x6e6   : > { %v9077_v61 = vand.u32 7, %v9063_v12 }
 0x6e8   : > { %vm9115_vm6 = vcmp.lt.s32.totalorder %v9077_v61, 4 }
 0x6eb   : > { %11549 = vmatmul.mubr.msk.bf16.gmra.mrb[204].mxu0 %vm412_vm4, %v8816_v17 }
 0x7a6   : > { %v11538_v5 = vpop.f32.mrb[192].mxu0 }
 0x7a7   : > { %v8996_v29 = vadd.f32 %v11538_v5, %v14187_v59  ;;  %v8908_v44 = vpop.f32.mrb[193].mxu0 }
 0x7a8   : > { %v8994_v45 = vadd.f32 %v14187_v59, %v8908_v44  ;;  %v11539_v9 = vpop.f32.mrb[194].mxu0  ;;  %v10076_v44 = vld [vmem:[%s14438_s7 + $0x40] sm:$0xff] }
 0x7a9   : > { %v9012_v18 = vmax.f32 %v8996_v29, 0.0  ;;  %v8997_v37 = vadd.f32 %v11539_v9, %v14187_v59  ;;  %v8911_v63 = vpop.f32.mrb[195].mxu0  ;;  %v9084_v9 = vand.u32 7, %v9064_v10 }
 0x7aa   : > { %v9010_v41 = vmax.f32 %v8994_v45, 0.0  ;;  %v8995_v38 = vadd.f32 %v14187_v59, %v8911_v63  ;;  %v10080_v63 = vld [vmem:[%s14438_s7 + $0x60] sm:$0xff] }
 0x7ab   : > { %v9013_v26 = vmax.f32 %v8997_v37, 0.0  ;;  %v9125_v37 = vld [vmem:[%s14438_s7] sm:$0xff]  ;;  %vm14250_vm7 = vcmp.lt.s32.totalorder %v9084_v9, 4 }
 0x7ac   : > { %v9026_v15 = vmax.f32 %v9010_v41, %v9012_v18  ;;  %v9011_v19 = vmax.f32 %v8995_v38, 0.0  ;;  %v9091_v18 = vand.u32 7, %v9065_v51 }
 0x7ae   : > { %9034 = vst [vmem:[#allocation6] sm:$0xff] %v9026_v15  ;;  %v9027_v24 = vmax.f32 %v9011_v19, %v9013_v26  ;;  %v11542_v31 = vpop.f32.mrb[196].mxu0  ;;  %v10088_v15 = vld [vmem:[%s14438_s7 + $0xa0] sm:$0xff]  ;;  %vm14254_vm8 = vcmp.lt.s32.totalorder %v9091_v18, 4 }
 0x7af   : > { %v9000_v46 = vadd.f32 %v11542_v31, %v14187_v59  ;;  %v8924_v56 = vpop.f32.mrb[197].mxu0  ;;  %v10084_v19 = vld [vmem:[%s14438_s7 + $0x80] sm:$0xff] }
 0x7b0   : > { %9035 = vst [vmem:[#allocation6 + $0x8] sm:$0xff] %v9027_v24  ;;  %v8998_v8 = vadd.f32 %v14187_v59, %v8924_v56  ;;  %v11543_v62 = vpop.f32.mrb[198].mxu0  ;;  %v10096_v24 = vld [vmem:[%s14438_s7 + $0xe0] sm:$0xff]  ;;  %v10077_v56 = vld [vmem:[%s14438_s7 + $0x48] sm:$0xff] }
 0x7b1   : > { %v9016_v2 = vmax.f32 %v9000_v46, 0.0  ;;  %v9001_v16 = vadd.f32 %v11543_v62, %v14187_v59  ;;  %v8927_v39 = vpop.f32.mrb[199].mxu0  ;;  %v10092_v31 = vld [vmem:[%s14438_s7 + $0xc0] sm:$0xff] }
 0x7b2   : > { %v9014_v23 = vmax.f32 %v8998_v8, 0.0  ;;  %v8999_v27 = vadd.f32 %v14187_v59, %v8927_v39  ;;  %v9126_v8 = vld [vmem:[%s14438_s7 + $0x8] sm:$0xff]  ;;  %v10104_v62 = vld [vmem:[%s14438_s7 + $0x120] sm:$0xff] }
 0x7b3   : > { %v9017_v3 = vmax.f32 %v9001_v16, 0.0  ;;  %v10081_v16 = vld [vmem:[%s14438_s7 + $0x68] sm:$0xff] }
 0x7b4   : > { %v9028_v33 = vmax.f32 %v9014_v23, %v9016_v2  ;;  %v9015_v40 = vmax.f32 %v8999_v27, 0.0  ;;  %v10073_v39 = vld [vmem:[%s14438_s7 + $0x28] sm:$0xff]  ;;  %v10100_v23 = vld [vmem:[%s14438_s7 + $0x100] sm:$0xff] }
 0x7b6   : > { %9036 = vst [vmem:[#allocation6 + $0x10] sm:$0xff] %v9028_v33  ;;  %v9029_v52 = vmax.f32 %v9015_v40, %v9017_v3  ;;  %v11546_v6 = vpop.f32.mrb[200].mxu0 }
 0x7b7   : > { %v9004_v4 = vadd.f32 %v11546_v6, %v14187_v59  ;;  %v8940_v49 = vpop.f32.mrb[201].mxu0  ;;  %v9042_v30 = vld [vmem:[#allocation6] ss:$2 sm:$0xff]  ;;  %v9050_v50 = vld [vmem:[#allocation6 + $0x1] ss:$2 sm:$0xff] }
 0x7b8   : > { %9037 = vst [vmem:[#allocation6 + $0x18] sm:$0xff] %v9029_v52  ;;  %v9002_v60 = vadd.f32 %v14187_v59, %v8940_v49  ;;  %v11547_v0 = vpop.f32.mrb[202].mxu0  ;;  %v9057_v58 = vmax.f32 %v9042_v30, %v9050_v50 }
 0x7b9   : > { %v9020_v34 = vmax.f32 %v9004_v4, 0.0  ;;  %v9005_v36 = vadd.f32 %v11547_v0, %v14187_v59  ;;  %v8943_v21 = vpop.f32.mrb[203].mxu0 }
 0x7ba   : > { %v9018_v7 = vmax.f32 %v9002_v60, 0.0  ;;  %v9003_v43 = vadd.f32 %v14187_v59, %v8943_v21  ;;  %v9118_v26 = vsel %vm9114_vm5, %v9057_v58, 0.0  ;;  %v10078_v21 = vld [vmem:[%s14438_s7 + $0x50] sm:$0xff] }
 0x7bb   : > { %v9021_v35 = vmax.f32 %v9005_v36, 0.0  ;;  %v9175_v52 = vmul.f32 %v10076_v44, %v9118_v26  ;;  %v9129_v6 = vmul.f32 %v9125_v37, %v9118_v26  ;;  %v9198_v60 = vmul.f32 %v10080_v63, %v9118_v26  ;;  %v10097_v36 = vld [vmem:[%s14438_s7 + $0xe8] sm:$0xff]  ;;  %v10098_v58 = vld [vmem:[%s14438_s7 + $0xf0] sm:$0xff] }
 0x7bc   : > { %v9030_v32 = vmax.f32 %v9018_v7, %v9020_v34  ;;  %v9019_v1 = vmax.f32 %v9003_v43, 0.0  ;;  %v10085_v34 = vld [vmem:[%s14438_s7 + $0x88] sm:$0xff]  ;;  %v9127_v7 = vld [vmem:[%s14438_s7 + $0x10] sm:$0xff]  ;;  %v9244_v43 = vmul.f32 %v10088_v15, %v9118_v26  ;;  %v9221_v12 = vmul.f32 %v10084_v19, %v9118_v26 }
 0x7bd   : > { %v14291_v10 = vmul.f32 %v10104_v62, %v9118_v26  ;;  %v14293_v61 = vmul.f32 %v10100_v23, %v9118_v26  ;;  %v10075_v62 = vld [vmem:[%s14438_s7 + $0x38] sm:$0xff] }
 0x7be   : > { %9038 = vst [vmem:[#allocation6 + $0x20] sm:$0xff] %v9030_v32  ;;  %v9031_v13 = vmax.f32 %v9019_v1, %v9021_v35  ;;  %v11550_v55 = vpop.f32.mrb[204].mxu0  ;;  %v9290_v35 = vmul.f32 %v10096_v24, %v9118_v26  ;;  %v10093_v32 = vld [vmem:[%s14438_s7 + $0xc8] sm:$0xff]  ;;  %v9267_v1 = vmul.f32 %v10092_v31, %v9118_v26 }
 0x7bf   : > { %v9044_v42 = vld [vmem:[#allocation6 + $0x10] ss:$2 sm:$0xff]  ;;  %v9052_v53 = vld [vmem:[#allocation6 + $0x11] ss:$2 sm:$0xff]  ;;  %v9008_v54 = vadd.f32 %v11550_v55, %v14187_v59  ;;  %v8956_v20 = vpop.f32.mrb[205].mxu0 }
 0x7c0   : > { %9039 = vst [vmem:[#allocation6 + $0x28] sm:$0xff] %v9031_v13  ;;  %v9006_v48 = vadd.f32 %v14187_v59, %v8956_v20  ;;  %v11551_v28 = vpop.f32.mrb[206].mxu0  ;;  %v9058_v25 = vmax.f32 %v9044_v42, %v9052_v53  ;;  %v10074_v13 = vld [vmem:[%s14438_s7 + $0x30] sm:$0xff] }
 0x7c1   : > { %v9024_v11 = vmax.f32 %v9008_v54, 0.0  ;;  %v9009_v22 = vadd.f32 %v11551_v28, %v14187_v59  ;;  %v8959_v17 = vpop.f32.mrb[207].mxu0  ;;  %v10090_v55 = vld [vmem:[%s14438_s7 + $0xb0] sm:$0xff] }
 0x7c2   : > { %v9022_v5 = vmax.f32 %v9006_v48, 0.0  ;;  %v9007_v29 = vadd.f32 %v14187_v59, %v8959_v17  ;;  %v10072_v59 = vld [vmem:[%s14438_s7 + $0x20] sm:$0xff]  ;;  %v14230_v46 = vsel %vm9115_vm6, %v9058_v25, 0.0  ;;  %v10086_v20 = vld [vmem:[%s14438_s7 + $0x90] sm:$0xff] }
 0x7c3   : > { %v9025_v45 = vmax.f32 %v9009_v22, 0.0  ;;  %v9176_v49 = vmul.f32 %v10077_v56, %v14230_v46  ;;  %v9152_v0 = vmul.f32 %v10072_v59, %v9118_v26  ;;  %v9130_v50 = vmul.f32 %v9126_v8, %v14230_v46  ;;  %v10094_v48 = vld [vmem:[%s14438_s7 + $0xd0] sm:$0xff]  ;;  %v10083_v8 = vld [vmem:[%s14438_s7 + $0x78] sm:$0xff] }
 0x7c4   : > { %v9032_v41 = vmax.f32 %v9022_v5, %v9024_v11  ;;  %v9023_v38 = vmax.f32 %v9007_v29, 0.0  ;;  %v9199_v42 = vmul.f32 %v10081_v16, %v14230_v46  ;;  %v9153_v53 = vmul.f32 %v10073_v39, %v14230_v46 }
 0x7c5   : > { %v9245_v54 = vmul.f32 %v10089_v14, %v14230_v46  ;;  %v9222_v51 = vmul.f32 %v10085_v34, %v14230_v46  ;;  %v9179_v25 = vadd.f32 %v9176_v49, %v9175_v52  ;;  %v9291_v11 = vmul.f32 %v10097_v36, %v14230_v46  ;;  %v10087_v52 = vld [vmem:[%s14438_s7 + $0x98] sm:$0xff] }
 0x7c6   : > { %9040 = vst [vmem:[#allocation6 + $0x30] sm:$0xff] %v9032_v41  ;;  %v9033_v2 = vmax.f32 %v9023_v38, %v9025_v45  ;;  %v9268_v22 = vmul.f32 %v10093_v32, %v14230_v46  ;;  %v10079_v45 = vld [vmem:[%s14438_s7 + $0x58] sm:$0xff]  ;;  %v9133_v9 = vadd.f32 %v9130_v50, %v9129_v6  ;;  %v9202_v26 = vadd.f32 %v9199_v42, %v9198_v60 }
 0x7c7   : > { %v9046_v27 = vld [vmem:[#allocation6 + $0x20] ss:$2 sm:$0xff]  ;;  %v9054_v3 = vld [vmem:[#allocation6 + $0x21] ss:$2 sm:$0xff]  ;;  %v9128_v38 = vld [vmem:[%s14438_s7 + $0x18] sm:$0xff]  ;;  %v9156_v15 = vadd.f32 %v9153_v53, %v9152_v0  ;;  %v9248_v19 = vadd.f32 %v9245_v54, %v9244_v43  ;;  %v9225_v24 = vadd.f32 %v9222_v51, %v9221_v12  ;;  %v9294_v16 = vadd.f32 %v9291_v11, %v9290_v35 }
 0x7c8   : > { %v9059_v4 = vmax.f32 %v9046_v27, %v9054_v3  ;;  %9041 = vst [vmem:[#allocation6 + $0x38] sm:$0xff] %v9033_v2  ;;  %v10091_v2 = vld [vmem:[%s14438_s7 + $0xb8] sm:$0xff]  ;;  %v9271_v39 = vadd.f32 %v9268_v22, %v9267_v1 }
 0x7c9   : > { %v10099_v6 = vld [vmem:[%s14438_s7 + $0xf8] sm:$0xff] }
 0x7ca   : > { %v14279_v30 = vsel %vm14250_vm7, %v9059_v4, 0.0  ;;  %v10095_v4 = vld [vmem:[%s14438_s7 + $0xd8] sm:$0xff] }
 0x7cb   : > { %v9177_v28 = vmul.f32 %v10078_v21, %v14279_v30  ;;  %v9131_v17 = vmul.f32 %v9127_v7, %v14279_v30  ;;  %v9200_v5 = vmul.f32 %v10082_v57, %v14279_v30  ;;  %v9154_v29 = vmul.f32 %v10074_v13, %v14279_v30 }
 0x7cc   : > { %v9246_v44 = vmul.f32 %v10090_v55, %v14279_v30  ;;  %v9223_v18 = vmul.f32 %v10086_v20, %v14279_v30  ;;  %v9292_v37 = vmul.f32 %v10098_v58, %v14279_v30  ;;  %v9269_v63 = vmul.f32 %v10094_v48, %v14279_v30  ;;  %v10105_v48 = vld [vmem:[%s14438_s7 + $0x128] sm:$0xff] }
 0x7cd   : > { %v9180_v56 = vadd.f32 %v9179_v25, %v9177_v28  ;;  %v9134_v23 = vadd.f32 %v9133_v9, %v9131_v17  ;;  %v9203_v27 = vadd.f32 %v9202_v26, %v9200_v5  ;;  %v9157_v3 = vadd.f32 %v9156_v15, %v9154_v29  ;;  %v10101_v28 = vld [vmem:[%s14438_s7 + $0x108] sm:$0xff]  ;;  %v10106_v15 = vld [vmem:[%s14438_s7 + $0x130] sm:$0xff] }
 0x7ce   : > { %v9249_v33 = vadd.f32 %v9248_v19, %v9246_v44  ;;  %v9226_v60 = vadd.f32 %v9225_v24, %v9223_v18  ;;  %v9295_v0 = vadd.f32 %v9294_v16, %v9292_v37  ;;  %v9272_v14 = vadd.f32 %v9271_v39, %v9269_v63 }
 0x7cf   : > { %v9048_v59 = vld [vmem:[#allocation6 + $0x30] ss:$2 sm:$0xff]  ;;  %v9056_v41 = vld [vmem:[#allocation6 + $0x31] ss:$2 sm:$0xff]  ;;  %v9337_v37 = vmul.f32 %v10105_v48, %v14230_v46  ;;  %v9314_v63 = vmul.f32 %v10101_v28, %v14230_v46  ;;  %v9338_v39 = vmul.f32 %v10106_v15, %v14279_v30 }
 0x7d0   : > { %v9060_v31 = vmax.f32 %v9048_v59, %v9056_v41 }
 0x7d2   : > { %v14344_v49 = vsel %vm14254_vm8, %v9060_v31, 0.0 }
 0x7d3   : > { %v9178_v34 = vmul.f32 %v10079_v45, %v14344_v49  ;;  %v9132_v36 = vmul.f32 %v9128_v38, %v14344_v49  ;;  %v9201_v21 = vmul.f32 %v10083_v8, %v14344_v49  ;;  %v9155_v7 = vmul.f32 %v10075_v62, %v14344_v49  ;;  %v10102_v8 = vld [vmem:[%s14438_s7 + $0x110] sm:$0xff] }
 0x7d4   : > { %v9247_v43 = vmul.f32 %v10091_v2, %v14344_v49  ;;  %v9224_v12 = vmul.f32 %v10087_v52, %v14344_v49  ;;  %v9293_v35 = vmul.f32 %v10099_v6, %v14344_v49  ;;  %v9270_v40 = vmul.f32 %v10095_v4, %v14344_v49 }
 0x7d5   : > { %v9181_v32 = vadd.f32 %v9180_v56, %v9178_v34  ;;  %v9135_v1 = vadd.f32 %v9134_v23, %v9132_v36  ;;  %v9204_v50 = vadd.f32 %v9203_v27, %v9201_v21  ;;  %v9158_v57 = vadd.f32 %v9157_v3, %v9155_v7  ;;  %v10103_v34 = vld [vmem:[%s14438_s7 + $0x118] sm:$0xff] }
 0x7d6   : > { %v9250_v13 = vadd.f32 %v9249_v33, %v9247_v43  ;;  %v9227_v55 = vadd.f32 %v9226_v60, %v9224_v12  ;;  %v9296_v42 = vadd.f32 %v9295_v0, %v9293_v35  ;;  %v9273_v53 = vadd.f32 %v9272_v14, %v9270_v40  ;;  %v10107_v14 = vld [vmem:[%s14438_s7 + $0x138] sm:$0xff] }
 0x7d7   : > { %v9182_v54 = vrot.slane %v9181_v32, 4  ;;  %v9136_v20 = vrot.slane %v9135_v1, 4  ;;  %v9205_v51 = vrot.slane %v9204_v50, 4  ;;  %v9159_v58 = vrot.slane %v9158_v57, 4 }
 0x7d8   : > { %v9251_v25 = vrot.slane %v9250_v13, 4  ;;  %v9228_v11 = vrot.slane %v9227_v55, 4  ;;  %v9297_v22 = vrot.slane %v9296_v42, 4  ;;  %v9274_v17 = vrot.slane %v9273_v53, 4 }
 0x7d9   : > { %v9183_v5 = vadd.f32 %v9182_v54, %v9181_v32  ;;  %v9137_v29 = vadd.f32 %v9136_v20, %v9135_v1  ;;  %v9206_v44 = vadd.f32 %v9205_v51, %v9204_v50  ;;  %v9160_v45 = vadd.f32 %v9159_v58, %v9158_v57 }
 0x7da   : > { %v9252_v9 = vadd.f32 %v9251_v25, %v9250_v13  ;;  %v9229_v18 = vadd.f32 %v9228_v11, %v9227_v55  ;;  %v9298_v31 = vadd.f32 %v9297_v22, %v9296_v42  ;;  %v9275_v56 = vadd.f32 %v9274_v17, %v9273_v53 }
 0x7db   : > { %v9184_v59 = vrot.slane %v9183_v5, 2  ;;  %v9138_v41 = vrot.slane %v9137_v29, 2  ;;  %v9207_v38 = vrot.slane %v9206_v44, 2  ;;  %v9161_v26 = vrot.slane %v9160_v45, 2 }
 0x7dc   : > { %v9253_v19 = vrot.slane %v9252_v9, 2  ;;  %v9230_v24 = vrot.slane %v9229_v18, 2  ;;  %v9340_v23 = vadd.f32 %v9337_v37, %v14291_v10  ;;  %v9315_v33 = vmul.f32 %v10102_v8, %v14279_v30 }
 0x7dd   : > { %v9185_v62 = vadd.f32 %v9184_v59, %v9183_v5  ;;  %v9139_v2 = vadd.f32 %v9138_v41, %v9137_v29  ;;  %v9208_v16 = vadd.f32 %v9207_v38, %v9206_v44  ;;  %v9162_v46 = vadd.f32 %v9161_v26, %v9160_v45  ;;  %v9124_v59 = vld [vmem:[%s14439_s8] sm:$0x1] }
 0x7de   : > { %v9317_v52 = vadd.f32 %v9314_v63, %v14293_v61  ;;  %v9254_v6 = vadd.f32 %v9253_v19, %v9252_v9  ;;  %v9231_v4 = vadd.f32 %v9230_v24, %v9229_v18  ;;  %v9299_v60 = vrot.slane %v9298_v31, 2 }
 0x7df   : > { %v9186_v27 = vrot.slane %v9185_v62, 1  ;;  %v9140_v3 = vrot.slane %v9139_v2, 1  ;;  %v9276_v0 = vrot.slane %v9275_v56, 2  ;;  %v9209_v21 = vrot.slane %v9208_v16, 1 }
 0x7e0   : > { %v9163_v7 = vrot.slane %v9162_v46, 1  ;;  %v9341_v43 = vadd.f32 %v9340_v23, %v9338_v39  ;;  %v9339_v30 = vmul.f32 %v10107_v14, %v14344_v49  ;;  %v9316_v61 = vmul.f32 %v10103_v34, %v14344_v49 }
 0x7e1   : > { %v9187_v36 = vadd.f32 %v9186_v27, %v9185_v62  ;;  %v9141_v10 = vadd.f32 %v9140_v3, %v9139_v2  ;;  %v9318_v12 = vadd.f32 %v9317_v52, %v9315_v33  ;;  %v9255_v35 = vrot.slane %v9254_v6, 1 }
 0x7e2   : > { %v9232_v40 = vrot.slane %v9231_v4, 1  ;;  %v9300_v32 = vadd.f32 %v9299_v60, %v9298_v31  ;;  %v9277_v1 = vadd.f32 %v9276_v0, %v9275_v56  ;;  %v9210_v50 = vadd.f32 %v9209_v21, %v9208_v16 }
 0x7e3   : > { %9188 = vadd.xlane.f32.xlu1 %v9187_v36  ;;  %9142 = vadd.xlane.f32.xlu0 %v9141_v10  ;;  %v9164_v57 = vadd.f32 %v9163_v7, %v9162_v46  ;;  %v9342_v13 = vadd.f32 %v9341_v43, %v9339_v30  ;;  %v9319_v55 = vadd.f32 %v9318_v12, %v9316_v61  ;;  %v9123_v18 = vand.u32 127, %v9061_v47 }
 0x7e4   : > { %v9301_v54 = vrot.slane %v9300_v32, 1  ;;  %v9278_v20 = vrot.slane %v9277_v1, 1  ;;  %v9256_v51 = vadd.f32 %v9255_v35, %v9254_v6  ;;  %v9233_v58 = vadd.f32 %v9232_v40, %v9231_v4 }
 0x7e5   : > { %v9343_v42 = vrot.slane %v9342_v13, 4  ;;  %v9320_v53 = vrot.slane %v9319_v55, 4  ;;  %vm9144_vm9 = vcmp.eq.s32.totalorder %v9123_v18, 0  ;;  %vm9167_vm10 = vcmp.eq.s32.totalorder %v9123_v18, 1 }
 0x7e6   : > { %v9302_v11 = vadd.f32 %v9301_v54, %v9300_v32  ;;  %v9279_v22 = vadd.f32 %v9278_v20, %v9277_v1  ;;  %vm9190_vm11 = vcmp.eq.s32.totalorder %v9123_v18, 2  ;;  %vm9213_vm12 = vcmp.eq.s32.totalorder %v9123_v18, 3 }
 0x7e7   : > { %9211 = vadd.xlane.f32.xlu1 %v9210_v50  ;;  %9165 = vadd.xlane.f32.xlu0 %v9164_v57  ;;  %v9344_v48 = vadd.f32 %v9343_v42, %v9342_v13  ;;  %v9321_v28 = vadd.f32 %v9320_v53, %v9319_v55  ;;  %vm9236_vm13 = vcmp.eq.s32.totalorder %v9123_v18, 4  ;;  %vm9259_vm14 = vcmp.eq.s32.totalorder %v9123_v18, 5 }
 0x7e8   : > { %vm9282_vm15 = vcmp.eq.s32.totalorder %v9123_v18, 6  ;;  %vm9305_vm0 = vcmp.eq.s32.totalorder %v9123_v18, 7  ;;  %vm9328_vm1 = vcmp.eq.s32.totalorder %v9123_v18, 8  ;;  %vm9351_vm2 = vcmp.eq.s32.totalorder %v9123_v18, 9 }
 0x7e9   : > { %v9345_v49 = vrot.slane %v9344_v48, 2  ;;  %v9322_v25 = vrot.slane %v9321_v28, 2 }
 0x7eb   : > { %9257 = vadd.xlane.f32.xlu1 %v9256_v51  ;;  %9234 = vadd.xlane.f32.xlu0 %v9233_v58  ;;  %v9346_v17 = vadd.f32 %v9345_v49, %v9344_v48  ;;  %v9323_v5 = vadd.f32 %v9322_v25, %v9321_v28 }
 0x7ed   : > { %v9347_v29 = vrot.slane %v9346_v17, 1  ;;  %v9324_v44 = vrot.slane %v9323_v5, 1 }
 0x7ef   : > { %9303 = vadd.xlane.f32.xlu1 %v9302_v11  ;;  %9280 = vadd.xlane.f32.xlu0 %v9279_v22  ;;  %v9348_v45 = vadd.f32 %v9347_v29, %v9346_v17  ;;  %v9325_v9 = vadd.f32 %v9324_v44, %v9323_v5 }
 0x7f3   : > { %9349 = vadd.xlane.f32.xlu1 %v9348_v45  ;;  %9326 = vadd.xlane.f32.xlu0 %v9325_v9 }
 0x870   : > { %v9189_v37 = vpop.xlane.xlu1 %9188  ;;  %v9143_v63 = vpop.xlane.xlu0 %9142 }
 0x871   : > { %v9145_v41 = vsel %vm9144_vm9, %v9143_v63, 0.0  ;;  %v9191_v31 = vsel %vm9190_vm11, %v9189_v37, 0.0 }
 0x872   : > { %v9146_v38 = vadd.f32 %v9145_v41, %v9124_v59 }
 0x874   : > { %v9212_v26 = vpop.xlane.xlu1 %9211  ;;  %v9166_v15 = vpop.xlane.xlu0 %9165 }
 0x875   : > { %v9168_v19 = vsel %vm9167_vm10, %v9166_v15, 0.0  ;;  %v9214_v62 = vsel %vm9213_vm12, %v9212_v26, 0.0 }
 0x876   : > { %v9169_v24 = vadd.f32 %v9168_v19, %v9146_v38 }
 0x878   : > { %v9192_v56 = vadd.f32 %v9191_v31, %v9169_v24  ;;  %v9258_v47 = vpop.xlane.xlu1 %9257  ;;  %v9235_v8 = vpop.xlane.xlu0 %9234 }
 0x879   : > { %v9237_v16 = vsel %vm9236_vm13, %v9235_v8, 0.0  ;;  %v9260_v27 = vsel %vm9259_vm14, %v9258_v47, 0.0 }
 0x87a   : > { %v9215_v2 = vadd.f32 %v9214_v62, %v9192_v56 }
 0x87c   : > { %v9238_v46 = vadd.f32 %v9237_v16, %v9215_v2  ;;  %v9304_v39 = vpop.xlane.xlu1 %9303  ;;  %v9281_v23 = vpop.xlane.xlu0 %9280 }
 0x87d   : > { %v9283_v33 = vsel %vm9282_vm15, %v9281_v23, 0.0  ;;  %v9306_v4 = vsel %vm9305_vm0, %v9304_v39, 0.0 }
 0x87e   : > { %v9261_v3 = vadd.f32 %v9260_v27, %v9238_v46 }
 0x880   : > { %v9284_v52 = vadd.f32 %v9283_v33, %v9261_v3  ;;  %v9327_v6 = vpop.xlane.xlu0 %9326  ;;  %v9350_v60 = vpop.xlane.xlu1 %9349 }
 0x881   : > { %v9329_v14 = vsel %vm9328_vm1, %v9327_v6, 0.0  ;;  %v9352_v36 = vsel %vm9351_vm2, %v9350_v60, 0.0 }
 0x882   : > { %v9307_v0 = vadd.f32 %v9306_v4, %v9284_v52 }
 0x884   : > { %v9330_v34 = vadd.f32 %v9329_v14, %v9307_v0 }
 0x886   : > { %v9353_v10 = vadd.f32 %v9352_v36, %v9330_v34 }
 0x888   : > { %9354 = vst [vmem:[%s324_s14] sm:$0x1] %v9353_v10 }
 0x889   : > { %12373 = shalt.err (!%p12370_p3)
}
 0x88a   : > { %s12374_s27 = scalar_lea.hbm %s14389_s22, 16  ;;  %s12378_s14 = scalar_lea.hbm %s14440_s9, 32 }
 0x88b   : > { %p12375_p4 = scmp.ne.s32.totalorder %s14389_s22, %s12374_s27  ;;  %p12379_p9 = scmp.lt.u32.totalorder %s14389_s22, %s14440_s9 }
 0x88c   : > { %p12380_p10 = scmp.lt.u32.totalorder %s12378_s14, %s12374_s27  ;;  %p12382_p12 = scmp.lt.u32.totalorder %s12374_s27, %s14389_s22 }
 0x88d   : > { %p12376_p7 = pnand %p12375_p4, %p12515_p5 }
 0x88e   : > { %p12381_p11 = por %p12380_p10, %p12379_p9 }
 0x88f   : > { %p12377_p8 = pneg %p12376_p7 }
 0x890   : > { %p12383_p13 = por %p12382_p12, %p12381_p11 }
 0x892   : > { %p12384_p0 = pnand %p12383_p13, %p12377_p8 }
 0x894   : > { %12387 = shalt.err (!%p12384_p0)
}
 0x895   : > { %12196 = dma.vmem_to_hbm [thread:$0]  (%p12515_p5), %s14391_s16, 16, %s14389_s22, %s9356_s23  }
 0x896 PF: > { %p12202_p1 = scmp.ge.s32.totalorder %s12422_s12, 2  ;;  %s9380_s24 = sand.u32 1, %s12410_s30  }
 0x897   : > { %s9381_s13 = scalar_lea.sflag [#allocation8], %s9380_s24 }
 0x898   : > { %p12199_p2 = pnand %p12202_p1, %p12519_p6 }
 0x89a   : > { %12405 = dma.done.wait (!%p12199_p2), %s9381_s13, 16  }
 0x89b   : > { %12407 = vsyncadd (!%p12199_p2), %s9381_s13, 4294967280  ;;  %p19_p3 = scmp.ge.s32.totalorder %s12502_s15, 4   ;;  %s14520_s30 = smov %s12414_s10 }
 0x89c   : > { %s14521_s10 = smov %s12418_s11  ;;  %s14522_s11 = smov %s12513_s18 }
 0x89d   : > { %s14523_s12 = smov %s12502_s15  ;;  %21 = sbr.rel (!%p19_p3) target bundleno = 3 (0x3), region = 201 }
 0x8a4   :  { %9385 = vsyncpa [#allocation8], 1 }
 0x8a5   :  { %9387 = vsyncpa [#allocation8 + $0x1], 1 }

</bundles_post_ra>
